<compile_context>
chip_gen: v7x
topology: tpu7x:2x2x1
jax: 0.10.0
libtpu: 0.0.40
codegen_flags: <defaults>
</compile_context>

<pallas_src>
import functools

import jax
import jax.numpy as jnp
from jax.experimental import pallas as pl
from jax.experimental.pallas import tpu as pltpu

EPS = 1e-5  # nn.LayerNorm default


def _ln_over_channels(v, gamma, beta):
    # v: [C, T] (channels on sublanes, time on lanes); gamma/beta: [C, 1].
    mean = jnp.mean(v, axis=0, keepdims=True)
    ctr = v - mean
    var = jnp.mean(ctr * ctr, axis=0, keepdims=True)
    return ctr * jax.lax.rsqrt(var + EPS) * gamma + beta


def _encoder_kernel(x_ref, ctx_ref, dww_ref, pww_ref, vec_ref,
                    o_ref, ctx_out_ref, *win_refs,
                    num_layers, kernel_size, dilations,
                    buf_offsets, buf_lengths, t_tile, use_mxu):
    """All DCC layers, fused, on one lane-dense [C, t_tile] time tile.

    x_ref       : (1, C, t_tile)      non-overlapping input tile
    ctx_ref     : (1, C, ctx_len)     original context buffer (read at j == 0)
    dww_ref     : (L*K, C, 1)         depthwise taps (per layer, per tap)
    pww_ref     : (L, C_out, C_in)    pointwise 1x1 weights, lane-dense on C_in
    vec_ref     : (L*6, C, 1)         dw_b, ln1_g, ln1_b, pw_b, ln2_g, ln2_b
    o_ref       : (1, C, t_tile)      encoder output tile (x + layers)
    ctx_out_ref : (1, C, ctx_len)     updated context buffer (resident block)
    win_refs    : L x VMEM (C, halo_l + t_tile); columns [0, halo_l) carry the
                  previous tile's tail across the sequential time axis.
    """
    j = pl.program_id(1)

    # Seed every layer's halo carry from the context buffer on the first time
    # tile of each batch element.
    @pl.when(j == 0)
    def _():
        for l in range(num_layers):
            off, halo = buf_offsets[l], buf_lengths[l]
            win_refs[l][:, 0:halo] = (
                ctx_ref[0, :, off:off + halo].astype(jnp.float32))

    h = x_ref[0].astype(jnp.float32)                       # [C, t_tile]

    for l in range(num_layers):
        dil, off, halo = dilations[l], buf_offsets[l], buf_lengths[l]
        win = win_refs[l]

        # Window for this tile: [old carry | current layer input].
        win[:, halo:halo + t_tile] = h
        new_carry = win[:, t_tile:t_tile + halo]           # last `halo` samples

        # Depthwise dilated causal conv (valid): y[t] = sum_k w_k * win[t+k*d].
        # TODO(synk): if the bundle shows relayout cost on these unaligned lane
        # slices, switch to pltpu.roll-based shifts (rides the idle XLU slot).
        acc = win[:, 0:t_tile] * dww_ref[l * kernel_size]
        for k in range(1, kernel_size):
            s = k * dil
            acc = acc + win[:, s:s + t_tile] * dww_ref[l * kernel_size + k]

        # Persist carry for the next tile; emit the new ctx slice (resident
        # output block -> only the last tile's write survives per batch).
        win[:, 0:halo] = new_carry
        ctx_out_ref[0, :, off:off + halo] = new_carry.astype(ctx_out_ref.dtype)

        a = acc + vec_ref[l * 6 + 0]                       # depthwise bias
        a = jnp.maximum(
            _ln_over_channels(a, vec_ref[l * 6 + 1], vec_ref[l * 6 + 2]), 0.0)

        # Pointwise (1x1) conv.
        pw = pww_ref[l]                                    # [C_out, C_in]
        if use_mxu:
            # Larger C: f32 MXU matmul (kept f32 to match reference numerics).
            y = jax.lax.dot_general(pw, a, (((1,), (0,)), ((), ())),
                                    preferred_element_type=jnp.float32)
        else:
            # Tiny C: C_in-step lane-dense broadcast FMA on the VPU.
            c_in = a.shape[0]
            y = pw[:, 0:1] * a[0:1, :]
            for c in range(1, c_in):
                y = y + pw[:, c:c + 1] * a[c:c + 1, :]
        y = y + vec_ref[l * 6 + 3]                         # pointwise bias
        y = jnp.maximum(
            _ln_over_channels(y, vec_ref[l * 6 + 4], vec_ref[l * 6 + 5]), 0.0)

        h = h + y                                          # fused residual

    o_ref[0] = h.astype(o_ref.dtype)


def dilated_causal_conv_encoder(x, ctx_buf, layer_params, *, kernel_size=3,
                                max_t_tile=8192,
                                vmem_budget_bytes=20 * 1024 * 1024):
    """Functional DilatedCausalConvEncoder.forward: returns (x_out, new_ctx_buf)."""
    B, C, T = x.shape
    L = len(layer_params)
    K = kernel_size
    dilations = tuple(2 ** i for i in range(L))
    buf_lengths = tuple((K - 1) * d for d in dilations)
    buf_offsets = tuple(int(sum(buf_lengths[:i])) for i in range(L))
    ctx_len = int(sum(buf_lengths))
    assert ctx_buf.shape == (B, C, ctx_len), (ctx_buf.shape, (B, C, ctx_len))

    # Time tile: largest 128-multiple dividing T (cap max_t_tile) that fits a
    # conservative VMEM budget (also safe on v7x's 64 MiB physical VMEM).
    c_pad = -(-C // 8) * 8

    def est_vmem(tt):
        tile = c_pad * tt * 4
        # 2x-buffered in + out blocks, L halo windows, ~6 live f32 temps,
        # plus the grid-invariant weight blocks.
        return (tile * (2 + 2 + L + 6)
                + 4 * (L * K + L * 6) * c_pad * 128 + 4 * L * C * C)

    t_tile = T  # fallback: single (possibly lane-masked) tile if T % 128 != 0
    for cand in (8192, 4096, 2048, 1024, 512, 256, 128):
        if cand <= max_t_tile and T % cand == 0 and est_vmem(cand) <= vmem_budget_bytes:
            t_tile = cand
            break
    n_t = T // t_tile

    # --- parameter packing (all grid-invariant blocks) ---
    dw_w = jnp.stack([p[0] for p in layer_params])                  # [L, C, K]
    dww = jnp.transpose(dw_w, (0, 2, 1)).reshape(L * K, C)[:, :, None]
    pww = jnp.stack([p[4] for p in layer_params])                   # [L, C_out, C_in]
    vecs = jnp.stack(
        [jnp.stack([p[1], p[2], p[3], p[5], p[6], p[7]], axis=0)
         for p in layer_params], axis=0).reshape(L * 6, C)[:, :, None]

    use_mxu = C >= 32   # TODO(synk): retune crossover per generation (lower on v5e).

    kern = functools.partial(
        _encoder_kernel, num_layers=L, kernel_size=K, dilations=dilations,
        buf_offsets=buf_offsets, buf_lengths=buf_lengths, t_tile=t_tile,
        use_mxu=use_mxu)

    cost = pl.CostEstimate(
        flops=int(B * T * L * (2 * K * C + 2 * C * C + 10 * C)),
        transcendentals=int(2 * B * T * L),
        bytes_accessed=int(4 * (2 * B * C * T + 2 * B * C * ctx_len
                                + L * (K * C + 6 * C + C * C))),
    )

    out, new_ctx = pl.pallas_call(
        kern,
        out_shape=(jax.ShapeDtypeStruct((B, C, T), x.dtype),
                   jax.ShapeDtypeStruct((B, C, ctx_len), ctx_buf.dtype)),
        grid_spec=pltpu.PrefetchScalarGridSpec(
            num_scalar_prefetch=0,
            grid=(B, n_t),
            in_specs=[
                pl.BlockSpec((1, C, t_tile), lambda b, j: (b, 0, j)),   # x tiles
                pl.BlockSpec((1, C, ctx_len), lambda b, j: (b, 0, 0)),  # ctx buffer
                pl.BlockSpec((L * K, C, 1), lambda b, j: (0, 0, 0)),    # dw taps
                pl.BlockSpec((L, C, C), lambda b, j: (0, 0, 0)),        # pw weights
                pl.BlockSpec((L * 6, C, 1), lambda b, j: (0, 0, 0)),    # packed vectors
            ],
            out_specs=(
                pl.BlockSpec((1, C, t_tile), lambda b, j: (b, 0, j)),
                pl.BlockSpec((1, C, ctx_len), lambda b, j: (b, 0, 0)),
            ),
            scratch_shapes=[pltpu.VMEM((C, hl + t_tile), jnp.float32)
                            for hl in buf_lengths],
        ),
        compiler_params=pltpu.CompilerParams(
            dimension_semantics=("parallel", "arbitrary"),
            vmem_limit_bytes=32 * 1024 * 1024),
        cost_estimate=cost,
    )(x, ctx_buf, dww, pww, vecs)
    return out, new_ctx


# ----------------------------- pure-JAX reference ---------------------------

def _dsc_reference(x_bct, params, kernel_size, dilation):
    dw_w, dw_b, g1, b1, pw_w, pw_b, g2, b2 = params
    C = x_bct.shape[1]
    y = jax.lax.conv_general_dilated(
        x_bct, dw_w[:, None, :], window_strides=(1,), padding=[(0, 0)],
        rhs_dilation=(dilation,), feature_group_count=C,
        dimension_numbers=("NCH", "OIH", "NCH"))
    y = y + dw_b[None, :, None]

    def ln(v, g, b):
        vt = jnp.transpose(v, (0, 2, 1))
        m = vt.mean(-1, keepdims=True)
        var = ((vt - m) ** 2).mean(-1, keepdims=True)
        o = (vt - m) / jnp.sqrt(var + EPS) * g + b
        return jnp.transpose(o, (0, 2, 1))

    y = jnp.maximum(ln(y, g1, b1), 0.0)
    y = jnp.einsum('bct,oc->bot', y, pw_w) + pw_b[None, :, None]
    y = jnp.maximum(ln(y, g2, b2), 0.0)
    return y


def reference_encoder(x, ctx_buf, layer_params, *, kernel_size=3):
    num_layers = len(layer_params)
    buf_lengths = [(kernel_size - 1) * 2 ** i for i in range(num_layers)]
    buf_indices = [0]
    for i in range(num_layers - 1):
        buf_indices.append(buf_indices[-1] + buf_lengths[i])
    ctx = ctx_buf
    for i, params in enumerate(layer_params):
        s, Lh = buf_indices[i], buf_lengths[i]
        dcc_in = jnp.concatenate([ctx[:, :, s:s + Lh], x], axis=-1)
        ctx = ctx.at[:, :, s:s + Lh].set(dcc_in[:, :, -Lh:])
        x = x + _dsc_reference(dcc_in, params, kernel_size, 2 ** i)
    return x, ctx


if __name__ == "__main__":
    B, C, T = 2, 4, 1024
    num_layers, ksz = 3, 3

    key = jax.random.PRNGKey(0)
    keys = jax.random.split(key, 2 + 8 * num_layers)
    x = jax.random.normal(keys[0], (B, C, T), jnp.float32)
    ctx_len = (ksz - 1) * (2 ** num_layers - 1)
    # torch init_ctx_buf() is zeros; use a nonzero buffer to exercise the ctx path.
    ctx_buf = 0.5 * jax.random.normal(keys[1], (B, C, ctx_len), jnp.float32)

    layer_params = []
    for i in range(num_layers):
        kk = keys[2 + 8 * i: 2 + 8 * (i + 1)]
        dw_w = 0.3 * jax.random.normal(kk[0], (C, ksz), jnp.float32)  # torch [C,1,K] squeezed
        dw_b = 0.1 * jax.random.normal(kk[1], (C,), jnp.float32)
        pw_w = 0.3 * jax.random.normal(kk[2], (C, C), jnp.float32)    # torch [C_out,C_in,1] squeezed
        pw_b = 0.1 * jax.random.normal(kk[3], (C,), jnp.float32)
        g1 = 1.0 + 0.1 * jax.random.normal(kk[4], (C,), jnp.float32)
        b1 = 0.1 * jax.random.normal(kk[5], (C,), jnp.float32)
        g2 = 1.0 + 0.1 * jax.random.normal(kk[6], (C,), jnp.float32)
        b2 = 0.1 * jax.random.normal(kk[7], (C,), jnp.float32)
        layer_params.append((dw_w, dw_b, g1, b1, pw_w, pw_b, g2, b2))
    layer_params = tuple(layer_params)

    ref_out, ref_ctx = reference_encoder(x, ctx_buf, layer_params, kernel_size=ksz)

    # 1) Default tiling (single big time tile at this T).
    run = jax.jit(functools.partial(dilated_causal_conv_encoder, kernel_size=ksz))
    out, new_ctx = jax.block_until_ready(run(x, ctx_buf, layer_params))

    assert out.shape == (B, C, T), out.shape
    assert new_ctx.shape == (B, C, ctx_len), new_ctx.shape
    assert jnp.allclose(out, ref_out, atol=1e-4, rtol=1e-4), \
        float(jnp.max(jnp.abs(out - ref_out)))
    assert jnp.allclose(new_ctx, ref_ctx, atol=1e-4, rtol=1e-4), \
        float(jnp.max(jnp.abs(new_ctx - ref_ctx)))

    # 2) Forced multi-tile run to exercise the in-kernel halo carry path.
    run_tiled = jax.jit(functools.partial(dilated_causal_conv_encoder,
                                          kernel_size=ksz, max_t_tile=256))
    out_t, ctx_t = jax.block_until_ready(run_tiled(x, ctx_buf, layer_params))
    assert jnp.allclose(out_t, ref_out, atol=1e-4, rtol=1e-4), \
        float(jnp.max(jnp.abs(out_t - ref_out)))
    assert jnp.allclose(ctx_t, ref_ctx, atol=1e-4, rtol=1e-4), \
        float(jnp.max(jnp.abs(ctx_t - ref_ctx)))

    print("KERNEL_OK")
</pallas_src>

<mosaic_0001>
module attributes {stable_mosaic.version = 11 : i64} {
  func.func @_encoder_kernel(%arg0: i32, %arg1: i32, %arg2: memref<1x4x1024xf32, #tpu.memory_space<vmem>>, %arg3: memref<1x4x14xf32, #tpu.memory_space<vmem>>, %arg4: memref<9x4x1xf32, #tpu.memory_space<vmem>>, %arg5: memref<3x4x4xf32, #tpu.memory_space<vmem>>, %arg6: memref<18x4x1xf32, #tpu.memory_space<vmem>>, %arg7: memref<1x4x1024xf32, #tpu.memory_space<vmem>>, %arg8: memref<1x4x14xf32, #tpu.memory_space<vmem>>, %arg9: memref<4x1026xf32, #tpu.memory_space<vmem>>, %arg10: memref<4x1028xf32, #tpu.memory_space<vmem>>, %arg11: memref<4x1032xf32, #tpu.memory_space<vmem>>) attributes {dimension_semantics = [#tpu.dimension_semantics<parallel>, #tpu.dimension_semantics<arbitrary>], iteration_bounds = array<i64: 2, 1>, scalar_prefetch = 0 : i64, scratch_operands = 3 : i64, tpu.core_type = #tpu.core_type<tc>, window_params = [{transform_indices = @transform_0, window_bounds = array<i64: 1, 4, 1024>}, {transform_indices = @transform_1, window_bounds = array<i64: 1, 4, 14>}, {pipeline_mode = #tpu.pipeline_mode<synchronous>, transform_indices = @transform_2, window_bounds = array<i64: 9, 4, 1>}, {pipeline_mode = #tpu.pipeline_mode<synchronous>, transform_indices = @transform_3, window_bounds = array<i64: 3, 4, 4>}, {pipeline_mode = #tpu.pipeline_mode<synchronous>, transform_indices = @transform_4, window_bounds = array<i64: 18, 4, 1>}, {transform_indices = @transform_5, window_bounds = array<i64: 1, 4, 1024>}, {transform_indices = @transform_6, window_bounds = array<i64: 1, 4, 14>}]} {
    %c0_i32 = arith.constant 0 : i32
    %0 = arith.cmpi eq, %arg1, %c0_i32 : i32
    %1 = arith.extui %0 : i1 to i32
    %c0_i32_0 = arith.constant 0 : i32
    %2 = arith.cmpi ne, %1, %c0_i32_0 : i32
    scf.if %2 {
      %c0_158 = arith.constant 0 : index
      %c0_159 = arith.constant 0 : index
      %c0_160 = arith.constant 0 : index
      %335 = vector.load %arg3[%c0_158, %c0_159, %c0_160] : memref<1x4x14xf32, #tpu.memory_space<vmem>>, vector<1x4x2xf32>
      %336 = vector.shape_cast %335 : vector<1x4x2xf32> to vector<4x2xf32>
      %c0_161 = arith.constant 0 : index
      %c0_162 = arith.constant 0 : index
      %337 = vector.load %arg9[%c0_161, %c0_162] : memref<4x1026xf32, #tpu.memory_space<vmem>>, vector<4x2xf32>
      tpu.vector_store %arg9[%c0_161, %c0_162], %336 {strides = array<i32>} : memref<4x1026xf32, #tpu.memory_space<vmem>>, vector<4x2xf32>,
      %c0_163 = arith.constant 0 : index
      %c0_164 = arith.constant 0 : index
      %c2_165 = arith.constant 2 : index
      %338 = vector.load %arg3[%c0_163, %c0_164, %c2_165] : memref<1x4x14xf32, #tpu.memory_space<vmem>>, vector<1x4x4xf32>
      %339 = vector.shape_cast %338 : vector<1x4x4xf32> to vector<4x4xf32>
      %c0_166 = arith.constant 0 : index
      %c0_167 = arith.constant 0 : index
      %340 = vector.load %arg10[%c0_166, %c0_167] : memref<4x1028xf32, #tpu.memory_space<vmem>>, vector<4x4xf32>
      tpu.vector_store %arg10[%c0_166, %c0_167], %339 {strides = array<i32>} : memref<4x1028xf32, #tpu.memory_space<vmem>>, vector<4x4xf32>,
      %c0_168 = arith.constant 0 : index
      %c0_169 = arith.constant 0 : index
      %c6_170 = arith.constant 6 : index
      %341 = vector.load %arg3[%c0_168, %c0_169, %c6_170] : memref<1x4x14xf32, #tpu.memory_space<vmem>>, vector<1x4x8xf32>
      %342 = vector.shape_cast %341 : vector<1x4x8xf32> to vector<4x8xf32>
      %c0_171 = arith.constant 0 : index
      %c0_172 = arith.constant 0 : index
      %343 = vector.load %arg11[%c0_171, %c0_172] : memref<4x1032xf32, #tpu.memory_space<vmem>>, vector<4x8xf32>
      tpu.vector_store %arg11[%c0_171, %c0_172], %342 {strides = array<i32>} : memref<4x1032xf32, #tpu.memory_space<vmem>>, vector<4x8xf32>,
    } else {
    }
    %c0 = arith.constant 0 : index
    %c0_1 = arith.constant 0 : index
    %c0_2 = arith.constant 0 : index
    %3 = vector.load %arg2[%c0, %c0_1, %c0_2] : memref<1x4x1024xf32, #tpu.memory_space<vmem>>, vector<1x4x1024xf32>
    %4 = vector.shape_cast %3 : vector<1x4x1024xf32> to vector<4x1024xf32>
    %c0_3 = arith.constant 0 : index
    %c2 = arith.constant 2 : index
    %5 = vector.load %arg9[%c0_3, %c2] : memref<4x1026xf32, #tpu.memory_space<vmem>>, vector<4x1024xf32>
    tpu.vector_store %arg9[%c0_3, %c2], %4 {strides = array<i32>} : memref<4x1026xf32, #tpu.memory_space<vmem>>, vector<4x1024xf32>,
    %c0_4 = arith.constant 0 : index
    %c1024 = arith.constant 1024 : index
    %6 = vector.load %arg9[%c0_4, %c1024] : memref<4x1026xf32, #tpu.memory_space<vmem>>, vector<4x2xf32>
    %c0_5 = arith.constant 0 : index
    %c0_6 = arith.constant 0 : index
    %7 = vector.load %arg9[%c0_5, %c0_6] : memref<4x1026xf32, #tpu.memory_space<vmem>>, vector<4x1024xf32>
    %c0_7 = arith.constant 0 : index
    %c0_8 = arith.constant 0 : index
    %c0_9 = arith.constant 0 : index
    %8 = vector.load %arg4[%c0_7, %c0_8, %c0_9] : memref<9x4x1xf32, #tpu.memory_space<vmem>>, vector<1x4x1xf32>
    %9 = vector.shape_cast %8 : vector<1x4x1xf32> to vector<4x1xf32>
    %10 = vector.broadcast %9 : vector<4x1xf32> to vector<4x1024xf32>
    %11 = arith.mulf %7, %10 : vector<4x1024xf32>
    %c0_10 = arith.constant 0 : index
    %c1 = arith.constant 1 : index
    %12 = vector.load %arg9[%c0_10, %c1] : memref<4x1026xf32, #tpu.memory_space<vmem>>, vector<4x1024xf32>
    %c1_11 = arith.constant 1 : index
    %c0_12 = arith.constant 0 : index
    %c0_13 = arith.constant 0 : index
    %13 = vector.load %arg4[%c1_11, %c0_12, %c0_13] : memref<9x4x1xf32, #tpu.memory_space<vmem>>, vector<1x4x1xf32>
    %14 = vector.shape_cast %13 : vector<1x4x1xf32> to vector<4x1xf32>
    %15 = vector.broadcast %14 : vector<4x1xf32> to vector<4x1024xf32>
    %16 = arith.mulf %12, %15 : vector<4x1024xf32>
    %17 = arith.addf %11, %16 : vector<4x1024xf32>
    %c0_14 = arith.constant 0 : index
    %c2_15 = arith.constant 2 : index
    %18 = vector.load %arg9[%c0_14, %c2_15] : memref<4x1026xf32, #tpu.memory_space<vmem>>, vector<4x1024xf32>
    %c2_16 = arith.constant 2 : index
    %c0_17 = arith.constant 0 : index
    %c0_18 = arith.constant 0 : index
    %19 = vector.load %arg4[%c2_16, %c0_17, %c0_18] : memref<9x4x1xf32, #tpu.memory_space<vmem>>, vector<1x4x1xf32>
    %20 = vector.shape_cast %19 : vector<1x4x1xf32> to vector<4x1xf32>
    %21 = vector.broadcast %20 : vector<4x1xf32> to vector<4x1024xf32>
    %22 = arith.mulf %18, %21 : vector<4x1024xf32>
    %23 = arith.addf %17, %22 : vector<4x1024xf32>
    %c0_19 = arith.constant 0 : index
    %c0_20 = arith.constant 0 : index
    %24 = vector.load %arg9[%c0_19, %c0_20] : memref<4x1026xf32, #tpu.memory_space<vmem>>, vector<4x2xf32>
    tpu.vector_store %arg9[%c0_19, %c0_20], %6 {strides = array<i32>} : memref<4x1026xf32, #tpu.memory_space<vmem>>, vector<4x2xf32>,
    %c0_21 = arith.constant 0 : index
    %c0_22 = arith.constant 0 : index
    %c0_23 = arith.constant 0 : index
    %25 = vector.load %arg8[%c0_21, %c0_22, %c0_23] : memref<1x4x14xf32, #tpu.memory_space<vmem>>, vector<1x4x2xf32>
    %26 = vector.shape_cast %25 : vector<1x4x2xf32> to vector<4x2xf32>
    %27 = vector.shape_cast %6 : vector<4x2xf32> to vector<1x4x2xf32>
    tpu.vector_store %arg8[%c0_21, %c0_22, %c0_23], %27 {strides = array<i32>} : memref<1x4x14xf32, #tpu.memory_space<vmem>>, vector<1x4x2xf32>,
    %c0_24 = arith.constant 0 : index
    %c0_25 = arith.constant 0 : index
    %c0_26 = arith.constant 0 : index
    %28 = vector.load %arg6[%c0_24, %c0_25, %c0_26] : memref<18x4x1xf32, #tpu.memory_space<vmem>>, vector<1x4x1xf32>
    %29 = vector.shape_cast %28 : vector<1x4x1xf32> to vector<4x1xf32>
    %30 = vector.broadcast %29 : vector<4x1xf32> to vector<4x1024xf32>
    %31 = arith.addf %23, %30 : vector<4x1024xf32>
    %c1_27 = arith.constant 1 : index
    %c0_28 = arith.constant 0 : index
    %c0_29 = arith.constant 0 : index
    %32 = vector.load %arg6[%c1_27, %c0_28, %c0_29] : memref<18x4x1xf32, #tpu.memory_space<vmem>>, vector<1x4x1xf32>
    %33 = vector.shape_cast %32 : vector<1x4x1xf32> to vector<4x1xf32>
    %c2_30 = arith.constant 2 : index
    %c0_31 = arith.constant 0 : index
    %c0_32 = arith.constant 0 : index
    %34 = vector.load %arg6[%c2_30, %c0_31, %c0_32] : memref<18x4x1xf32, #tpu.memory_space<vmem>>, vector<1x4x1xf32>
    %35 = vector.shape_cast %34 : vector<1x4x1xf32> to vector<4x1xf32>
    %cst = arith.constant dense<0.000000e+00> : vector<1024xf32>
    %36 = vector.multi_reduction <add>, %31, %cst [0] : vector<4x1024xf32> to vector<1024xf32>
    %37 = vector.shape_cast %36 : vector<1024xf32> to vector<1x1024xf32>
    %cst_33 = arith.constant 4.000000e+00 : f32
    %38 = vector.broadcast %cst_33 : f32 to vector<1x1024xf32>
    %39 = arith.divf %37, %38 : vector<1x1024xf32>
    %40 = vector.broadcast %39 : vector<1x1024xf32> to vector<4x1024xf32>
    %41 = arith.subf %31, %40 : vector<4x1024xf32>
    %42 = arith.mulf %41, %41 : vector<4x1024xf32>
    %cst_34 = arith.constant dense<0.000000e+00> : vector<1024xf32>
    %43 = vector.multi_reduction <add>, %42, %cst_34 [0] : vector<4x1024xf32> to vector<1024xf32>
    %44 = vector.shape_cast %43 : vector<1024xf32> to vector<1x1024xf32>
    %cst_35 = arith.constant 4.000000e+00 : f32
    %45 = vector.broadcast %cst_35 : f32 to vector<1x1024xf32>
    %46 = arith.divf %44, %45 : vector<1x1024xf32>
    %cst_36 = arith.constant 9.99999974E-6 : f32
    %47 = vector.broadcast %cst_36 : f32 to vector<1x1024xf32>
    %48 = arith.addf %46, %47 : vector<1x1024xf32>
    %49 = math.rsqrt %48 : vector<1x1024xf32>
    %50 = vector.broadcast %49 : vector<1x1024xf32> to vector<4x1024xf32>
    %51 = arith.mulf %41, %50 : vector<4x1024xf32>
    %52 = vector.broadcast %33 : vector<4x1xf32> to vector<4x1024xf32>
    %53 = arith.mulf %51, %52 : vector<4x1024xf32>
    %54 = vector.broadcast %35 : vector<4x1xf32> to vector<4x1024xf32>
    %55 = arith.addf %53, %54 : vector<4x1024xf32>
    %cst_37 = arith.constant 0.000000e+00 : f32
    %56 = vector.broadcast %cst_37 : f32 to vector<4x1024xf32>
    %57 = arith.maximumf %55, %56 : vector<4x1024xf32>
    %c0_38 = arith.constant 0 : index
    %c0_39 = arith.constant 0 : index
    %c0_40 = arith.constant 0 : index
    %58 = vector.load %arg5[%c0_38, %c0_39, %c0_40] : memref<3x4x4xf32, #tpu.memory_space<vmem>>, vector<1x4x4xf32>
    %59 = vector.shape_cast %58 : vector<1x4x4xf32> to vector<4x4xf32>
    %60 = vector.extract_strided_slice %59 {offsets = [0, 0], sizes = [4, 1], strides = [1, 1]} : vector<4x4xf32> to vector<4x1xf32>
    %61 = vector.extract_strided_slice %57 {offsets = [0, 0], sizes = [1, 1024], strides = [1, 1]} : vector<4x1024xf32> to vector<1x1024xf32>
    %62 = vector.broadcast %60 : vector<4x1xf32> to vector<4x1024xf32>
    %63 = vector.broadcast %61 : vector<1x1024xf32> to vector<4x1024xf32>
    %64 = arith.mulf %62, %63 : vector<4x1024xf32>
    %65 = vector.extract_strided_slice %59 {offsets = [0, 1], sizes = [4, 1], strides = [1, 1]} : vector<4x4xf32> to vector<4x1xf32>
    %66 = vector.extract_strided_slice %57 {offsets = [1, 0], sizes = [1, 1024], strides = [1, 1]} : vector<4x1024xf32> to vector<1x1024xf32>
    %67 = vector.broadcast %65 : vector<4x1xf32> to vector<4x1024xf32>
    %68 = vector.broadcast %66 : vector<1x1024xf32> to vector<4x1024xf32>
    %69 = arith.mulf %67, %68 : vector<4x1024xf32>
    %70 = arith.addf %64, %69 : vector<4x1024xf32>
    %71 = vector.extract_strided_slice %59 {offsets = [0, 2], sizes = [4, 1], strides = [1, 1]} : vector<4x4xf32> to vector<4x1xf32>
    %72 = vector.extract_strided_slice %57 {offsets = [2, 0], sizes = [1, 1024], strides = [1, 1]} : vector<4x1024xf32> to vector<1x1024xf32>
    %73 = vector.broadcast %71 : vector<4x1xf32> to vector<4x1024xf32>
    %74 = vector.broadcast %72 : vector<1x1024xf32> to vector<4x1024xf32>
    %75 = arith.mulf %73, %74 : vector<4x1024xf32>
    %76 = arith.addf %70, %75 : vector<4x1024xf32>
    %77 = vector.extract_strided_slice %59 {offsets = [0, 3], sizes = [4, 1], strides = [1, 1]} : vector<4x4xf32> to vector<4x1xf32>
    %78 = vector.extract_strided_slice %57 {offsets = [3, 0], sizes = [1, 1024], strides = [1, 1]} : vector<4x1024xf32> to vector<1x1024xf32>
    %79 = vector.broadcast %77 : vector<4x1xf32> to vector<4x1024xf32>
    %80 = vector.broadcast %78 : vector<1x1024xf32> to vector<4x1024xf32>
    %81 = arith.mulf %79, %80 : vector<4x1024xf32>
    %82 = arith.addf %76, %81 : vector<4x1024xf32>
    %c3 = arith.constant 3 : index
    %c0_41 = arith.constant 0 : index
    %c0_42 = arith.constant 0 : index
    %83 = vector.load %arg6[%c3, %c0_41, %c0_42] : memref<18x4x1xf32, #tpu.memory_space<vmem>>, vector<1x4x1xf32>
    %84 = vector.shape_cast %83 : vector<1x4x1xf32> to vector<4x1xf32>
    %85 = vector.broadcast %84 : vector<4x1xf32> to vector<4x1024xf32>
    %86 = arith.addf %82, %85 : vector<4x1024xf32>
    %c4 = arith.constant 4 : index
    %c0_43 = arith.constant 0 : index
    %c0_44 = arith.constant 0 : index
    %87 = vector.load %arg6[%c4, %c0_43, %c0_44] : memref<18x4x1xf32, #tpu.memory_space<vmem>>, vector<1x4x1xf32>
    %88 = vector.shape_cast %87 : vector<1x4x1xf32> to vector<4x1xf32>
    %c5 = arith.constant 5 : index
    %c0_45 = arith.constant 0 : index
    %c0_46 = arith.constant 0 : index
    %89 = vector.load %arg6[%c5, %c0_45, %c0_46] : memref<18x4x1xf32, #tpu.memory_space<vmem>>, vector<1x4x1xf32>
    %90 = vector.shape_cast %89 : vector<1x4x1xf32> to vector<4x1xf32>
    %cst_47 = arith.constant dense<0.000000e+00> : vector<1024xf32>
    %91 = vector.multi_reduction <add>, %86, %cst_47 [0] : vector<4x1024xf32> to vector<1024xf32>
    %92 = vector.shape_cast %91 : vector<1024xf32> to vector<1x1024xf32>
    %cst_48 = arith.constant 4.000000e+00 : f32
    %93 = vector.broadcast %cst_48 : f32 to vector<1x1024xf32>
    %94 = arith.divf %92, %93 : vector<1x1024xf32>
    %95 = vector.broadcast %94 : vector<1x1024xf32> to vector<4x1024xf32>
    %96 = arith.subf %86, %95 : vector<4x1024xf32>
    %97 = arith.mulf %96, %96 : vector<4x1024xf32>
    %cst_49 = arith.constant dense<0.000000e+00> : vector<1024xf32>
    %98 = vector.multi_reduction <add>, %97, %cst_49 [0] : vector<4x1024xf32> to vector<1024xf32>
    %99 = vector.shape_cast %98 : vector<1024xf32> to vector<1x1024xf32>
    %cst_50 = arith.constant 4.000000e+00 : f32
    %100 = vector.broadcast %cst_50 : f32 to vector<1x1024xf32>
    %101 = arith.divf %99, %100 : vector<1x1024xf32>
    %cst_51 = arith.constant 9.99999974E-6 : f32
    %102 = vector.broadcast %cst_51 : f32 to vector<1x1024xf32>
    %103 = arith.addf %101, %102 : vector<1x1024xf32>
    %104 = math.rsqrt %103 : vector<1x1024xf32>
    %105 = vector.broadcast %104 : vector<1x1024xf32> to vector<4x1024xf32>
    %106 = arith.mulf %96, %105 : vector<4x1024xf32>
    %107 = vector.broadcast %88 : vector<4x1xf32> to vector<4x1024xf32>
    %108 = arith.mulf %106, %107 : vector<4x1024xf32>
    %109 = vector.broadcast %90 : vector<4x1xf32> to vector<4x1024xf32>
    %110 = arith.addf %108, %109 : vector<4x1024xf32>
    %cst_52 = arith.constant 0.000000e+00 : f32
    %111 = vector.broadcast %cst_52 : f32 to vector<4x1024xf32>
    %112 = arith.maximumf %110, %111 : vector<4x1024xf32>
    %113 = arith.addf %4, %112 : vector<4x1024xf32>
    %c0_53 = arith.constant 0 : index
    %c4_54 = arith.constant 4 : index
    %114 = vector.load %arg10[%c0_53, %c4_54] : memref<4x1028xf32, #tpu.memory_space<vmem>>, vector<4x1024xf32>
    tpu.vector_store %arg10[%c0_53, %c4_54], %113 {strides = array<i32>} : memref<4x1028xf32, #tpu.memory_space<vmem>>, vector<4x1024xf32>,
    %c0_55 = arith.constant 0 : index
    %c1024_56 = arith.constant 1024 : index
    %115 = vector.load %arg10[%c0_55, %c1024_56] : memref<4x1028xf32, #tpu.memory_space<vmem>>, vector<4x4xf32>
    %c0_57 = arith.constant 0 : index
    %c0_58 = arith.constant 0 : index
    %116 = vector.load %arg10[%c0_57, %c0_58] : memref<4x1028xf32, #tpu.memory_space<vmem>>, vector<4x1024xf32>
    %c3_59 = arith.constant 3 : index
    %c0_60 = arith.constant 0 : index
    %c0_61 = arith.constant 0 : index
    %117 = vector.load %arg4[%c3_59, %c0_60, %c0_61] : memref<9x4x1xf32, #tpu.memory_space<vmem>>, vector<1x4x1xf32>
    %118 = vector.shape_cast %117 : vector<1x4x1xf32> to vector<4x1xf32>
    %119 = vector.broadcast %118 : vector<4x1xf32> to vector<4x1024xf32>
    %120 = arith.mulf %116, %119 : vector<4x1024xf32>
    %c0_62 = arith.constant 0 : index
    %c2_63 = arith.constant 2 : index
    %121 = vector.load %arg10[%c0_62, %c2_63] : memref<4x1028xf32, #tpu.memory_space<vmem>>, vector<4x1024xf32>
    %c4_64 = arith.constant 4 : index
    %c0_65 = arith.constant 0 : index
    %c0_66 = arith.constant 0 : index
    %122 = vector.load %arg4[%c4_64, %c0_65, %c0_66] : memref<9x4x1xf32, #tpu.memory_space<vmem>>, vector<1x4x1xf32>
    %123 = vector.shape_cast %122 : vector<1x4x1xf32> to vector<4x1xf32>
    %124 = vector.broadcast %123 : vector<4x1xf32> to vector<4x1024xf32>
    %125 = arith.mulf %121, %124 : vector<4x1024xf32>
    %126 = arith.addf %120, %125 : vector<4x1024xf32>
    %c0_67 = arith.constant 0 : index
    %c4_68 = arith.constant 4 : index
    %127 = vector.load %arg10[%c0_67, %c4_68] : memref<4x1028xf32, #tpu.memory_space<vmem>>, vector<4x1024xf32>
    %c5_69 = arith.constant 5 : index
    %c0_70 = arith.constant 0 : index
    %c0_71 = arith.constant 0 : index
    %128 = vector.load %arg4[%c5_69, %c0_70, %c0_71] : memref<9x4x1xf32, #tpu.memory_space<vmem>>, vector<1x4x1xf32>
    %129 = vector.shape_cast %128 : vector<1x4x1xf32> to vector<4x1xf32>
    %130 = vector.broadcast %129 : vector<4x1xf32> to vector<4x1024xf32>
    %131 = arith.mulf %127, %130 : vector<4x1024xf32>
    %132 = arith.addf %126, %131 : vector<4x1024xf32>
    %c0_72 = arith.constant 0 : index
    %c0_73 = arith.constant 0 : index
    %133 = vector.load %arg10[%c0_72, %c0_73] : memref<4x1028xf32, #tpu.memory_space<vmem>>, vector<4x4xf32>
    tpu.vector_store %arg10[%c0_72, %c0_73], %115 {strides = array<i32>} : memref<4x1028xf32, #tpu.memory_space<vmem>>, vector<4x4xf32>,
    %c0_74 = arith.constant 0 : index
    %c0_75 = arith.constant 0 : index
    %c2_76 = arith.constant 2 : index
    %134 = vector.load %arg8[%c0_74, %c0_75, %c2_76] : memref<1x4x14xf32, #tpu.memory_space<vmem>>, vector<1x4x4xf32>
    %135 = vector.shape_cast %134 : vector<1x4x4xf32> to vector<4x4xf32>
    %136 = vector.shape_cast %115 : vector<4x4xf32> to vector<1x4x4xf32>
    tpu.vector_store %arg8[%c0_74, %c0_75, %c2_76], %136 {strides = array<i32>} : memref<1x4x14xf32, #tpu.memory_space<vmem>>, vector<1x4x4xf32>,
    %c6 = arith.constant 6 : index
    %c0_77 = arith.constant 0 : index
    %c0_78 = arith.constant 0 : index
    %137 = vector.load %arg6[%c6, %c0_77, %c0_78] : memref<18x4x1xf32, #tpu.memory_space<vmem>>, vector<1x4x1xf32>
    %138 = vector.shape_cast %137 : vector<1x4x1xf32> to vector<4x1xf32>
    %139 = vector.broadcast %138 : vector<4x1xf32> to vector<4x1024xf32>
    %140 = arith.addf %132, %139 : vector<4x1024xf32>
    %c7 = arith.constant 7 : index
    %c0_79 = arith.constant 0 : index
    %c0_80 = arith.constant 0 : index
    %141 = vector.load %arg6[%c7, %c0_79, %c0_80] : memref<18x4x1xf32, #tpu.memory_space<vmem>>, vector<1x4x1xf32>
    %142 = vector.shape_cast %141 : vector<1x4x1xf32> to vector<4x1xf32>
    %c8 = arith.constant 8 : index
    %c0_81 = arith.constant 0 : index
    %c0_82 = arith.constant 0 : index
    %143 = vector.load %arg6[%c8, %c0_81, %c0_82] : memref<18x4x1xf32, #tpu.memory_space<vmem>>, vector<1x4x1xf32>
    %144 = vector.shape_cast %143 : vector<1x4x1xf32> to vector<4x1xf32>
    %cst_83 = arith.constant dense<0.000000e+00> : vector<1024xf32>
    %145 = vector.multi_reduction <add>, %140, %cst_83 [0] : vector<4x1024xf32> to vector<1024xf32>
    %146 = vector.shape_cast %145 : vector<1024xf32> to vector<1x1024xf32>
    %cst_84 = arith.constant 4.000000e+00 : f32
    %147 = vector.broadcast %cst_84 : f32 to vector<1x1024xf32>
    %148 = arith.divf %146, %147 : vector<1x1024xf32>
    %149 = vector.broadcast %148 : vector<1x1024xf32> to vector<4x1024xf32>
    %150 = arith.subf %140, %149 : vector<4x1024xf32>
    %151 = arith.mulf %150, %150 : vector<4x1024xf32>
    %cst_85 = arith.constant dense<0.000000e+00> : vector<1024xf32>
    %152 = vector.multi_reduction <add>, %151, %cst_85 [0] : vector<4x1024xf32> to vector<1024xf32>
    %153 = vector.shape_cast %152 : vector<1024xf32> to vector<1x1024xf32>
    %cst_86 = arith.constant 4.000000e+00 : f32
    %154 = vector.broadcast %cst_86 : f32 to vector<1x1024xf32>
    %155 = arith.divf %153, %154 : vector<1x1024xf32>
    %cst_87 = arith.constant 9.99999974E-6 : f32
    %156 = vector.broadcast %cst_87 : f32 to vector<1x1024xf32>
    %157 = arith.addf %155, %156 : vector<1x1024xf32>
    %158 = math.rsqrt %157 : vector<1x1024xf32>
    %159 = vector.broadcast %158 : vector<1x1024xf32> to vector<4x1024xf32>
    %160 = arith.mulf %150, %159 : vector<4x1024xf32>
    %161 = vector.broadcast %142 : vector<4x1xf32> to vector<4x1024xf32>
    %162 = arith.mulf %160, %161 : vector<4x1024xf32>
    %163 = vector.broadcast %144 : vector<4x1xf32> to vector<4x1024xf32>
    %164 = arith.addf %162, %163 : vector<4x1024xf32>
    %cst_88 = arith.constant 0.000000e+00 : f32
    %165 = vector.broadcast %cst_88 : f32 to vector<4x1024xf32>
    %166 = arith.maximumf %164, %165 : vector<4x1024xf32>
    %c1_89 = arith.constant 1 : index
    %c0_90 = arith.constant 0 : index
    %c0_91 = arith.constant 0 : index
    %167 = vector.load %arg5[%c1_89, %c0_90, %c0_91] : memref<3x4x4xf32, #tpu.memory_space<vmem>>, vector<1x4x4xf32>
    %168 = vector.shape_cast %167 : vector<1x4x4xf32> to vector<4x4xf32>
    %169 = vector.extract_strided_slice %168 {offsets = [0, 0], sizes = [4, 1], strides = [1, 1]} : vector<4x4xf32> to vector<4x1xf32>
    %170 = vector.extract_strided_slice %166 {offsets = [0, 0], sizes = [1, 1024], strides = [1, 1]} : vector<4x1024xf32> to vector<1x1024xf32>
    %171 = vector.broadcast %169 : vector<4x1xf32> to vector<4x1024xf32>
    %172 = vector.broadcast %170 : vector<1x1024xf32> to vector<4x1024xf32>
    %173 = arith.mulf %171, %172 : vector<4x1024xf32>
    %174 = vector.extract_strided_slice %168 {offsets = [0, 1], sizes = [4, 1], strides = [1, 1]} : vector<4x4xf32> to vector<4x1xf32>
    %175 = vector.extract_strided_slice %166 {offsets = [1, 0], sizes = [1, 1024], strides = [1, 1]} : vector<4x1024xf32> to vector<1x1024xf32>
    %176 = vector.broadcast %174 : vector<4x1xf32> to vector<4x1024xf32>
    %177 = vector.broadcast %175 : vector<1x1024xf32> to vector<4x1024xf32>
    %178 = arith.mulf %176, %177 : vector<4x1024xf32>
    %179 = arith.addf %173, %178 : vector<4x1024xf32>
    %180 = vector.extract_strided_slice %168 {offsets = [0, 2], sizes = [4, 1], strides = [1, 1]} : vector<4x4xf32> to vector<4x1xf32>
    %181 = vector.extract_strided_slice %166 {offsets = [2, 0], sizes = [1, 1024], strides = [1, 1]} : vector<4x1024xf32> to vector<1x1024xf32>
    %182 = vector.broadcast %180 : vector<4x1xf32> to vector<4x1024xf32>
    %183 = vector.broadcast %181 : vector<1x1024xf32> to vector<4x1024xf32>
    %184 = arith.mulf %182, %183 : vector<4x1024xf32>
    %185 = arith.addf %179, %184 : vector<4x1024xf32>
    %186 = vector.extract_strided_slice %168 {offsets = [0, 3], sizes = [4, 1], strides = [1, 1]} : vector<4x4xf32> to vector<4x1xf32>
    %187 = vector.extract_strided_slice %166 {offsets = [3, 0], sizes = [1, 1024], strides = [1, 1]} : vector<4x1024xf32> to vector<1x1024xf32>
    %188 = vector.broadcast %186 : vector<4x1xf32> to vector<4x1024xf32>
    %189 = vector.broadcast %187 : vector<1x1024xf32> to vector<4x1024xf32>
    %190 = arith.mulf %188, %189 : vector<4x1024xf32>
    %191 = arith.addf %185, %190 : vector<4x1024xf32>
    %c9 = arith.constant 9 : index
    %c0_92 = arith.constant 0 : index
    %c0_93 = arith.constant 0 : index
    %192 = vector.load %arg6[%c9, %c0_92, %c0_93] : memref<18x4x1xf32, #tpu.memory_space<vmem>>, vector<1x4x1xf32>
    %193 = vector.shape_cast %192 : vector<1x4x1xf32> to vector<4x1xf32>
    %194 = vector.broadcast %193 : vector<4x1xf32> to vector<4x1024xf32>
    %195 = arith.addf %191, %194 : vector<4x1024xf32>
    %c10 = arith.constant 10 : index
    %c0_94 = arith.constant 0 : index
    %c0_95 = arith.constant 0 : index
    %196 = vector.load %arg6[%c10, %c0_94, %c0_95] : memref<18x4x1xf32, #tpu.memory_space<vmem>>, vector<1x4x1xf32>
    %197 = vector.shape_cast %196 : vector<1x4x1xf32> to vector<4x1xf32>
    %c11 = arith.constant 11 : index
    %c0_96 = arith.constant 0 : index
    %c0_97 = arith.constant 0 : index
    %198 = vector.load %arg6[%c11, %c0_96, %c0_97] : memref<18x4x1xf32, #tpu.memory_space<vmem>>, vector<1x4x1xf32>
    %199 = vector.shape_cast %198 : vector<1x4x1xf32> to vector<4x1xf32>
    %cst_98 = arith.constant dense<0.000000e+00> : vector<1024xf32>
    %200 = vector.multi_reduction <add>, %195, %cst_98 [0] : vector<4x1024xf32> to vector<1024xf32>
    %201 = vector.shape_cast %200 : vector<1024xf32> to vector<1x1024xf32>
    %cst_99 = arith.constant 4.000000e+00 : f32
    %202 = vector.broadcast %cst_99 : f32 to vector<1x1024xf32>
    %203 = arith.divf %201, %202 : vector<1x1024xf32>
    %204 = vector.broadcast %203 : vector<1x1024xf32> to vector<4x1024xf32>
    %205 = arith.subf %195, %204 : vector<4x1024xf32>
    %206 = arith.mulf %205, %205 : vector<4x1024xf32>
    %cst_100 = arith.constant dense<0.000000e+00> : vector<1024xf32>
    %207 = vector.multi_reduction <add>, %206, %cst_100 [0] : vector<4x1024xf32> to vector<1024xf32>
    %208 = vector.shape_cast %207 : vector<1024xf32> to vector<1x1024xf32>
    %cst_101 = arith.constant 4.000000e+00 : f32
    %209 = vector.broadcast %cst_101 : f32 to vector<1x1024xf32>
    %210 = arith.divf %208, %209 : vector<1x1024xf32>
    %cst_102 = arith.constant 9.99999974E-6 : f32
    %211 = vector.broadcast %cst_102 : f32 to vector<1x1024xf32>
    %212 = arith.addf %210, %211 : vector<1x1024xf32>
    %213 = math.rsqrt %212 : vector<1x1024xf32>
    %214 = vector.broadcast %213 : vector<1x1024xf32> to vector<4x1024xf32>
    %215 = arith.mulf %205, %214 : vector<4x1024xf32>
    %216 = vector.broadcast %197 : vector<4x1xf32> to vector<4x1024xf32>
    %217 = arith.mulf %215, %216 : vector<4x1024xf32>
    %218 = vector.broadcast %199 : vector<4x1xf32> to vector<4x1024xf32>
    %219 = arith.addf %217, %218 : vector<4x1024xf32>
    %cst_103 = arith.constant 0.000000e+00 : f32
    %220 = vector.broadcast %cst_103 : f32 to vector<4x1024xf32>
    %221 = arith.maximumf %219, %220 : vector<4x1024xf32>
    %222 = arith.addf %113, %221 : vector<4x1024xf32>
    %c0_104 = arith.constant 0 : index
    %c8_105 = arith.constant 8 : index
    %223 = vector.load %arg11[%c0_104, %c8_105] : memref<4x1032xf32, #tpu.memory_space<vmem>>, vector<4x1024xf32>
    tpu.vector_store %arg11[%c0_104, %c8_105], %222 {strides = array<i32>} : memref<4x1032xf32, #tpu.memory_space<vmem>>, vector<4x1024xf32>,
    %c0_106 = arith.constant 0 : index
    %c1024_107 = arith.constant 1024 : index
    %224 = vector.load %arg11[%c0_106, %c1024_107] : memref<4x1032xf32, #tpu.memory_space<vmem>>, vector<4x8xf32>
    %c0_108 = arith.constant 0 : index
    %c0_109 = arith.constant 0 : index
    %225 = vector.load %arg11[%c0_108, %c0_109] : memref<4x1032xf32, #tpu.memory_space<vmem>>, vector<4x1024xf32>
    %c6_110 = arith.constant 6 : index
    %c0_111 = arith.constant 0 : index
    %c0_112 = arith.constant 0 : index
    %226 = vector.load %arg4[%c6_110, %c0_111, %c0_112] : memref<9x4x1xf32, #tpu.memory_space<vmem>>, vector<1x4x1xf32>
    %227 = vector.shape_cast %226 : vector<1x4x1xf32> to vector<4x1xf32>
    %228 = vector.broadcast %227 : vector<4x1xf32> to vector<4x1024xf32>
    %229 = arith.mulf %225, %228 : vector<4x1024xf32>
    %c0_113 = arith.constant 0 : index
    %c4_114 = arith.constant 4 : index
    %230 = vector.load %arg11[%c0_113, %c4_114] : memref<4x1032xf32, #tpu.memory_space<vmem>>, vector<4x1024xf32>
    %c7_115 = arith.constant 7 : index
    %c0_116 = arith.constant 0 : index
    %c0_117 = arith.constant 0 : index
    %231 = vector.load %arg4[%c7_115, %c0_116, %c0_117] : memref<9x4x1xf32, #tpu.memory_space<vmem>>, vector<1x4x1xf32>
    %232 = vector.shape_cast %231 : vector<1x4x1xf32> to vector<4x1xf32>
    %233 = vector.broadcast %232 : vector<4x1xf32> to vector<4x1024xf32>
    %234 = arith.mulf %230, %233 : vector<4x1024xf32>
    %235 = arith.addf %229, %234 : vector<4x1024xf32>
    %c0_118 = arith.constant 0 : index
    %c8_119 = arith.constant 8 : index
    %236 = vector.load %arg11[%c0_118, %c8_119] : memref<4x1032xf32, #tpu.memory_space<vmem>>, vector<4x1024xf32>
    %c8_120 = arith.constant 8 : index
    %c0_121 = arith.constant 0 : index
    %c0_122 = arith.constant 0 : index
    %237 = vector.load %arg4[%c8_120, %c0_121, %c0_122] : memref<9x4x1xf32, #tpu.memory_space<vmem>>, vector<1x4x1xf32>
    %238 = vector.shape_cast %237 : vector<1x4x1xf32> to vector<4x1xf32>
    %239 = vector.broadcast %238 : vector<4x1xf32> to vector<4x1024xf32>
    %240 = arith.mulf %236, %239 : vector<4x1024xf32>
    %241 = arith.addf %235, %240 : vector<4x1024xf32>
    %c0_123 = arith.constant 0 : index
    %c0_124 = arith.constant 0 : index
    %242 = vector.load %arg11[%c0_123, %c0_124] : memref<4x1032xf32, #tpu.memory_space<vmem>>, vector<4x8xf32>
    tpu.vector_store %arg11[%c0_123, %c0_124], %224 {strides = array<i32>} : memref<4x1032xf32, #tpu.memory_space<vmem>>, vector<4x8xf32>,
    %c0_125 = arith.constant 0 : index
    %c0_126 = arith.constant 0 : index
    %c6_127 = arith.constant 6 : index
    %243 = vector.load %arg8[%c0_125, %c0_126, %c6_127] : memref<1x4x14xf32, #tpu.memory_space<vmem>>, vector<1x4x8xf32>
    %244 = vector.shape_cast %243 : vector<1x4x8xf32> to vector<4x8xf32>
    %245 = vector.shape_cast %224 : vector<4x8xf32> to vector<1x4x8xf32>
    tpu.vector_store %arg8[%c0_125, %c0_126, %c6_127], %245 {strides = array<i32>} : memref<1x4x14xf32, #tpu.memory_space<vmem>>, vector<1x4x8xf32>,
    %c12 = arith.constant 12 : index
    %c0_128 = arith.constant 0 : index
    %c0_129 = arith.constant 0 : index
    %246 = vector.load %arg6[%c12, %c0_128, %c0_129] : memref<18x4x1xf32, #tpu.memory_space<vmem>>, vector<1x4x1xf32>
    %247 = vector.shape_cast %246 : vector<1x4x1xf32> to vector<4x1xf32>
    %248 = vector.broadcast %247 : vector<4x1xf32> to vector<4x1024xf32>
    %249 = arith.addf %241, %248 : vector<4x1024xf32>
    %c13 = arith.constant 13 : index
    %c0_130 = arith.constant 0 : index
    %c0_131 = arith.constant 0 : index
    %250 = vector.load %arg6[%c13, %c0_130, %c0_131] : memref<18x4x1xf32, #tpu.memory_space<vmem>>, vector<1x4x1xf32>
    %251 = vector.shape_cast %250 : vector<1x4x1xf32> to vector<4x1xf32>
    %c14 = arith.constant 14 : index
    %c0_132 = arith.constant 0 : index
    %c0_133 = arith.constant 0 : index
    %252 = vector.load %arg6[%c14, %c0_132, %c0_133] : memref<18x4x1xf32, #tpu.memory_space<vmem>>, vector<1x4x1xf32>
    %253 = vector.shape_cast %252 : vector<1x4x1xf32> to vector<4x1xf32>
    %cst_134 = arith.constant dense<0.000000e+00> : vector<1024xf32>
    %254 = vector.multi_reduction <add>, %249, %cst_134 [0] : vector<4x1024xf32> to vector<1024xf32>
    %255 = vector.shape_cast %254 : vector<1024xf32> to vector<1x1024xf32>
    %cst_135 = arith.constant 4.000000e+00 : f32
    %256 = vector.broadcast %cst_135 : f32 to vector<1x1024xf32>
    %257 = arith.divf %255, %256 : vector<1x1024xf32>
    %258 = vector.broadcast %257 : vector<1x1024xf32> to vector<4x1024xf32>
    %259 = arith.subf %249, %258 : vector<4x1024xf32>
    %260 = arith.mulf %259, %259 : vector<4x1024xf32>
    %cst_136 = arith.constant dense<0.000000e+00> : vector<1024xf32>
    %261 = vector.multi_reduction <add>, %260, %cst_136 [0] : vector<4x1024xf32> to vector<1024xf32>
    %262 = vector.shape_cast %261 : vector<1024xf32> to vector<1x1024xf32>
    %cst_137 = arith.constant 4.000000e+00 : f32
    %263 = vector.broadcast %cst_137 : f32 to vector<1x1024xf32>
    %264 = arith.divf %262, %263 : vector<1x1024xf32>
    %cst_138 = arith.constant 9.99999974E-6 : f32
    %265 = vector.broadcast %cst_138 : f32 to vector<1x1024xf32>
    %266 = arith.addf %264, %265 : vector<1x1024xf32>
    %267 = math.rsqrt %266 : vector<1x1024xf32>
    %268 = vector.broadcast %267 : vector<1x1024xf32> to vector<4x1024xf32>
    %269 = arith.mulf %259, %268 : vector<4x1024xf32>
    %270 = vector.broadcast %251 : vector<4x1xf32> to vector<4x1024xf32>
    %271 = arith.mulf %269, %270 : vector<4x1024xf32>
    %272 = vector.broadcast %253 : vector<4x1xf32> to vector<4x1024xf32>
    %273 = arith.addf %271, %272 : vector<4x1024xf32>
    %cst_139 = arith.constant 0.000000e+00 : f32
    %274 = vector.broadcast %cst_139 : f32 to vector<4x1024xf32>
    %275 = arith.maximumf %273, %274 : vector<4x1024xf32>
    %c2_140 = arith.constant 2 : index
    %c0_141 = arith.constant 0 : index
    %c0_142 = arith.constant 0 : index
    %276 = vector.load %arg5[%c2_140, %c0_141, %c0_142] : memref<3x4x4xf32, #tpu.memory_space<vmem>>, vector<1x4x4xf32>
    %277 = vector.shape_cast %276 : vector<1x4x4xf32> to vector<4x4xf32>
    %278 = vector.extract_strided_slice %277 {offsets = [0, 0], sizes = [4, 1], strides = [1, 1]} : vector<4x4xf32> to vector<4x1xf32>
    %279 = vector.extract_strided_slice %275 {offsets = [0, 0], sizes = [1, 1024], strides = [1, 1]} : vector<4x1024xf32> to vector<1x1024xf32>
    %280 = vector.broadcast %278 : vector<4x1xf32> to vector<4x1024xf32>
    %281 = vector.broadcast %279 : vector<1x1024xf32> to vector<4x1024xf32>
    %282 = arith.mulf %280, %281 : vector<4x1024xf32>
    %283 = vector.extract_strided_slice %277 {offsets = [0, 1], sizes = [4, 1], strides = [1, 1]} : vector<4x4xf32> to vector<4x1xf32>
    %284 = vector.extract_strided_slice %275 {offsets = [1, 0], sizes = [1, 1024], strides = [1, 1]} : vector<4x1024xf32> to vector<1x1024xf32>
    %285 = vector.broadcast %283 : vector<4x1xf32> to vector<4x1024xf32>
    %286 = vector.broadcast %284 : vector<1x1024xf32> to vector<4x1024xf32>
    %287 = arith.mulf %285, %286 : vector<4x1024xf32>
    %288 = arith.addf %282, %287 : vector<4x1024xf32>
    %289 = vector.extract_strided_slice %277 {offsets = [0, 2], sizes = [4, 1], strides = [1, 1]} : vector<4x4xf32> to vector<4x1xf32>
    %290 = vector.extract_strided_slice %275 {offsets = [2, 0], sizes = [1, 1024], strides = [1, 1]} : vector<4x1024xf32> to vector<1x1024xf32>
    %291 = vector.broadcast %289 : vector<4x1xf32> to vector<4x1024xf32>
    %292 = vector.broadcast %290 : vector<1x1024xf32> to vector<4x1024xf32>
    %293 = arith.mulf %291, %292 : vector<4x1024xf32>
    %294 = arith.addf %288, %293 : vector<4x1024xf32>
    %295 = vector.extract_strided_slice %277 {offsets = [0, 3], sizes = [4, 1], strides = [1, 1]} : vector<4x4xf32> to vector<4x1xf32>
    %296 = vector.extract_strided_slice %275 {offsets = [3, 0], sizes = [1, 1024], strides = [1, 1]} : vector<4x1024xf32> to vector<1x1024xf32>
    %297 = vector.broadcast %295 : vector<4x1xf32> to vector<4x1024xf32>
    %298 = vector.broadcast %296 : vector<1x1024xf32> to vector<4x1024xf32>
    %299 = arith.mulf %297, %298 : vector<4x1024xf32>
    %300 = arith.addf %294, %299 : vector<4x1024xf32>
    %c15 = arith.constant 15 : index
    %c0_143 = arith.constant 0 : index
    %c0_144 = arith.constant 0 : index
    %301 = vector.load %arg6[%c15, %c0_143, %c0_144] : memref<18x4x1xf32, #tpu.memory_space<vmem>>, vector<1x4x1xf32>
    %302 = vector.shape_cast %301 : vector<1x4x1xf32> to vector<4x1xf32>
    %303 = vector.broadcast %302 : vector<4x1xf32> to vector<4x1024xf32>
    %304 = arith.addf %300, %303 : vector<4x1024xf32>
    %c16 = arith.constant 16 : index
    %c0_145 = arith.constant 0 : index
    %c0_146 = arith.constant 0 : index
    %305 = vector.load %arg6[%c16, %c0_145, %c0_146] : memref<18x4x1xf32, #tpu.memory_space<vmem>>, vector<1x4x1xf32>
    %306 = vector.shape_cast %305 : vector<1x4x1xf32> to vector<4x1xf32>
    %c17 = arith.constant 17 : index
    %c0_147 = arith.constant 0 : index
    %c0_148 = arith.constant 0 : index
    %307 = vector.load %arg6[%c17, %c0_147, %c0_148] : memref<18x4x1xf32, #tpu.memory_space<vmem>>, vector<1x4x1xf32>
    %308 = vector.shape_cast %307 : vector<1x4x1xf32> to vector<4x1xf32>
    %cst_149 = arith.constant dense<0.000000e+00> : vector<1024xf32>
    %309 = vector.multi_reduction <add>, %304, %cst_149 [0] : vector<4x1024xf32> to vector<1024xf32>
    %310 = vector.shape_cast %309 : vector<1024xf32> to vector<1x1024xf32>
    %cst_150 = arith.constant 4.000000e+00 : f32
    %311 = vector.broadcast %cst_150 : f32 to vector<1x1024xf32>
    %312 = arith.divf %310, %311 : vector<1x1024xf32>
    %313 = vector.broadcast %312 : vector<1x1024xf32> to vector<4x1024xf32>
    %314 = arith.subf %304, %313 : vector<4x1024xf32>
    %315 = arith.mulf %314, %314 : vector<4x1024xf32>
    %cst_151 = arith.constant dense<0.000000e+00> : vector<1024xf32>
    %316 = vector.multi_reduction <add>, %315, %cst_151 [0] : vector<4x1024xf32> to vector<1024xf32>
    %317 = vector.shape_cast %316 : vector<1024xf32> to vector<1x1024xf32>
    %cst_152 = arith.constant 4.000000e+00 : f32
    %318 = vector.broadcast %cst_152 : f32 to vector<1x1024xf32>
    %319 = arith.divf %317, %318 : vector<1x1024xf32>
    %cst_153 = arith.constant 9.99999974E-6 : f32
    %320 = vector.broadcast %cst_153 : f32 to vector<1x1024xf32>
    %321 = arith.addf %319, %320 : vector<1x1024xf32>
    %322 = math.rsqrt %321 : vector<1x1024xf32>
    %323 = vector.broadcast %322 : vector<1x1024xf32> to vector<4x1024xf32>
    %324 = arith.mulf %314, %323 : vector<4x1024xf32>
    %325 = vector.broadcast %306 : vector<4x1xf32> to vector<4x1024xf32>
    %326 = arith.mulf %324, %325 : vector<4x1024xf32>
    %327 = vector.broadcast %308 : vector<4x1xf32> to vector<4x1024xf32>
    %328 = arith.addf %326, %327 : vector<4x1024xf32>
    %cst_154 = arith.constant 0.000000e+00 : f32
    %329 = vector.broadcast %cst_154 : f32 to vector<4x1024xf32>
    %330 = arith.maximumf %328, %329 : vector<4x1024xf32>
    %331 = arith.addf %222, %330 : vector<4x1024xf32>
    %c0_155 = arith.constant 0 : index
    %c0_156 = arith.constant 0 : index
    %c0_157 = arith.constant 0 : index
    %332 = vector.load %arg7[%c0_155, %c0_156, %c0_157] : memref<1x4x1024xf32, #tpu.memory_space<vmem>>, vector<1x4x1024xf32>
    %333 = vector.shape_cast %332 : vector<1x4x1024xf32> to vector<4x1024xf32>
    %334 = vector.shape_cast %331 : vector<4x1024xf32> to vector<1x4x1024xf32>
    tpu.vector_store %arg7[%c0_155, %c0_156, %c0_157], %334 {strides = array<i32>} : memref<1x4x1024xf32, #tpu.memory_space<vmem>>, vector<1x4x1024xf32>,
    return
  }
  func.func @transform_0(%arg0: i32, %arg1: i32) -> (i32, i32, i32) {
    %c0_i32 = arith.constant 0 : i32
    %c0_i32_0 = arith.constant 0 : i32
    return %arg0, %c0_i32, %arg1 : i32, i32, i32
  }
  func.func @transform_1(%arg0: i32, %arg1: i32) -> (i32, i32, i32) {
    %c0_i32 = arith.constant 0 : i32
    %c0_i32_0 = arith.constant 0 : i32
    %c0_i32_1 = arith.constant 0 : i32
    return %arg0, %c0_i32, %c0_i32_0 : i32, i32, i32
  }
  func.func @transform_2(%arg0: i32, %arg1: i32) -> (i32, i32, i32) {
    %c0_i32 = arith.constant 0 : i32
    %c0_i32_0 = arith.constant 0 : i32
    %c0_i32_1 = arith.constant 0 : i32
    %c0_i32_2 = arith.constant 0 : i32
    return %c0_i32, %c0_i32_0, %c0_i32_1 : i32, i32, i32
  }
  func.func @transform_3(%arg0: i32, %arg1: i32) -> (i32, i32, i32) {
    %c0_i32 = arith.constant 0 : i32
    %c0_i32_0 = arith.constant 0 : i32
    %c0_i32_1 = arith.constant 0 : i32
    %c0_i32_2 = arith.constant 0 : i32
    return %c0_i32, %c0_i32_0, %c0_i32_1 : i32, i32, i32
  }
  func.func @transform_4(%arg0: i32, %arg1: i32) -> (i32, i32, i32) {
    %c0_i32 = arith.constant 0 : i32
    %c0_i32_0 = arith.constant 0 : i32
    %c0_i32_1 = arith.constant 0 : i32
    %c0_i32_2 = arith.constant 0 : i32
    return %c0_i32, %c0_i32_0, %c0_i32_1 : i32, i32, i32
  }
  func.func @transform_5(%arg0: i32, %arg1: i32) -> (i32, i32, i32) {
    %c0_i32 = arith.constant 0 : i32
    %c0_i32_0 = arith.constant 0 : i32
    return %arg0, %c0_i32, %arg1 : i32, i32, i32
  }
  func.func @transform_6(%arg0: i32, %arg1: i32) -> (i32, i32, i32) {
    %c0_i32 = arith.constant 0 : i32
    %c0_i32_0 = arith.constant 0 : i32
    %c0_i32_1 = arith.constant 0 : i32
    return %arg0, %c0_i32, %c0_i32_0 : i32, i32, i32
  }
}

</mosaic_0001>

<bundles_post_ra>
// kernel: dilated_causal_conv_encoder.1
= control target key start
LH: loop header
LB: loop body
LE: loop exit
PB: predicated region body
PF: predicated region fallthrough
CT: control target
= control target key end

     0   :  { %12 = vsyncpa [#allocation6], 0  ;;  %s5532_s0 = inlined_call_operand.vmem [shape: f32[2,4,1024], index: 0, kind: input, shape index: {}]   ;;  %s5533_s1 = inlined_call_operand.vmem [shape: f32[2,4,14], index: 1, kind: input, shape index: {}]   ;;  %s5534_s2 = inlined_call_operand.vmem [shape: f32[9,4,1], index: 2, kind: input, shape index: {}]   ;;  %s5535_s3 = inlined_call_operand.vmem [shape: f32[3,4,4], index: 3, kind: input, shape index: {}]   ;;  %s5536_s4 = inlined_call_operand.vmem [shape: f32[18,4,1], index: 4, kind: input, shape index: {}]   ;;  %s5537_s5 = inlined_call_operand.hbm [shape: f32[2,4,1024], index: 5, kind: output, shape index: {0}]   ;;  %s5538_s6 = inlined_call_operand.hbm [shape: f32[2,4,14], index: 6, kind: output, shape index: {1}]  }
   0x1   :  { %14 = vsyncpa [#allocation6 + $0x1], 0 }
   0x2   :  { %15 = vsyncpa [#allocation8], 0 }
   0x3   :  { %17 = vsyncpa [#allocation8 + $0x1], 0  ;;  %s4069_s21 = smov 0   ;;  %s4071_s22 = smov 0  }
   0x4   :  { %s4073_s23 = smov 0   ;;  %s4075_s24 = smov 0  }
   0x5   :  { %s4077_s25 = smov 0   ;;  %s4079_s26 = smov 0  }
   0x6 LB: > { %s3669_s27 = sadd.s32 4294967295, %s4016_s26   ;;  %s3670_s28 = sadd.s32 4294967294, %s4016_s26   ;;  %s4016_s26 = sphi %s4079_s26, %s23_s26   ;;  %s4012_s25 = sphi %s4077_s25, %s5558_s25   ;;  %s4008_s24 = sphi %s4075_s24, %s5557_s24   ;;  %s4004_s23 = sphi %s4073_s23, %s5556_s23   ;;  %s4000_s22 = sphi %s4071_s22, %s5555_s22   ;;  %s3996_s21 = sphi %s4069_s21, %s5554_s21  }
   0x7   : > { %s35_s29 = sadd.s32 1, %s4012_s25  ;;  %s161_s30 = sadd.s32 1, %s4004_s23 }
   0x8   : > { %p37_p0 = scmp.ge.s32.totalorder %s35_s29, 2  ;;  %p171_p1 = scmp.ne.s32.totalorder %s4004_s23, %s4000_s22 }
   0x9   : > { %p172_p2 = scmp.eq.s32.totalorder %s3669_s27, 1  ;;  %p177_p3 = scmp.ne.s32.totalorder %s4000_s22, %s3996_s21 }
   0xa   : > { %s5560_s29 = smov (%p37_p0, %s35_s29), 0  ;;  %p178_p5 = scmp.eq.s32.totalorder %s3670_s28, 1 }
   0xb   : > { %p4109_p4 = por %p172_p2, %p171_p1  ;;  %s156_s8 = ssub.s32 %s4012_s25, %s5560_s29 }
   0xc   : > { %p3673_p6 = scmp.ge.s32.totalorder %s4016_s26, 1  ;;  %p159_p7 = scmp.eq.s32.totalorder %s156_s8, 0 }
   0xd   : > { %p4116_p8 = por %p178_p5, %p177_p3  ;;  %p251_p9 = scmp.lt.s32.totalorder %s4016_s26, 3 }
   0xe   : > { %s4122_s10 = scalar_select %p159_p7, %s4004_s23, %s161_s30  }
   0xf   : > { %p252_p10 = pnand %p3673_p6, %p251_p9 }
  0x11   : > { %255 = sbr.rel (%p252_p10) target bundleno = 1366 (0x556), region = 40 }
  0x18   : > { %p295_p11 = scmp.lt.s32.totalorder %s4008_s24, 1  ;;  %v5540_v0 = vmov 0   ;;  %vm314_vm0 = vcmask 11264   ;;  %s4019_s20 = smov 2   ;;  %v3680_v6 = vld [vmem:[%s5534_s2 + $0x8] sm:$0xf]  ;;  %v386_v27 = vlaneseq }
  0x19   : > { %3790 = vset.pattern.permute.xlu1 %v5540_v0  ;;  %3789 = vset.pattern.permute.xlu0 %v5540_v0  ;;  %v3679_v7 = vld [vmem:[%s5534_s2 + $0x4] sm:$0xf]  ;;  %v378_v8 = vld [vmem:[%s5534_s2] sm:$0xf]  ;;  %vm364_vm1 = vcmask 1043472   ;;  %vm365_vm2 = vcmask 1047556  }
  0x1a   : > { %s296_s11 = scalar_select %p295_p11, %s4008_s24, 1  ;;  %v513_v9 = vld [vmem:[%s5536_s4] sm:$0xf]  ;;  %vm350_vm3 = vcmask 15360   ;;  %vm366_vm4 = vmor %vm365_vm2, %vm364_vm1  ;;  %vm352_vm5 = vcmask 1043456   ;;  %v4179_v29 = vshrl.u32 %v386_v27, 7 }
  0x1b   : > { %s4163_s15 = sand.u32 1, %s4000_s22   ;;  %v4020_v25 = vmov 839922192   ;;  %s4021_s27 = smov 126   ;;  %v3682_v47 = vld [vmem:[%s5536_s4 + $0x8] sm:$0xf] }
  0x1c   : > { %s3713_s12 = sshll.u32 %s296_s11, 5  ;;  %s3678_s13 = sshll.u32 %s296_s11, 2  ;;  %v384_v26 = vunpack.c.l.s4 %v4020_v25  ;;  %v3681_v48 = vld [vmem:[%s5536_s4 + $0x4] sm:$0xf]  ;;  %v783_v49 = vld [vmem:[%s5535_s3] sm:$0xf] }
  0x1d   : > { %s4131_s16 = scalar_lea.vmem %s5532_s0, %s3713_s12  ;;  %s4136_s19 = scalar_lea.vmem %s5533_s1, %s3678_s13  ;;  %v5543_v50 = vmov 1   ;;  %v3683_v51 = vld [vmem:[%s5536_s4 + $0xc] sm:$0xf]  ;;  %v5542_v52 = vmov 2   ;;  %v5539_v53 = vmov 3   ;;  %vm439_vm6 = vcmask 1039360  }
  0x1e   : > { %v332_v1 = vld [vmem:[%s4131_s16 + $0x10] sm:$0xff]  ;;  %v330_v2 = vld [vmem:[%s4131_s16] sm:$0xff]  ;;  %v333_v4 = vld [vmem:[%s4131_s16 + $0x18] sm:$0xff]  ;;  %s3675_s17 = sshll.u32 %s4163_s15, 2  ;;  %v385_v28 = vunpack.c.0.s8 %v384_v26  ;;  %s4022_s28 = smov 127   ;;  %vm495_vm7 = vcmask 1031168  }
  0x1f   : > { %342 = vrot.lane.b32.xlu1 %v332_v1, %s4019_s20  ;;  %338 = vrot.lane.b32.xlu0 %v330_v2, %s4019_s20  ;;  %v313_v3 = vld [vmem:[%s4136_s19] sm:$0xf]  ;;  %v331_v5 = vld [vmem:[%s4131_s16 + $0x8] sm:$0xff]  ;;  %s4184_s18 = scalar_lea.vmem [#allocation7], %s3675_s17  ;;  %s4026_s13 = smov 4   ;;  %vm1406_vm8 = vcmask 31744  }
  0x20   : > { %315 = vst.msk [vmem:[#allocation2] sm:$0xf] %vm314_vm0, %v313_v3  ;;  %v4189_v32 = vsub.s32 %v385_v28, %v4179_v29  ;;  %v3684_v54 = vld [vmem:[%s5536_s4 + $0x10] sm:$0xf]  ;;  %v3685_v55 = vld [vmem:[%s5536_s4 + $0x14] sm:$0xf] }
  0x21   : > { %vm321_vm9 = vcmask 27648   ;;  %vm1419_vm10 = vcmask 1043488   ;;  %vm1549_vm12 = vcmask 1014784   ;;  %s4028_s30 = smov 8   ;;  %vm2479_vm13 = vcmask 1043520   ;;  %s4031_s8 = smov 6  }
  0x22   : > { %vm1420_vm11 = vmor %vm365_vm2, %vm1419_vm10  ;;  %vm2466_vm14 = vcmask 64512   ;;  %vm328_vm15 = vcmask 60416   ;;  %vm2609_vm1 = vcmask 982016   ;;  %s3549_s11 = sshll.u32 %s4184_s18, 4  ;;  %s3520_s14 = scalar_lea.sflag [#allocation8], %s4163_s15  ;;  %s5193_s11 = int_to_ptr.vmem [resolvable:$true] %s3549_s11 }
  0x23   : > { %344 = vrot.lane.b32.xlu1 %v333_v4, %s4019_s20  ;;  %340 = vrot.lane.b32.xlu0 %v331_v5, %s4019_s20  ;;  %s3906_s17 = scalar_lea.vmem %s5193_s11, 64 }
  0x24   : > { %p3907_p12 = scmp.ne.s32.totalorder %s5193_s11, %s3906_s17 }
  0x26   : > { %p3908_p13 = pnand %p3907_p12, %p4109_p4 }
  0x27   : > { %459 = vperm.xlu1 %3790, %v3680_v6   ;;  %403 = vperm.xlu0 %3789, %v3679_v7  }
  0x28   : > { %p3909_p0 = pneg %p3908_p13 }
  0x2b   : > { %381 = vperm.xlu1 %3790, %v378_v8   ;;  %516 = vperm.xlu0 %3789, %v513_v9  }
  0x91   : > { %v343_v10 = vpop.permute.xlu1 %342  ;;  %v339_v11 = vpop.permute.xlu0 %338 }
  0x92   : > { %v346_v12 = vrot.slane %v339_v11, 4  ;;  %v348_v16 = vrot.slane %v343_v10, 4 }
  0x94   : > { %v351_v13 = vsel %vm350_vm3, %v346_v12, %v339_v11 }
  0x95   : > { %367 = vst.msk [vmem:[#allocation2] sm:$0xff] %vm366_vm4, %v351_v13  ;;  %v345_v14 = vpop.permute.xlu1 %344  ;;  %v341_v15 = vpop.permute.xlu0 %340 }
  0x96   : > { %v349_v17 = vrot.slane %v345_v14, 4  ;;  %v347_v18 = vrot.slane %v341_v15, 4 }
  0x98   : > { %v357_v19 = vsel %vm352_vm5, %v348_v16, %v349_v17  ;;  %372 = vst.msk [vmem:[#allocation2 + $0x20] sm:$0xf] %vm314_vm0, %v349_v17  ;;  %v353_v20 = vsel %vm352_vm5, %v346_v12, %v347_v18  ;;  %v355_v21 = vsel %vm352_vm5, %v347_v18, %v348_v16 }
  0x99   : > { %v4170_v22 = vsel %vm350_vm3, %v357_v19, %v345_v14  ;;  %v4173_v23 = vsel %vm350_vm3, %v353_v20, %v341_v15  ;;  %v4176_v24 = vsel %vm350_vm3, %v355_v21, %v343_v10  ;;  %vm2630_vm3 = vcmask 109616  }
  0x9c   : > { %v4181_v30 = vld [vmem:[#allocation2] sm:$0xff] }
  0x9f   : > { %v373_v31 = vld [vmem:[#allocation2 + $0x20] sm:$0xf] }
  0xa0   : > { %511 = vst.msk [vmem:[#allocation2] sm:$0xf] %vm314_vm0, %v373_v31  ;;  %512 = vst.msk [vmem:[%s4184_s18] sm:$0xf] %vm314_vm0, %v373_v31 }
  0xa1   : > { %vm2480_vm0 = vmor %vm365_vm2, %vm2479_vm13  ;;  %vm1570_vm2 = vcmask 44048  }
  0xa6   : > { %v460_v33 = vpop.permute.xlu1 %459  ;;  %v404_v34 = vpop.permute.xlu0 %403 }
  0xa7   : > { %v467_v35 = vrot.slane %v460_v33, %v4189_v32  ;;  %v411_v36 = vrot.slane %v404_v34, %v4189_v32 }
  0xa9   : > { %v469_v37 = vmul.f32 %v467_v35, %v4181_v30  ;;  %v417_v38 = vmul.f32 %v411_v36, %v373_v31  ;;  %v414_v39 = vmul.f32 %v411_v36, %v4173_v23  ;;  %v413_v40 = vmul.f32 %v411_v36, %v4181_v30 }
  0xaa   : > { %v416_v41 = vmul.f32 %v411_v36, %v4170_v22  ;;  %v415_v42 = vmul.f32 %v411_v36, %v4176_v24  ;;  %v471_v43 = vmul.f32 %v467_v35, %v4176_v24  ;;  %v470_v44 = vmul.f32 %v467_v35, %v4173_v23  ;;  %v382_v56 = vpop.permute.xlu1 %381  ;;  %v517_v57 = vpop.permute.xlu0 %516 }
  0xab   : > { %479 = vrot.lane.b32.xlu0 %v469_v37, %s4021_s27  ;;  %431 = vrot.lane.b32.xlu1 %v417_v38, %s4022_s28  ;;  %v473_v45 = vmul.f32 %v467_v35, %v373_v31  ;;  %v472_v46 = vmul.f32 %v467_v35, %v4170_v22  ;;  %v389_v1 = vrot.slane %v382_v56, %v4189_v32 }
  0xac   : > { %v524_v20 = vrot.slane %v517_v57, %v4189_v32 }
  0xad   : > { %v391_v9 = vmul.f32 %v389_v1, %v4181_v30  ;;  %v392_v18 = vmul.f32 %v389_v1, %v4173_v23  ;;  %v393_v19 = vmul.f32 %v389_v1, %v4176_v24  ;;  %v394_v25 = vmul.f32 %v389_v1, %v4170_v22 }
  0xaf   : > { %425 = vrot.lane.b32.xlu0 %v414_v39, %s4022_s28  ;;  %423 = vrot.lane.b32.xlu1 %v413_v40, %s4022_s28 }
  0xb3   : > { %429 = vrot.lane.b32.xlu0 %v416_v41, %s4022_s28  ;;  %427 = vrot.lane.b32.xlu1 %v415_v42, %s4022_s28  ;;  %s4032_s28 = smov [#allocation7]  }
  0xb7   : > { %483 = vrot.lane.b32.xlu0 %v471_v43, %s4021_s27  ;;  %481 = vrot.lane.b32.xlu1 %v470_v44, %s4021_s27 }
  0xbb   : > { %487 = vrot.lane.b32.xlu0 %v473_v45, %s4021_s27  ;;  %485 = vrot.lane.b32.xlu1 %v472_v46, %s4021_s27 }
  0xbf   : > { %765 = vperm.xlu0 %3789, %v3682_v47   ;;  %749 = vperm.xlu1 %3790, %v3681_v48  }
  0xc3   : > { %786 = vperm.xlu1 %3790, %v783_v49   ;;  %3791 = vset.pattern.permute.xlu0 %v5543_v50 }
  0xc4   : > { %874 = vperm.xlu0 %3791, %v783_v49  }
  0xc7   : > { %3792 = vset.pattern.permute.xlu1 %v5542_v52 }
  0xc8   : > { %966 = vperm.xlu1 %3792, %v783_v49   ;;  %3794 = vset.pattern.permute.xlu0 %v5540_v0 }
  0xc9   : > { %1153 = vperm.xlu0 %3794, %v3683_v51  }
  0xcc   : > { %3793 = vset.pattern.permute.xlu1 %v5539_v53 }
  0xcd   : > { %1058 = vperm.xlu1 %3793, %v783_v49  }
  0xd1   : > { %3795 = vset.pattern.permute.xlu1 %v5540_v0 }
  0xd2   : > { %1338 = vperm.xlu1 %3795, %v3684_v54  }
  0xd6   : > { %1351 = vperm.xlu1 %3795, %v3685_v55  }
 0x11d   : > { %v432_v58 = vpop.permute.xlu1 %431  ;;  %v480_v59 = vpop.permute.xlu0 %479 }
 0x11e   : > { %v437_v7 = vrot.slane %v432_v58, 4  ;;  %v489_v14 = vrot.slane %v480_v59, 4 }
 0x121   : > { %v424_v60 = vpop.permute.xlu1 %423  ;;  %v426_v61 = vpop.permute.xlu0 %425 }
 0x122   : > { %v433_v62 = vrot.slane %v424_v60, 4  ;;  %v434_v63 = vrot.slane %v426_v61, 4 }
 0x124   : > { %v438_v4 = vsel %vm352_vm5, %v433_v62, %v434_v63 }
 0x125   : > { %v428_v2 = vpop.permute.xlu1 %427  ;;  %v430_v3 = vpop.permute.xlu0 %429  ;;  %v440_v10 = vsel %vm439_vm6, %v424_v60, %v438_v4 }
 0x126   : > { %v435_v5 = vrot.slane %v428_v2, 4  ;;  %v436_v6 = vrot.slane %v430_v3, 4  ;;  %v451_v26 = vadd.f32 %v440_v10, %v391_v9 }
 0x128   : > { %v441_v8 = vsel %vm352_vm5, %v434_v63, %v435_v5  ;;  %v443_v11 = vsel %vm352_vm5, %v435_v5, %v436_v6  ;;  %v445_v16 = vsel %vm352_vm5, %v436_v6, %v437_v7 }
 0x129   : > { %v482_v12 = vpop.permute.xlu1 %481  ;;  %v484_v13 = vpop.permute.xlu0 %483  ;;  %v442_v15 = vsel %vm439_vm6, %v426_v61, %v441_v8  ;;  %v444_v27 = vsel %vm439_vm6, %v428_v2, %v443_v11  ;;  %v446_v31 = vsel %vm439_vm6, %v430_v3, %v445_v16 }
 0x12a   : > { %v490_v17 = vrot.slane %v482_v12, 4  ;;  %v491_v21 = vrot.slane %v484_v13, 4  ;;  %v452_v30 = vadd.f32 %v442_v15, %v392_v18  ;;  %v453_v22 = vadd.f32 %v444_v27, %v393_v19 }
 0x12b   : > { %v454_v40 = vadd.f32 %v446_v31, %v394_v25 }
 0x12c   : > { %v494_v28 = vsel %vm352_vm5, %v489_v14, %v490_v17  ;;  %v497_v34 = vsel %vm352_vm5, %v490_v17, %v491_v21 }
 0x12d   : > { %v496_v33 = vsel %vm495_vm7, %v480_v59, %v494_v28  ;;  %v486_v23 = vpop.permute.xlu1 %485  ;;  %v488_v35 = vpop.permute.xlu0 %487  ;;  %v498_v36 = vsel %vm495_vm7, %v482_v12, %v497_v34 }
 0x12e   : > { %v507_v24 = vadd.f32 %v496_v33, %v451_v26  ;;  %v492_v37 = vrot.slane %v486_v23, 4  ;;  %v493_v38 = vrot.slane %v488_v35, 4  ;;  %v508_v39 = vadd.f32 %v498_v36, %v452_v30 }
 0x130   : > { %v4247_v41 = vadd.f32 %v524_v20, %v507_v24  ;;  %v499_v42 = vsel %vm352_vm5, %v491_v21, %v492_v37  ;;  %v501_v43 = vsel %vm352_vm5, %v492_v37, %v493_v38  ;;  %v4251_v44 = vadd.f32 %v524_v20, %v508_v39 }
 0x131   : > { %v500_v45 = vsel %vm495_vm7, %v484_v13, %v499_v42  ;;  %v502_v46 = vsel %vm495_vm7, %v486_v23, %v501_v43 }
 0x132   : > { %v538_v47 = vcombine.high %v4247_v41, %v4247_v41  ;;  %v546_v48 = vsel %vm352_vm5, %v4247_v41, 0.0  ;;  %v509_v49 = vadd.f32 %v500_v45, %v453_v22  ;;  %v510_v51 = vadd.f32 %v502_v46, %v454_v40 }
 0x133   : > { %v547_v54 = vrot.slane %v546_v48, 4  ;;  %v539_v55 = vcombine.high %v4251_v44, %v4251_v44  ;;  %v560_v56 = vsel %vm352_vm5, %v4251_v44, 0.0 }
 0x134   : > { %v553_v57 = vsel %vm352_vm5, %v538_v47, 0.0  ;;  %v561_v58 = vrot.slane %v560_v56, 4  ;;  %v4264_v59 = vadd.f32 %v524_v20, %v509_v49  ;;  %v4266_v60 = vadd.f32 %v524_v20, %v510_v51 }
 0x135   : > { %v548_v61 = vadd.f32 %v547_v54, %v546_v48  ;;  %v554_v62 = vrot.slane %v553_v57, 4  ;;  %v567_v63 = vsel %vm352_vm5, %v539_v55, 0.0 }
 0x136   : > { %v562_v1 = vadd.f32 %v561_v58, %v560_v56  ;;  %v568_v2 = vrot.slane %v567_v63, 4  ;;  %v540_v3 = vcombine.high %v4264_v59, %v4264_v59  ;;  %v574_v4 = vsel %vm352_vm5, %v4264_v59, 0.0 }
 0x137   : > { %v549_v5 = vrot.slane %v548_v61, 2  ;;  %v555_v6 = vadd.f32 %v554_v62, %v553_v57  ;;  %v575_v7 = vrot.slane %v574_v4, 4  ;;  %v541_v8 = vcombine.high %v4266_v60, %v4266_v60 }
 0x138   : > { %v563_v9 = vrot.slane %v562_v1, 2  ;;  %v569_v10 = vadd.f32 %v568_v2, %v567_v63  ;;  %v581_v11 = vsel %vm352_vm5, %v540_v3, 0.0  ;;  %v588_v12 = vsel %vm352_vm5, %v4266_v60, 0.0 }
 0x139   : > { %v576_v13 = vadd.f32 %v575_v7, %v574_v4  ;;  %v582_v14 = vrot.slane %v581_v11, 4  ;;  %v589_v15 = vrot.slane %v588_v12, 4  ;;  %v595_v16 = vsel %vm352_vm5, %v541_v8, 0.0 }
 0x13a   : > { %v596_v17 = vrot.slane %v595_v16, 4  ;;  %v550_v18 = vadd.f32 %v549_v5, %v548_v61  ;;  %v556_v19 = vrot.slane %v555_v6, 2  ;;  %v564_v20 = vadd.f32 %v563_v9, %v562_v1 }
 0x13b   : > { %v577_v21 = vrot.slane %v576_v13, 2  ;;  %v583_v25 = vadd.f32 %v582_v14, %v581_v11  ;;  %v590_v26 = vadd.f32 %v589_v15, %v588_v12  ;;  %v570_v27 = vrot.slane %v569_v10, 2 }
 0x13c   : > { %v597_v28 = vadd.f32 %v596_v17, %v595_v16  ;;  %v551_v30 = vrot.slane %v550_v18, 1  ;;  %v557_v31 = vadd.f32 %v556_v19, %v555_v6  ;;  %v565_v33 = vrot.slane %v564_v20, 1 }
 0x13d   : > { %v591_v34 = vrot.slane %v590_v26, 2  ;;  %v571_v23 = vadd.f32 %v570_v27, %v569_v10  ;;  %v578_v35 = vadd.f32 %v577_v21, %v576_v13  ;;  %v584_v24 = vrot.slane %v583_v25, 2 }
 0x13e   : > { %v598_v36 = vrot.slane %v597_v28, 2  ;;  %v552_v37 = vadd.f32 %v551_v30, %v550_v18  ;;  %v558_v38 = vrot.slane %v557_v31, 1  ;;  %v566_v22 = vadd.f32 %v565_v33, %v564_v20 }
 0x13f   : > { %v592_v39 = vadd.f32 %v591_v34, %v590_v26  ;;  %v572_v40 = vrot.slane %v571_v23, 1  ;;  %v579_v42 = vrot.slane %v578_v35, 1  ;;  %v585_v43 = vadd.f32 %v584_v24, %v583_v25 }
 0x140   : > { %v559_v45 = vadd.f32 %v558_v38, %v557_v31  ;;  %v599_v46 = vadd.f32 %v598_v36, %v597_v28  ;;  %v603_v55 = vmul.f32 0.25, %v552_v37  ;;  %v605_v61 = vmul.f32 0.25, %v566_v22 }
 0x141   : > { %v573_v47 = vadd.f32 %v572_v40, %v571_v23  ;;  %v580_v48 = vadd.f32 %v579_v42, %v578_v35  ;;  %v586_v49 = vrot.slane %v585_v43, 1  ;;  %v593_v51 = vrot.slane %v592_v39, 1 }
 0x142   : > { %v600_v54 = vrot.slane %v599_v46, 1  ;;  %v604_v56 = vmul.f32 0.25, %v559_v45 }
 0x143   : > { %v587_v57 = vadd.f32 %v586_v49, %v585_v43  ;;  %v594_v58 = vadd.f32 %v593_v51, %v592_v39  ;;  %v606_v62 = vmul.f32 0.25, %v573_v47  ;;  %v607_v2 = vmul.f32 0.25, %v580_v48 }
 0x144   : > { %v601_v63 = vadd.f32 %v600_v54, %v599_v46  ;;  %v619_v1 = vcombine.low %v603_v55, %v604_v56 }
 0x145   : > { %v608_v3 = vmul.f32 0.25, %v587_v57  ;;  %v620_v4 = vcombine.low %v605_v61, %v606_v62  ;;  %v609_v5 = vmul.f32 0.25, %v594_v58 }
 0x146   : > { %v610_v6 = vmul.f32 0.25, %v601_v63  ;;  %v4280_v7 = vsub.f32 %v4247_v41, %v619_v1 }
 0x147   : > { %v621_v8 = vcombine.low %v607_v2, %v608_v3  ;;  %v4283_v9 = vsub.f32 %v4251_v44, %v620_v4 }
 0x148   : > { %v622_v10 = vcombine.low %v609_v5, %v610_v6  ;;  %v631_v11 = vmul.f32 %v4280_v7, %v4280_v7 }
 0x149   : > { %v4288_v12 = vsub.f32 %v4264_v59, %v621_v8  ;;  %v632_v13 = vmul.f32 %v4283_v9, %v4283_v9 }
 0x14a   : > { %v4293_v14 = vsub.f32 %v4266_v60, %v622_v10  ;;  %v639_v15 = vcombine.high %v631_v11, %v631_v11  ;;  %v647_v41 = vsel %vm352_vm5, %v631_v11, 0.0 }
 0x14b   : > { %v633_v44 = vmul.f32 %v4288_v12, %v4288_v12  ;;  %v640_v16 = vcombine.high %v632_v13, %v632_v13  ;;  %v648_v17 = vrot.slane %v647_v41, 4  ;;  %v661_v18 = vsel %vm352_vm5, %v632_v13, 0.0 }
 0x14c   : > { %v634_v59 = vmul.f32 %v4293_v14, %v4293_v14  ;;  %v654_v19 = vsel %vm352_vm5, %v639_v15, 0.0  ;;  %v662_v20 = vrot.slane %v661_v18, 4 }
 0x14d   : > { %v641_v21 = vcombine.high %v633_v44, %v633_v44  ;;  %v649_v25 = vadd.f32 %v648_v17, %v647_v41  ;;  %v655_v60 = vrot.slane %v654_v19, 4  ;;  %v668_v26 = vsel %vm352_vm5, %v640_v16, 0.0 }
 0x14e   : > { %v642_v27 = vcombine.high %v634_v59, %v634_v59  ;;  %v663_v28 = vadd.f32 %v662_v20, %v661_v18  ;;  %v669_v30 = vrot.slane %v668_v26, 4  ;;  %v675_v31 = vsel %vm352_vm5, %v633_v44, 0.0 }
 0x14f   : > { %v650_v33 = vrot.slane %v649_v25, 2  ;;  %v656_v34 = vadd.f32 %v655_v60, %v654_v19  ;;  %v676_v23 = vrot.slane %v675_v31, 4  ;;  %v682_v35 = vsel %vm352_vm5, %v641_v21, 0.0 }
 0x150   : > { %v664_v24 = vrot.slane %v663_v28, 2  ;;  %v670_v36 = vadd.f32 %v669_v30, %v668_v26  ;;  %v683_v37 = vrot.slane %v682_v35, 4  ;;  %v689_v38 = vsel %vm352_vm5, %v634_v59, 0.0 }
 0x151   : > { %v651_v22 = vadd.f32 %v650_v33, %v649_v25  ;;  %v657_v39 = vrot.slane %v656_v34, 2  ;;  %v677_v40 = vadd.f32 %v676_v23, %v675_v31  ;;  %v690_v42 = vrot.slane %v689_v38, 4 }
 0x152   : > { %v665_v43 = vadd.f32 %v664_v24, %v663_v28  ;;  %v671_v45 = vrot.slane %v670_v36, 2  ;;  %v684_v46 = vadd.f32 %v683_v37, %v682_v35  ;;  %v696_v47 = vsel %vm352_vm5, %v642_v27, 0.0 }
 0x153   : > { %v652_v48 = vrot.slane %v651_v22, 1  ;;  %v658_v49 = vadd.f32 %v657_v39, %v656_v34  ;;  %v678_v51 = vrot.slane %v677_v40, 2  ;;  %v691_v54 = vadd.f32 %v690_v42, %v689_v38 }
 0x154   : > { %v666_v55 = vrot.slane %v665_v43, 1  ;;  %v672_v56 = vadd.f32 %v671_v45, %v670_v36  ;;  %v685_v57 = vrot.slane %v684_v46, 2  ;;  %v697_v58 = vrot.slane %v696_v47, 4 }
 0x155   : > { %v653_v61 = vadd.f32 %v652_v48, %v651_v22  ;;  %v659_v62 = vrot.slane %v658_v49, 1  ;;  %v679_v63 = vadd.f32 %v678_v51, %v677_v40  ;;  %v692_v1 = vrot.slane %v691_v54, 2  ;;  %v750_v40 = vpop.permute.xlu1 %749 }
 0x156   : > { %v667_v2 = vadd.f32 %v666_v55, %v665_v43  ;;  %v673_v3 = vrot.slane %v672_v56, 1  ;;  %v686_v4 = vadd.f32 %v685_v57, %v684_v46  ;;  %v698_v5 = vadd.f32 %v697_v58, %v696_v47  ;;  %v766_v47 = vpop.permute.xlu0 %765 }
 0x157   : > { %v660_v6 = vadd.f32 %v659_v62, %v658_v49  ;;  %v680_v8 = vrot.slane %v679_v63, 1  ;;  %v693_v10 = vadd.f32 %v692_v1, %v691_v54  ;;  %v703_v11 = vmul.f32 0.25, %v653_v61 }
 0x158   : > { %v674_v13 = vadd.f32 %v673_v3, %v672_v56  ;;  %v687_v15 = vrot.slane %v686_v4, 1  ;;  %v699_v41 = vrot.slane %v698_v5, 2  ;;  %v705_v44 = vmul.f32 0.25, %v667_v2 }
 0x159   : > { %v681_v16 = vadd.f32 %v680_v8, %v679_v63  ;;  %v694_v17 = vrot.slane %v693_v10, 1  ;;  %v704_v18 = vmul.f32 0.25, %v660_v6  ;;  %v711_v59 = vadd.f32 1e-05, %v703_v11 }
 0x15a   : > { %v688_v19 = vadd.f32 %v687_v15, %v686_v4  ;;  %v700_v20 = vadd.f32 %v699_v41, %v698_v5  ;;  %v706_v21 = vmul.f32 0.25, %v674_v13  ;;  %v713_v25 = vadd.f32 1e-05, %v705_v44 }
 0x15b   : > { %v695_v60 = vadd.f32 %v694_v17, %v693_v10  ;;  %v707_v26 = vmul.f32 0.25, %v681_v16  ;;  %v712_v27 = vadd.f32 1e-05, %v704_v18  ;;  %3806 = vrsqrt.f32 %v711_v59 }
 0x15c   : > { %v701_v28 = vrot.slane %v700_v20, 1  ;;  %v708_v30 = vmul.f32 0.25, %v688_v19  ;;  %v714_v31 = vadd.f32 1e-05, %v706_v21  ;;  %3808 = vrsqrt.f32 %v713_v25 }
 0x15d   : > { %v709_v33 = vmul.f32 0.25, %v695_v60  ;;  %v715_v34 = vadd.f32 1e-05, %v707_v26  ;;  %3810 = vrsqrt.f32 %v712_v27  ;;  %v757_v51 = vrot.slane %v750_v40, %v4189_v32 }
 0x15e   : > { %v702_v23 = vadd.f32 %v701_v28, %v700_v20  ;;  %v716_v35 = vadd.f32 1e-05, %v708_v30  ;;  %3812 = vrsqrt.f32 %v714_v31  ;;  %v773_v57 = vrot.slane %v766_v47, %v4189_v32  ;;  %v787_v28 = vpop.permute.xlu1 %786 }
 0x15f   : > { %v717_v24 = vadd.f32 1e-05, %v709_v33  ;;  %3814 = vrsqrt.f32 %v715_v34  ;;  %v4312_v61 = vsub.s32 0, %v4179_v29  ;;  %v4316_v2 = vsub.s32 2, %v4179_v29 }
 0x160   : > { %v710_v36 = vmul.f32 0.25, %v702_v23  ;;  %3816 = vrsqrt.f32 %v716_v35  ;;  %v4319_v3 = vsub.s32 4, %v4179_v29  ;;  %v4325_v8 = vsub.s32 1, %v4179_v29 }
 0x161   : > { %3818 = vrsqrt.f32 %v717_v24  ;;  %v4333_v11 = vsub.s32 7, %v4179_v29  ;;  %v4339_v44 = vsub.s32 5, %v4179_v29 }
 0x162   : > { %v718_v37 = vadd.f32 1e-05, %v710_v36 }
 0x163   : > { %5548 = vst [vmem:[#allocation11_spill] sm:$0xff] %v4333_v11 }
 0x164   : > { %3820 = vrsqrt.f32 %v718_v37 }
 0x165   : > { %v3807_v38 = vpop.eup %3806 }
 0x166   : > { %v3809_v22 = vpop.eup %3808 }
 0x167   : > { %v3811_v39 = vpop.eup %3810 }
 0x168   : > { %v3813_v42 = vpop.eup %3812  ;;  %v735_v43 = vcombine.low %v3807_v38, %v3811_v39 }
 0x169   : > { %v3815_v45 = vpop.eup %3814  ;;  %v736_v46 = vcombine.low %v3809_v22, %v3813_v42 }
 0x16a   : > { %v3817_v48 = vpop.eup %3816  ;;  %v743_v49 = vmul.f32 %v735_v43, %v4280_v7 }
 0x16b   : > { %v737_v54 = vcombine.low %v3815_v45, %v3817_v48  ;;  %v744_v55 = vmul.f32 %v736_v46, %v4283_v9  ;;  %v3819_v58 = vpop.eup %3818  ;;  %v4322_v9 = vsub.s32 6, %v4179_v29 }
 0x16c   : > { %v759_v56 = vmul.f32 %v757_v51, %v743_v49  ;;  %v967_v49 = vpop.permute.xlu1 %966 }
 0x16d   : > { %v745_v62 = vmul.f32 %v737_v54, %v4288_v12  ;;  %v760_v63 = vmul.f32 %v757_v51, %v744_v55  ;;  %v4328_v12 = vsub.s32 3, %v4179_v29 }
 0x16e   : > { %v3821_v1 = vpop.eup %3820  ;;  %v775_v7 = vadd.f32 %v773_v57, %v759_v56 }
 0x16f   : > { %v738_v4 = vcombine.low %v3819_v58, %v3821_v1  ;;  %v761_v5 = vmul.f32 %v757_v51, %v745_v62  ;;  %v776_v6 = vadd.f32 %v773_v57, %v760_v63 }
 0x170   : > { %v4330_v10 = vmax.f32 %v775_v7, 0.0 }
 0x171   : > { %v746_v13 = vmul.f32 %v738_v4, %v4293_v14  ;;  %v777_v15 = vadd.f32 %v773_v57, %v761_v5  ;;  %v4336_v41 = vmax.f32 %v776_v6, 0.0 }
 0x172   : > { %v796_v16 = vrot.slane %v4330_v10, %v4312_v61  ;;  %v800_v17 = vrot.slane %v4330_v10, %v4319_v3  ;;  %v972_v18 = vrot.slane %v4330_v10, %v4316_v2  ;;  %v976_v59 = vrot.slane %v4330_v10, %v4322_v9 }
 0x173   : > { %v762_v19 = vmul.f32 %v757_v51, %v746_v13  ;;  %v4349_v14 = vmax.f32 %v777_v15, 0.0  ;;  %v804_v20 = vrot.slane %v4336_v41, %v4312_v61  ;;  %v808_v29 = vrot.slane %v4336_v41, %v4319_v3 }
 0x174   : > { %v836_v21 = vrot.slane %v796_v16, %v4312_v61  ;;  %v840_v25 = vrot.slane %v800_v17, %v4312_v61  ;;  %v980_v60 = vrot.slane %v4336_v41, %v4316_v2  ;;  %v984_v26 = vrot.slane %v4336_v41, %v4322_v9 }
 0x175   : > { %v778_v27 = vadd.f32 %v773_v57, %v762_v19  ;;  %v812_v30 = vrot.slane %v4349_v14, %v4312_v61  ;;  %v816_v31 = vrot.slane %v4349_v14, %v4319_v3  ;;  %v844_v33 = vrot.slane %v804_v20, %v4312_v61 }
 0x176   : > { %v848_v34 = vrot.slane %v808_v29, %v4312_v61  ;;  %v4367_v23 = vmul.f32 %v836_v21, %v787_v28  ;;  %v4369_v35 = vmul.f32 %v840_v25, %v787_v28  ;;  %v988_v24 = vrot.slane %v4349_v14, %v4316_v2 }
 0x177   : > { %v4373_v36 = vmax.f32 %v778_v27, 0.0  ;;  %v852_v37 = vrot.slane %v812_v30, %v4312_v61  ;;  %v856_v38 = vrot.slane %v816_v31, %v4312_v61  ;;  %v4377_v22 = vmul.f32 %v844_v33, %v787_v28 }
 0x178   : > { %v4379_v39 = vmul.f32 %v848_v34, %v787_v28  ;;  %v992_v40 = vrot.slane %v4349_v14, %v4322_v9  ;;  %v1012_v42 = vrot.slane %v972_v18, %v4316_v2  ;;  %v1016_v43 = vrot.slane %v976_v59, %v4316_v2 }
 0x179   : > { %v820_v45 = vrot.slane %v4373_v36, %v4312_v61  ;;  %v824_v46 = vrot.slane %v4373_v36, %v4319_v3  ;;  %v4389_v47 = vmul.f32 %v852_v37, %v787_v28  ;;  %v4391_v48 = vmul.f32 %v856_v38, %v787_v28 }
 0x17a   : > { %v996_v51 = vrot.slane %v4373_v36, %v4316_v2  ;;  %v1000_v54 = vrot.slane %v4373_v36, %v4322_v9  ;;  %v1020_v55 = vrot.slane %v980_v60, %v4316_v2  ;;  %v1024_v56 = vrot.slane %v984_v26, %v4316_v2  ;;  %v1059_v60 = vpop.permute.xlu1 %1058 }
 0x17b   : > { %v860_v57 = vrot.slane %v820_v45, %v4312_v61  ;;  %v864_v58 = vrot.slane %v824_v46, %v4312_v61  ;;  %v1028_v62 = vrot.slane %v988_v24, %v4316_v2  ;;  %v1032_v63 = vrot.slane %v992_v40, %v4316_v2 }
 0x17c   : > { %v1036_v1 = vrot.slane %v996_v51, %v4316_v2  ;;  %v1040_v7 = vrot.slane %v1000_v54, %v4316_v2  ;;  %v4405_v4 = vmul.f32 %v1012_v42, %v967_v49  ;;  %v4407_v5 = vmul.f32 %v1016_v43, %v967_v49 }
 0x17d   : > { %v4409_v6 = vmul.f32 %v860_v57, %v787_v28  ;;  %v4411_v13 = vmul.f32 %v864_v58, %v787_v28  ;;  %v4413_v15 = vmul.f32 %v1020_v55, %v967_v49  ;;  %v4415_v16 = vmul.f32 %v1024_v56, %v967_v49 }
 0x17e   : > { %v4417_v17 = vmul.f32 %v1028_v62, %v967_v49  ;;  %v4419_v18 = vmul.f32 %v1032_v63, %v967_v49  ;;  %v4421_v59 = vmul.f32 %v1036_v1, %v967_v49  ;;  %v4423_v19 = vmul.f32 %v1040_v7, %v967_v49 }
 0x17f   : > { %v1064_v20 = vrot.slane %v4330_v10, %v4328_v12  ;;  %v1068_v29 = vrot.slane %v4330_v10, %v4333_v11  ;;  %v1072_v21 = vrot.slane %v4336_v41, %v4328_v12  ;;  %v1076_v25 = vrot.slane %v4336_v41, %v4333_v11 }
 0x180   : > { %v1080_v26 = vrot.slane %v4349_v14, %v4328_v12  ;;  %v1084_v27 = vrot.slane %v4349_v14, %v4333_v11  ;;  %v1088_v28 = vrot.slane %v4373_v36, %v4328_v12  ;;  %v1092_v30 = vrot.slane %v4373_v36, %v4333_v11 }
 0x181   : > { %v1104_v31 = vrot.slane %v1064_v20, %v4328_v12  ;;  %v1108_v33 = vrot.slane %v1068_v29, %v4328_v12  ;;  %v1112_v34 = vrot.slane %v1072_v21, %v4328_v12  ;;  %v1116_v24 = vrot.slane %v1076_v25, %v4328_v12  ;;  %v875_v21 = vpop.permute.xlu0 %874 }
 0x182   : > { %v1120_v37 = vrot.slane %v1080_v26, %v4328_v12  ;;  %v1124_v38 = vrot.slane %v1084_v27, %v4328_v12  ;;  %v1128_v40 = vrot.slane %v1088_v28, %v4328_v12  ;;  %v1132_v42 = vrot.slane %v1092_v30, %v4328_v12 }
 0x183   : > { %v1133_v43 = vmul.f32 %v1104_v31, %v1059_v60  ;;  %v1134_v45 = vmul.f32 %v1108_v33, %v1059_v60  ;;  %v1135_v46 = vmul.f32 %v1112_v34, %v1059_v60  ;;  %v1136_v49 = vmul.f32 %v1116_v24, %v1059_v60 }
 0x184   : > { %v1137_v51 = vmul.f32 %v1120_v37, %v1059_v60  ;;  %v1138_v54 = vmul.f32 %v1124_v38, %v1059_v60  ;;  %v1139_v55 = vmul.f32 %v1128_v40, %v1059_v60  ;;  %v1140_v56 = vmul.f32 %v1132_v42, %v1059_v60 }
 0x185   : > { %v880_v57 = vrot.slane %v4330_v10, %v4325_v8  ;;  %v884_v58 = vrot.slane %v4330_v10, %v4339_v44  ;;  %v888_v62 = vrot.slane %v4336_v41, %v4325_v8  ;;  %v892_v63 = vrot.slane %v4336_v41, %v4339_v44 }
 0x186   : > { %v896_v1 = vrot.slane %v4349_v14, %v4325_v8  ;;  %v900_v7 = vrot.slane %v4349_v14, %v4339_v44  ;;  %v904_v20 = vrot.slane %v4373_v36, %v4325_v8  ;;  %v908_v29 = vrot.slane %v4373_v36, %v4339_v44 }
 0x187   : > { %v920_v10 = vrot.slane %v880_v57, %v4325_v8  ;;  %v924_v25 = vrot.slane %v884_v58, %v4325_v8  ;;  %v928_v60 = vrot.slane %v888_v62, %v4325_v8  ;;  %v932_v41 = vrot.slane %v892_v63, %v4325_v8 }
 0x188   : > { %v936_v26 = vrot.slane %v896_v1, %v4325_v8  ;;  %v940_v27 = vrot.slane %v900_v7, %v4325_v8  ;;  %v944_v14 = vrot.slane %v904_v20, %v4325_v8  ;;  %v948_v28 = vrot.slane %v908_v29, %v4325_v8 }
 0x189   : > { %v949_v30 = vmul.f32 %v920_v10, %v875_v21  ;;  %v950_v31 = vmul.f32 %v924_v25, %v875_v21  ;;  %v951_v36 = vmul.f32 %v928_v60, %v875_v21  ;;  %v952_v33 = vmul.f32 %v932_v41, %v875_v21 }
 0x18a   : > { %v953_v34 = vmul.f32 %v936_v26, %v875_v21  ;;  %v954_v24 = vmul.f32 %v940_v27, %v875_v21  ;;  %v955_v37 = vmul.f32 %v944_v14, %v875_v21  ;;  %v956_v38 = vmul.f32 %v948_v28, %v875_v21  ;;  %v1154_v21 = vpop.permute.xlu0 %1153 }
 0x18b   : > { %v957_v40 = vadd.f32 %v949_v30, %v4367_v23  ;;  %v958_v42 = vadd.f32 %v950_v31, %v4369_v35  ;;  %v959_v57 = vadd.f32 %v951_v36, %v4377_v22  ;;  %v960_v58 = vadd.f32 %v952_v33, %v4379_v39 }
 0x18c   : > { %v961_v62 = vadd.f32 %v953_v34, %v4389_v47  ;;  %v962_v63 = vadd.f32 %v954_v24, %v4391_v48  ;;  %v963_v1 = vadd.f32 %v955_v37, %v4409_v6  ;;  %v964_v7 = vadd.f32 %v956_v38, %v4411_v13 }
 0x18d   : > { %v1051_v20 = vadd.f32 %v4413_v15, %v959_v57  ;;  %v1052_v29 = vadd.f32 %v4415_v16, %v960_v58  ;;  %v1049_v23 = vadd.f32 %v4405_v4, %v957_v40  ;;  %v1050_v35 = vadd.f32 %v4407_v5, %v958_v42 }
 0x18e   : > { %v1055_v22 = vadd.f32 %v4421_v59, %v963_v1  ;;  %v1056_v39 = vadd.f32 %v4423_v19, %v964_v7  ;;  %v1053_v47 = vadd.f32 %v4417_v17, %v961_v62  ;;  %v1054_v48 = vadd.f32 %v4419_v18, %v962_v63 }
 0x18f   : > { %v1143_v6 = vadd.f32 %v1135_v46, %v1051_v20  ;;  %v1144_v10 = vadd.f32 %v1136_v49, %v1052_v29  ;;  %v1141_v13 = vadd.f32 %v1133_v43, %v1049_v23  ;;  %v1142_v25 = vadd.f32 %v1134_v45, %v1050_v35 }
 0x190   : > { %v1147_v15 = vadd.f32 %v1139_v55, %v1055_v22  ;;  %v1148_v60 = vadd.f32 %v1140_v56, %v1056_v39  ;;  %v1145_v16 = vadd.f32 %v1137_v51, %v1053_v47  ;;  %v1146_v41 = vadd.f32 %v1138_v54, %v1054_v48 }
 0x191   : > { %v4489_v4 = vadd.f32 %v1154_v21, %v1143_v6  ;;  %v4491_v5 = vadd.f32 %v1154_v21, %v1144_v10  ;;  %v4493_v26 = vadd.f32 %v1154_v21, %v1141_v13  ;;  %v4495_v59 = vadd.f32 %v1154_v21, %v1142_v25 }
 0x192   : > { %v4497_v19 = vadd.f32 %v1154_v21, %v1147_v15  ;;  %v4499_v17 = vadd.f32 %v1154_v21, %v1148_v60  ;;  %v4501_v18 = vadd.f32 %v1154_v21, %v1145_v16  ;;  %v4503_v43 = vadd.f32 %v1154_v21, %v1146_v41 }
 0x193   : > { %v1182_v45 = vsel %vm352_vm5, %v4489_v4, 0.0  ;;  %v1189_v46 = vsel %vm352_vm5, %v4491_v5, 0.0  ;;  %v1168_v49 = vsel %vm352_vm5, %v4493_v26, 0.0  ;;  %v1175_v51 = vsel %vm352_vm5, %v4495_v59, 0.0 }
 0x194   : > { %v1183_v54 = vrot.slane %v1182_v45, 4  ;;  %v1190_v55 = vrot.slane %v1189_v46, 4  ;;  %v1169_v56 = vrot.slane %v1168_v49, 4  ;;  %v1176_v27 = vrot.slane %v1175_v51, 4 }
 0x195   : > { %v1210_v14 = vsel %vm352_vm5, %v4497_v19, 0.0  ;;  %v1217_v28 = vsel %vm352_vm5, %v4499_v17, 0.0  ;;  %v1196_v30 = vsel %vm352_vm5, %v4501_v18, 0.0  ;;  %v1203_v31 = vsel %vm352_vm5, %v4503_v43, 0.0 }
 0x196   : > { %v1184_v36 = vadd.f32 %v1183_v54, %v1182_v45  ;;  %v1191_v33 = vadd.f32 %v1190_v55, %v1189_v46  ;;  %v1170_v34 = vadd.f32 %v1169_v56, %v1168_v49  ;;  %v1177_v24 = vadd.f32 %v1176_v27, %v1175_v51 }
 0x197   : > { %v1211_v37 = vrot.slane %v1210_v14, 4  ;;  %v1218_v38 = vrot.slane %v1217_v28, 4  ;;  %v1197_v40 = vrot.slane %v1196_v30, 4  ;;  %v1204_v42 = vrot.slane %v1203_v31, 4 }
 0x198   : > { %v1185_v57 = vrot.slane %v1184_v36, 2  ;;  %v1192_v58 = vrot.slane %v1191_v33, 2  ;;  %v1171_v62 = vrot.slane %v1170_v34, 2  ;;  %v1178_v63 = vrot.slane %v1177_v24, 2 }
 0x199   : > { %v1212_v1 = vadd.f32 %v1211_v37, %v1210_v14  ;;  %v1219_v7 = vadd.f32 %v1218_v38, %v1217_v28  ;;  %v1198_v20 = vadd.f32 %v1197_v40, %v1196_v30  ;;  %v1205_v29 = vadd.f32 %v1204_v42, %v1203_v31 }
 0x19a   : > { %v1186_v23 = vadd.f32 %v1185_v57, %v1184_v36  ;;  %v1193_v35 = vadd.f32 %v1192_v58, %v1191_v33  ;;  %v1172_v21 = vadd.f32 %v1171_v62, %v1170_v34  ;;  %v1179_v22 = vadd.f32 %v1178_v63, %v1177_v24 }
 0x19b   : > { %v1213_v39 = vrot.slane %v1212_v1, 2  ;;  %v1220_v47 = vrot.slane %v1219_v7, 2  ;;  %v1199_v48 = vrot.slane %v1198_v20, 2  ;;  %v1206_v6 = vrot.slane %v1205_v29, 2 }
 0x19c   : > { %v1187_v10 = vrot.slane %v1186_v23, 1  ;;  %v1194_v13 = vrot.slane %v1193_v35, 1  ;;  %v1173_v25 = vrot.slane %v1172_v21, 1  ;;  %v1180_v15 = vrot.slane %v1179_v22, 1 }
 0x19d   : > { %v1214_v60 = vadd.f32 %v1213_v39, %v1212_v1  ;;  %v1221_v16 = vadd.f32 %v1220_v47, %v1219_v7  ;;  %v1200_v41 = vadd.f32 %v1199_v48, %v1198_v20  ;;  %v1207_v45 = vadd.f32 %v1206_v6, %v1205_v29 }
 0x19e   : > { %v1188_v46 = vadd.f32 %v1187_v10, %v1186_v23  ;;  %v1195_v49 = vadd.f32 %v1194_v13, %v1193_v35  ;;  %v1174_v51 = vadd.f32 %v1173_v25, %v1172_v21  ;;  %v1181_v54 = vadd.f32 %v1180_v15, %v1179_v22 }
 0x19f   : > { %v1215_v55 = vrot.slane %v1214_v60, 1  ;;  %v1222_v56 = vrot.slane %v1221_v16, 1  ;;  %v1201_v27 = vrot.slane %v1200_v41, 1  ;;  %v1208_v14 = vrot.slane %v1207_v45, 1 }
 0x1a0   : > { %v1226_v28 = vmul.f32 0.25, %v1188_v46  ;;  %v1227_v30 = vmul.f32 0.25, %v1195_v49  ;;  %v1224_v31 = vmul.f32 0.25, %v1174_v51  ;;  %v1225_v36 = vmul.f32 0.25, %v1181_v54 }
 0x1a1   : > { %v1216_v33 = vadd.f32 %v1215_v55, %v1214_v60  ;;  %v1223_v34 = vadd.f32 %v1222_v56, %v1221_v16  ;;  %v1202_v24 = vadd.f32 %v1201_v27, %v1200_v41  ;;  %v1209_v37 = vadd.f32 %v1208_v14, %v1207_v45 }
 0x1a2   : > { %v4522_v38 = vsub.f32 %v4489_v4, %v1226_v28  ;;  %v4525_v40 = vsub.f32 %v4491_v5, %v1227_v30  ;;  %v4528_v42 = vsub.f32 %v4493_v26, %v1224_v31  ;;  %v4531_v57 = vsub.f32 %v4495_v59, %v1225_v36 }
 0x1a3   : > { %v1230_v58 = vmul.f32 0.25, %v1216_v33  ;;  %v1231_v62 = vmul.f32 0.25, %v1223_v34  ;;  %v1228_v63 = vmul.f32 0.25, %v1202_v24  ;;  %v1229_v1 = vmul.f32 0.25, %v1209_v37 }
 0x1a4   : > { %v1242_v7 = vmul.f32 %v4522_v38, %v4522_v38  ;;  %v1243_v4 = vmul.f32 %v4525_v40, %v4525_v40  ;;  %v1240_v5 = vmul.f32 %v4528_v42, %v4528_v42  ;;  %v1241_v26 = vmul.f32 %v4531_v57, %v4531_v57 }
 0x1a5   : > { %v4542_v20 = vsub.f32 %v4497_v19, %v1230_v58  ;;  %v4545_v59 = vsub.f32 %v4499_v17, %v1231_v62  ;;  %v4548_v29 = vsub.f32 %v4501_v18, %v1228_v63  ;;  %v4551_v23 = vsub.f32 %v4503_v43, %v1229_v1 }
 0x1a6   : > { %v1262_v35 = vsel %vm352_vm5, %v1242_v7, 0.0  ;;  %v1269_v21 = vsel %vm352_vm5, %v1243_v4, 0.0  ;;  %v1248_v22 = vsel %vm352_vm5, %v1240_v5, 0.0  ;;  %v1255_v39 = vsel %vm352_vm5, %v1241_v26, 0.0 }
 0x1a7   : > { %v1263_v47 = vrot.slane %v1262_v35, 4  ;;  %v1270_v19 = vrot.slane %v1269_v21, 4  ;;  %v1249_v48 = vrot.slane %v1248_v22, 4  ;;  %v1256_v6 = vrot.slane %v1255_v39, 4 }
 0x1a8   : > { %v1246_v17 = vmul.f32 %v4542_v20, %v4542_v20  ;;  %v1247_v18 = vmul.f32 %v4545_v59, %v4545_v59  ;;  %v1244_v43 = vmul.f32 %v4548_v29, %v4548_v29  ;;  %v1245_v10 = vmul.f32 %v4551_v23, %v4551_v23 }
 0x1a9   : > { %v1264_v13 = vadd.f32 %v1263_v47, %v1262_v35  ;;  %v1271_v25 = vadd.f32 %v1270_v19, %v1269_v21  ;;  %v1250_v15 = vadd.f32 %v1249_v48, %v1248_v22  ;;  %v1257_v60 = vadd.f32 %v1256_v6, %v1255_v39 }
 0x1aa   : > { %v1290_v16 = vsel %vm352_vm5, %v1246_v17, 0.0  ;;  %v1297_v41 = vsel %vm352_vm5, %v1247_v18, 0.0  ;;  %v1276_v45 = vsel %vm352_vm5, %v1244_v43, 0.0  ;;  %v1283_v46 = vsel %vm352_vm5, %v1245_v10, 0.0 }
 0x1ab   : > { %v1265_v49 = vrot.slane %v1264_v13, 2  ;;  %v1272_v51 = vrot.slane %v1271_v25, 2  ;;  %v1251_v54 = vrot.slane %v1250_v15, 2  ;;  %v1258_v55 = vrot.slane %v1257_v60, 2 }
 0x1ac   : > { %v1291_v56 = vrot.slane %v1290_v16, 4  ;;  %v1298_v27 = vrot.slane %v1297_v41, 4  ;;  %v1277_v14 = vrot.slane %v1276_v45, 4  ;;  %v1284_v28 = vrot.slane %v1283_v46, 4 }
 0x1ad   : > { %v1266_v30 = vadd.f32 %v1265_v49, %v1264_v13  ;;  %v1273_v31 = vadd.f32 %v1272_v51, %v1271_v25  ;;  %v1252_v36 = vadd.f32 %v1251_v54, %v1250_v15  ;;  %v1259_v33 = vadd.f32 %v1258_v55, %v1257_v60 }
 0x1ae   : > { %v1292_v34 = vadd.f32 %v1291_v56, %v1290_v16  ;;  %v1299_v24 = vadd.f32 %v1298_v27, %v1297_v41  ;;  %v1278_v37 = vadd.f32 %v1277_v14, %v1276_v45  ;;  %v1285_v58 = vadd.f32 %v1284_v28, %v1283_v46 }
 0x1af   : > { %v1267_v62 = vrot.slane %v1266_v30, 1  ;;  %v1274_v63 = vrot.slane %v1273_v31, 1  ;;  %v1253_v1 = vrot.slane %v1252_v36, 1  ;;  %v1260_v7 = vrot.slane %v1259_v33, 1 }
 0x1b0   : > { %v1293_v4 = vrot.slane %v1292_v34, 2  ;;  %v1300_v5 = vrot.slane %v1299_v24, 2  ;;  %v1279_v26 = vrot.slane %v1278_v37, 2  ;;  %v1286_v35 = vrot.slane %v1285_v58, 2 }
 0x1b1   : > { %v1268_v21 = vadd.f32 %v1267_v62, %v1266_v30  ;;  %v1275_v22 = vadd.f32 %v1274_v63, %v1273_v31  ;;  %v1254_v39 = vadd.f32 %v1253_v1, %v1252_v36  ;;  %v1261_v47 = vadd.f32 %v1260_v7, %v1259_v33 }
 0x1b2   : > { %v1294_v19 = vadd.f32 %v1293_v4, %v1292_v34  ;;  %v1301_v48 = vadd.f32 %v1300_v5, %v1299_v24  ;;  %v1280_v6 = vadd.f32 %v1279_v26, %v1278_v37  ;;  %v1287_v17 = vadd.f32 %v1286_v35, %v1285_v58  ;;  %v1339_v24 = vpop.permute.xlu1 %1338 }
 0x1b3   : > { %v1306_v18 = vmul.f32 0.25, %v1268_v21  ;;  %v1307_v43 = vmul.f32 0.25, %v1275_v22  ;;  %v1304_v10 = vmul.f32 0.25, %v1254_v39  ;;  %v1305_v13 = vmul.f32 0.25, %v1261_v47 }
 0x1b4   : > { %v1295_v25 = vrot.slane %v1294_v19, 1  ;;  %v1302_v15 = vrot.slane %v1301_v48, 1  ;;  %v1281_v60 = vrot.slane %v1280_v6, 1  ;;  %v1288_v16 = vrot.slane %v1287_v17, 1 }
 0x1b5   : > { %v1314_v41 = vadd.f32 1e-05, %v1306_v18  ;;  %v1315_v45 = vadd.f32 1e-05, %v1307_v43  ;;  %v1312_v46 = vadd.f32 1e-05, %v1304_v10 }
 0x1b6   : > { %v1313_v49 = vadd.f32 1e-05, %v1305_v13  ;;  %v1296_v51 = vadd.f32 %v1295_v25, %v1294_v19  ;;  %v1303_v54 = vadd.f32 %v1302_v15, %v1301_v48  ;;  %v1282_v55 = vadd.f32 %v1281_v60, %v1280_v6  ;;  %v1352_v26 = vpop.permute.xlu1 %1351 }
 0x1b7   : > { %3822 = vrsqrt.f32 %v1314_v41  ;;  %v1289_v56 = vadd.f32 %v1288_v16, %v1287_v17 }
 0x1b8   : > { %3824 = vrsqrt.f32 %v1315_v45  ;;  %v1310_v27 = vmul.f32 0.25, %v1296_v51  ;;  %v1311_v14 = vmul.f32 0.25, %v1303_v54  ;;  %v1308_v28 = vmul.f32 0.25, %v1282_v55  ;;  %v3902_v54 = vld [vmem:[%s4131_s16 + $0x8] sm:$0xff] }
 0x1b9   : > { %3826 = vrsqrt.f32 %v1312_v46  ;;  %v1309_v30 = vmul.f32 0.25, %v1289_v56 }
 0x1ba   : > { %3828 = vrsqrt.f32 %v1313_v49  ;;  %v1318_v31 = vadd.f32 1e-05, %v1310_v27  ;;  %v1319_v36 = vadd.f32 1e-05, %v1311_v14  ;;  %v1316_v33 = vadd.f32 1e-05, %v1308_v28 }
 0x1bb   : > { %v1317_v34 = vadd.f32 1e-05, %v1309_v30 }
 0x1bc   : > { %3830 = vrsqrt.f32 %v1318_v31 }
 0x1bd   : > { %3832 = vrsqrt.f32 %v1319_v36 }
 0x1be   : > { %3834 = vrsqrt.f32 %v1316_v33  ;;  %v3904_v33 = vld [vmem:[%s4131_s16 + $0x18] sm:$0xff] }
 0x1bf   : > { %3836 = vrsqrt.f32 %v1317_v34 }
 0x1c1   : > { %v3823_v37 = vpop.eup %3822 }
 0x1c2   : > { %v3825_v58 = vpop.eup %3824  ;;  %v1330_v62 = vmul.f32 %v3823_v37, %v4522_v38  ;;  %v3905_v37 = vld [vmem:[%s4131_s16 + $0x10] sm:$0xff] }
 0x1c3   : > { %v3827_v63 = vpop.eup %3826  ;;  %v1331_v1 = vmul.f32 %v3825_v58, %v4525_v40 }
 0x1c4   : > { %v3829_v7 = vpop.eup %3828  ;;  %v1343_v4 = vmul.f32 %v1339_v24, %v1330_v62  ;;  %v1328_v5 = vmul.f32 %v3827_v63, %v4528_v42  ;;  %v3687_v62 = vld [vmem:[%s5534_s2 + $0x10] sm:$0xf]  ;;  %v316_v63 = vld [vmem:[%s4136_s19] sm:$0xf] }
 0x1c5   : > { %v1344_v35 = vmul.f32 %v1339_v24, %v1331_v1  ;;  %v1329_v21 = vmul.f32 %v3829_v7, %v4531_v57  ;;  %v3686_v1 = vld [vmem:[%s5534_s2 + $0xc] sm:$0xf]  ;;  %v3688_v7 = vld [vmem:[%s5534_s2 + $0x14] sm:$0xf] }
 0x1c6   : > { %v3831_v22 = vpop.eup %3830  ;;  %v1356_v39 = vadd.f32 %v1352_v26, %v1343_v4  ;;  %v1341_v47 = vmul.f32 %v1339_v24, %v1328_v5  ;;  %v3689_v4 = vld [vmem:[%s5536_s4 + $0x18] sm:$0xf] }
 0x1c7   : > { %v3833_v19 = vpop.eup %3832  ;;  %v1357_v48 = vadd.f32 %v1352_v26, %v1344_v35  ;;  %v1342_v6 = vmul.f32 %v1339_v24, %v1329_v21  ;;  %v1334_v17 = vmul.f32 %v3831_v22, %v4542_v20 }
 0x1c8   : > { %v3835_v38 = vpop.eup %3834  ;;  %v1364_v18 = vmax.f32 %v1356_v39, 0.0  ;;  %v1354_v43 = vadd.f32 %v1352_v26, %v1341_v47  ;;  %v1335_v40 = vmul.f32 %v3833_v19, %v4545_v59 }
 0x1c9   : > { %v3837_v10 = vpop.eup %3836  ;;  %v1365_v42 = vmax.f32 %v1357_v48, 0.0  ;;  %v1355_v13 = vadd.f32 %v1352_v26, %v1342_v6  ;;  %v1347_v25 = vmul.f32 %v1339_v24, %v1334_v17  ;;  %v1332_v57 = vmul.f32 %v3835_v38, %v4548_v29 }
 0x1ca   : > { %v1362_v15 = vmax.f32 %v1354_v43, 0.0  ;;  %v1348_v60 = vmul.f32 %v1339_v24, %v1335_v40  ;;  %v1333_v16 = vmul.f32 %v3837_v10, %v4551_v23  ;;  %v3903_v23 = vld [vmem:[%s4131_s16] sm:$0xff] }
 0x1cb   : > { %v1379_v41 = vcombine.low %v1364_v18, %v1365_v42  ;;  %v1363_v45 = vmax.f32 %v1355_v13, 0.0  ;;  %v1360_v20 = vadd.f32 %v1352_v26, %v1347_v25  ;;  %v1345_v46 = vmul.f32 %v1339_v24, %v1332_v57 }
 0x1cc   : > { %v1361_v49 = vadd.f32 %v1352_v26, %v1348_v60  ;;  %v1346_v51 = vmul.f32 %v1339_v24, %v1333_v16 }
 0x1cd   : > { %v4578_v59 = vadd.f32 %v3902_v54, %v1379_v41  ;;  %v1378_v55 = vcombine.low %v1362_v15, %v1363_v45  ;;  %v1368_v56 = vmax.f32 %v1360_v20, 0.0  ;;  %v1358_v27 = vadd.f32 %v1352_v26, %v1345_v46 }
 0x1ce   : > { %v1369_v29 = vmax.f32 %v1361_v49, 0.0  ;;  %v1359_v14 = vadd.f32 %v1352_v26, %v1346_v51 }
 0x1cf   : > { %1396 = vrot.lane.b32.xlu1 %v4578_v59, %s4026_s13  ;;  %v4582_v28 = vadd.f32 %v3903_v23, %v1378_v55  ;;  %v1366_v30 = vmax.f32 %v1358_v27, 0.0  ;;  %v3693_v23 = vld [vmem:[%s5536_s4 + $0x24] sm:$0xf] }
 0x1d0   : > { %v1381_v31 = vcombine.low %v1368_v56, %v1369_v29  ;;  %v1367_v36 = vmax.f32 %v1359_v14, 0.0  ;;  %v3690_v56 = vld [vmem:[%s5536_s4 + $0x1c] sm:$0xf]  ;;  %v3692_v29 = vld [vmem:[%s5535_s3 + $0x4] sm:$0xf] }
 0x1d1   : > { %1394 = vrot.lane.b32.xlu0 %v4582_v28, %s4026_s13  ;;  %v3691_v14 = vld [vmem:[%s5536_s4 + $0x20] sm:$0xf] }
 0x1d2   : > { %v4586_v34 = vadd.f32 %v3904_v33, %v1381_v31  ;;  %v1380_v24 = vcombine.low %v1366_v30, %v1367_v36  ;;  %v3694_v30 = vld [vmem:[%s5536_s4 + $0x28] sm:$0xf]  ;;  %v3695_v31 = vld [vmem:[%s5536_s4 + $0x2c] sm:$0xf] }
 0x1d4   : > { %1400 = vrot.lane.b32.xlu1 %v4586_v34, %s4026_s13  ;;  %v4590_v58 = vadd.f32 %v3905_v37, %v1380_v24 }
 0x1d6   : > { %1398 = vrot.lane.b32.xlu0 %v4590_v58, %s4026_s13  ;;  %s4027_s13 = smov 124  }
 0x1d8   : > { %1458 = vperm.xlu1 %3795, %v3687_v62  }
 0x1da   : > { %318 = vrot.lane.b32.xlu0 %v316_v63, %s4021_s27 }
 0x1dc   : > { %1436 = vperm.xlu1 %3795, %v3686_v1  }
 0x1de   : > { %1513 = vperm.xlu0 %3794, %v3688_v7  }
 0x1e2   : > { %1576 = vperm.xlu0 %3794, %v3689_v4  }
 0x241   : > { %v1397_v5 = vpop.permute.xlu1 %1396 }
 0x242   : > { %v1403_v26 = vrot.slane %v1397_v5, 4 }
 0x243   : > { %v1395_v35 = vpop.permute.xlu0 %1394 }
 0x244   : > { %v1402_v21 = vrot.slane %v1395_v35, 4 }
 0x246   : > { %v1408_v22 = vsel %vm352_vm5, %v1402_v21, %v1403_v26  ;;  %v1401_v39 = vpop.permute.xlu1 %1400  ;;  %v1407_v10 = vsel %vm1406_vm8, %v1402_v21, %v1395_v35 }
 0x247   : > { %v4609_v47 = vsel %vm1406_vm8, %v1408_v22, %v1397_v5  ;;  %v1405_v19 = vrot.slane %v1401_v39, 4 }
 0x248   : > { %v1399_v48 = vpop.permute.xlu0 %1398 }
 0x249   : > { %v1404_v6 = vrot.slane %v1399_v48, 4  ;;  %1426 = vst.msk [vmem:[#allocation3 + $0x20] sm:$0xf] %vm321_vm9, %v1405_v19 }
 0x24b   : > { %v1410_v17 = vsel %vm352_vm5, %v1403_v26, %v1404_v6  ;;  %v1412_v38 = vsel %vm352_vm5, %v1404_v6, %v1405_v19 }
 0x24c   : > { %v4616_v18 = vsel %vm1406_vm8, %v1410_v17, %v1399_v48  ;;  %v4619_v43 = vsel %vm1406_vm8, %v1412_v38, %v1401_v39  ;;  %v319_v40 = vpop.permute.xlu0 %318 }
 0x24d   : > { %322 = vst.msk [vmem:[#allocation3] sm:$0xf] %vm321_vm9, %v319_v40 }
 0x24e   : > { %1421 = vst.msk [vmem:[#allocation3] sm:$0xff] %vm1420_vm11, %v1407_v10 }
 0x250   : > { %v4623_v13 = vld [vmem:[#allocation3 + $0x20] sm:$0xf] }
 0x255   : > { %v1428_v42 = vld [vmem:[#allocation3] sm:$0xff] }
 0x256   : > { %1565 = vst.msk [vmem:[#allocation3] sm:$0xf] %vm321_vm9, %v4623_v13 }
 0x257   : > { %v1459_v25 = vpop.permute.xlu1 %1458 }
 0x258   : > { %v1466_v57 = vrot.slane %v1459_v25, %v4189_v32 }
 0x25a   : > { %v1472_v15 = vmul.f32 %v1466_v57, %v4623_v13  ;;  %v1468_v41 = vmul.f32 %v1466_v57, %v1428_v42  ;;  %v1470_v20 = vmul.f32 %v1466_v57, %v4616_v18  ;;  %v1469_v46 = vmul.f32 %v1466_v57, %v4609_v47 }
 0x25b   : > { %v1471_v51 = vmul.f32 %v1466_v57, %v4619_v43  ;;  %v1437_v36 = vpop.permute.xlu1 %1436 }
 0x25c   : > { %1486 = vrot.lane.b32.xlu1 %v1472_v15, %s4021_s27  ;;  %v1444_v1 = vrot.slane %v1437_v36, %v4189_v32 }
 0x25d   : > { %v1514_v60 = vpop.permute.xlu0 %1513 }
 0x25e   : > { %v1521_v16 = vrot.slane %v1514_v60, %v4189_v32  ;;  %v1446_v21 = vmul.f32 %v1444_v1, %v1428_v42 }
 0x260   : > { %1478 = vrot.lane.b32.xlu1 %v1468_v41, %s4021_s27  ;;  %v1523_v45 = vmul.f32 %v1521_v16, %v1428_v42  ;;  %v1524_v49 = vmul.f32 %v1521_v16, %v4609_v47  ;;  %v1526_v54 = vmul.f32 %v1521_v16, %v4619_v43  ;;  %v1525_v55 = vmul.f32 %v1521_v16, %v4616_v18 }
 0x261   : > { %v1527_v27 = vmul.f32 %v1521_v16, %v4623_v13  ;;  %v1577_v24 = vpop.permute.xlu0 %1576 }
 0x262   : > { %1533 = vrot.lane.b32.xlu0 %v1523_v45, %s4027_s13  ;;  %v1584_v25 = vrot.slane %v1577_v24, %v4189_v32 }
 0x264   : > { %1482 = vrot.lane.b32.xlu1 %v1470_v20, %s4021_s27  ;;  %v1447_v20 = vmul.f32 %v1444_v1, %v4609_v47 }
 0x266   : > { %1480 = vrot.lane.b32.xlu0 %v1469_v46, %s4021_s27  ;;  %v1448_v46 = vmul.f32 %v1444_v1, %v4616_v18 }
 0x268   : > { %1535 = vrot.lane.b32.xlu1 %v1524_v49, %s4027_s13 }
 0x26a   : > { %1484 = vrot.lane.b32.xlu0 %v1471_v51, %s4021_s27  ;;  %s4029_s27 = smov 122  }
 0x26c   : > { %1539 = vrot.lane.b32.xlu1 %v1526_v54, %s4027_s13 }
 0x26e   : > { %1537 = vrot.lane.b32.xlu0 %v1525_v55, %s4027_s13 }
 0x270   : > { %1808 = vperm.xlu1 %3795, %v3690_v56  }
 0x272   : > { %1541 = vrot.lane.b32.xlu0 %v1527_v27, %s4027_s13 }
 0x274   : > { %1846 = vperm.xlu1 %3795, %v3692_v29  }
 0x276   : > { %1824 = vperm.xlu0 %3794, %v3691_v14  }
 0x278   : > { %3797 = vset.pattern.permute.xlu1 %v5542_v52 }
 0x279   : > { %2026 = vperm.xlu1 %3797, %v3692_v29  }
 0x27a   : > { %3796 = vset.pattern.permute.xlu0 %v5543_v50 }
 0x27b   : > { %1934 = vperm.xlu0 %3796, %v3692_v29  }
 0x27d   : > { %3798 = vset.pattern.permute.xlu1 %v5539_v53 }
 0x27e   : > { %2118 = vperm.xlu1 %3798, %v3692_v29  }
 0x27f   : > { %3799 = vset.pattern.permute.xlu0 %v5540_v0 }
 0x280   : > { %2213 = vperm.xlu0 %3799, %v3693_v23  }
 0x282   : > { %3800 = vset.pattern.permute.xlu1 %v5540_v0 }
 0x283   : > { %2398 = vperm.xlu1 %3800, %v3694_v30  }
 0x287   : > { %2411 = vperm.xlu1 %3800, %v3695_v31  }
 0x2ce   : > { %v1487_v33 = vpop.permute.xlu1 %1486 }
 0x2cf   : > { %v1492_v57 = vrot.slane %v1487_v33, 4 }
 0x2d2   : > { %v1479_v37 = vpop.permute.xlu1 %1478 }
 0x2d3   : > { %v1488_v5 = vrot.slane %v1479_v37, 4 }
 0x2d4   : > { %v1534_v62 = vpop.permute.xlu0 %1533 }
 0x2d5   : > { %v1543_v22 = vrot.slane %v1534_v62, 4 }
 0x2d6   : > { %v1483_v63 = vpop.permute.xlu1 %1482 }
 0x2d7   : > { %v1490_v7 = vrot.slane %v1483_v63, 4 }
 0x2d8   : > { %v1481_v4 = vpop.permute.xlu0 %1480 }
 0x2d9   : > { %v1489_v26 = vrot.slane %v1481_v4, 4 }
 0x2da   : > { %v1536_v35 = vpop.permute.xlu1 %1535 }
 0x2db   : > { %v1493_v39 = vsel %vm352_vm5, %v1488_v5, %v1489_v26  ;;  %v1544_v19 = vrot.slane %v1536_v35, 4  ;;  %v1495_v6 = vsel %vm352_vm5, %v1489_v26, %v1490_v7  ;;  %v1449_v26 = vmul.f32 %v1444_v1, %v4619_v43 }
 0x2dc   : > { %v1494_v48 = vsel %vm495_vm7, %v1479_v37, %v1493_v39  ;;  %v1485_v17 = vpop.permute.xlu0 %1484  ;;  %v1496_v42 = vsel %vm495_vm7, %v1481_v4, %v1495_v6 }
 0x2dd   : > { %v1505_v38 = vadd.f32 %v1494_v48, %v1446_v21  ;;  %v1548_v40 = vsel %vm352_vm5, %v1543_v22, %v1544_v19  ;;  %v1491_v10 = vrot.slane %v1485_v17, 4  ;;  %v1506_v27 = vadd.f32 %v1496_v42, %v1447_v20 }
 0x2de   : > { %v1550_v15 = vsel %vm1549_vm12, %v1534_v62, %v1548_v40  ;;  %v1540_v60 = vpop.permute.xlu1 %1539 }
 0x2df   : > { %v1561_v16 = vadd.f32 %v1550_v15, %v1505_v38  ;;  %v1497_v41 = vsel %vm352_vm5, %v1490_v7, %v1491_v10  ;;  %v1546_v45 = vrot.slane %v1540_v60, 4  ;;  %v1499_v55 = vsel %vm352_vm5, %v1491_v10, %v1492_v57 }
 0x2e0   : > { %v1498_v49 = vsel %vm495_vm7, %v1483_v63, %v1497_v41  ;;  %v1538_v51 = vpop.permute.xlu0 %1537  ;;  %v1500_v31 = vsel %vm495_vm7, %v1485_v17, %v1499_v55 }
 0x2e1   : > { %v4682_v54 = vadd.f32 %v1584_v25, %v1561_v16  ;;  %v1545_v56 = vrot.slane %v1538_v51, 4  ;;  %v1507_v29 = vadd.f32 %v1498_v49, %v1448_v46  ;;  %v1508_v48 = vadd.f32 %v1500_v31, %v1449_v26 }
 0x2e3   : > { %v1598_v14 = vcombine.high %v4682_v54, %v4682_v54  ;;  %v1606_v23 = vsel %vm352_vm5, %v4682_v54, 0.0  ;;  %v1551_v47 = vsel %vm352_vm5, %v1544_v19, %v1545_v56  ;;  %v1553_v18 = vsel %vm352_vm5, %v1545_v56, %v1546_v45 }
 0x2e4   : > { %v1607_v30 = vrot.slane %v1606_v23, 4  ;;  %v1552_v36 = vsel %vm1549_vm12, %v1536_v35, %v1551_v47  ;;  %v1554_v33 = vsel %vm1549_vm12, %v1538_v51, %v1553_v18  ;;  %v1542_v24 = vpop.permute.xlu0 %1541 }
 0x2e5   : > { %v1613_v37 = vsel %vm352_vm5, %v1598_v14, 0.0  ;;  %v1562_v62 = vadd.f32 %v1552_v36, %v1506_v27  ;;  %v1563_v63 = vadd.f32 %v1554_v33, %v1507_v29  ;;  %v1547_v7 = vrot.slane %v1542_v24, 4 }
 0x2e6   : > { %v1608_v4 = vadd.f32 %v1607_v30, %v1606_v23  ;;  %v1614_v5 = vrot.slane %v1613_v37, 4 }
 0x2e7   : > { %v4696_v21 = vadd.f32 %v1584_v25, %v1562_v62  ;;  %v4698_v22 = vadd.f32 %v1584_v25, %v1563_v63  ;;  %v1555_v39 = vsel %vm352_vm5, %v1546_v45, %v1547_v7 }
 0x2e8   : > { %v1609_v19 = vrot.slane %v1608_v4, 2  ;;  %v1615_v35 = vadd.f32 %v1614_v5, %v1613_v37  ;;  %v1556_v6 = vsel %vm1549_vm12, %v1540_v60, %v1555_v39 }
 0x2e9   : > { %v1599_v17 = vcombine.high %v4696_v21, %v4696_v21  ;;  %v1600_v38 = vcombine.high %v4698_v22, %v4698_v22  ;;  %v1620_v43 = vsel %vm352_vm5, %v4696_v21, 0.0  ;;  %v1634_v1 = vsel %vm352_vm5, %v4698_v22, 0.0 }
 0x2ea   : > { %v1621_v40 = vrot.slane %v1620_v43, 4  ;;  %v1635_v10 = vrot.slane %v1634_v1, 4  ;;  %v1564_v57 = vadd.f32 %v1556_v6, %v1508_v48  ;;  %v1610_v15 = vadd.f32 %v1609_v19, %v1608_v4 }
 0x2eb   : > { %v1627_v42 = vsel %vm352_vm5, %v1599_v17, 0.0  ;;  %v1641_v60 = vsel %vm352_vm5, %v1600_v38, 0.0  ;;  %v1616_v16 = vrot.slane %v1615_v35, 2 }
 0x2ec   : > { %v1622_v41 = vadd.f32 %v1621_v40, %v1620_v43  ;;  %v1628_v45 = vrot.slane %v1627_v42, 4  ;;  %v1636_v20 = vadd.f32 %v1635_v10, %v1634_v1  ;;  %v1642_v46 = vrot.slane %v1641_v60, 4 }
 0x2ed   : > { %v4712_v49 = vadd.f32 %v1584_v25, %v1564_v57  ;;  %v1611_v51 = vrot.slane %v1610_v15, 1  ;;  %v1617_v55 = vadd.f32 %v1616_v16, %v1615_v35 }
 0x2ee   : > { %v1623_v56 = vrot.slane %v1622_v41, 2  ;;  %v1629_v27 = vadd.f32 %v1628_v45, %v1627_v42  ;;  %v1637_v29 = vrot.slane %v1636_v20, 2  ;;  %v1643_v14 = vadd.f32 %v1642_v46, %v1641_v60 }
 0x2ef   : > { %v1601_v23 = vcombine.high %v4712_v49, %v4712_v49  ;;  %v1648_v47 = vsel %vm352_vm5, %v4712_v49, 0.0  ;;  %v1612_v18 = vadd.f32 %v1611_v51, %v1610_v15  ;;  %v1618_v30 = vrot.slane %v1617_v55, 1 }
 0x2f0   : > { %v1638_v31 = vadd.f32 %v1637_v29, %v1636_v20  ;;  %v1644_v36 = vrot.slane %v1643_v14, 2  ;;  %v1649_v33 = vrot.slane %v1648_v47, 4  ;;  %v1624_v24 = vadd.f32 %v1623_v56, %v1622_v41 }
 0x2f1   : > { %v1655_v25 = vsel %vm352_vm5, %v1601_v23, 0.0  ;;  %v1619_v37 = vadd.f32 %v1618_v30, %v1617_v55  ;;  %v1630_v62 = vrot.slane %v1629_v27, 2  ;;  %v1662_v19 = vmul.f32 0.25, %v1612_v18 }
 0x2f2   : > { %v1639_v63 = vrot.slane %v1638_v31, 1  ;;  %v1645_v7 = vadd.f32 %v1644_v36, %v1643_v14  ;;  %v1650_v4 = vadd.f32 %v1649_v33, %v1648_v47  ;;  %v1656_v5 = vrot.slane %v1655_v25, 4 }
 0x2f3   : > { %v1625_v26 = vrot.slane %v1624_v24, 1  ;;  %v1631_v39 = vadd.f32 %v1630_v62, %v1629_v27  ;;  %v1663_v35 = vmul.f32 0.25, %v1619_v37 }
 0x2f4   : > { %v1640_v48 = vadd.f32 %v1639_v63, %v1638_v31  ;;  %v1646_v6 = vrot.slane %v1645_v7, 1  ;;  %v1651_v17 = vrot.slane %v1650_v4, 2  ;;  %v1657_v38 = vadd.f32 %v1656_v5, %v1655_v25 }
 0x2f5   : > { %v1626_v43 = vadd.f32 %v1625_v26, %v1624_v24  ;;  %v1632_v1 = vrot.slane %v1631_v39, 1  ;;  %v1678_v40 = vcombine.low %v1662_v19, %v1663_v35 }
 0x2f6   : > { %v1647_v10 = vadd.f32 %v1646_v6, %v1645_v7  ;;  %v1652_v57 = vadd.f32 %v1651_v17, %v1650_v4  ;;  %v1658_v15 = vrot.slane %v1657_v38, 2  ;;  %v1666_v16 = vmul.f32 0.25, %v1640_v48 }
 0x2f7   : > { %v1633_v42 = vadd.f32 %v1632_v1, %v1631_v39  ;;  %v4720_v60 = vsub.f32 %v4682_v54, %v1678_v40  ;;  %v1664_v46 = vmul.f32 0.25, %v1626_v43 }
 0x2f8   : > { %v1667_v41 = vmul.f32 0.25, %v1647_v10  ;;  %v1653_v45 = vrot.slane %v1652_v57, 1  ;;  %v1659_v20 = vadd.f32 %v1658_v15, %v1657_v38 }
 0x2f9   : > { %v1665_v51 = vmul.f32 0.25, %v1633_v42  ;;  %v1690_v55 = vmul.f32 %v4720_v60, %v4720_v60 }
 0x2fa   : > { %v1680_v56 = vcombine.low %v1666_v16, %v1667_v41  ;;  %v1654_v27 = vadd.f32 %v1653_v45, %v1652_v57  ;;  %v1660_v29 = vrot.slane %v1659_v20, 1 }
 0x2fb   : > { %v1679_v14 = vcombine.low %v1664_v46, %v1665_v51  ;;  %v1698_v23 = vcombine.high %v1690_v55, %v1690_v55  ;;  %v1706_v47 = vsel %vm352_vm5, %v1690_v55, 0.0 }
 0x2fc   : > { %v4726_v18 = vsub.f32 %v4698_v22, %v1680_v56  ;;  %v1661_v54 = vadd.f32 %v1660_v29, %v1659_v20  ;;  %v1707_v30 = vrot.slane %v1706_v47, 4  ;;  %v1668_v31 = vmul.f32 0.25, %v1654_v27 }
 0x2fd   : > { %v4729_v36 = vsub.f32 %v4696_v21, %v1679_v14  ;;  %v1713_v33 = vsel %vm352_vm5, %v1698_v23, 0.0 }
 0x2fe   : > { %v1692_v24 = vmul.f32 %v4726_v18, %v4726_v18  ;;  %v1669_v25 = vmul.f32 0.25, %v1661_v54  ;;  %v1708_v37 = vadd.f32 %v1707_v30, %v1706_v47  ;;  %v1714_v62 = vrot.slane %v1713_v33, 4 }
 0x2ff   : > { %v1691_v63 = vmul.f32 %v4729_v36, %v4729_v36 }
 0x300   : > { %v1700_v7 = vcombine.high %v1692_v24, %v1692_v24  ;;  %v1734_v22 = vsel %vm352_vm5, %v1692_v24, 0.0  ;;  %v1681_v4 = vcombine.low %v1668_v31, %v1669_v25  ;;  %v1709_v5 = vrot.slane %v1708_v37, 2 }
 0x301   : > { %v1735_v26 = vrot.slane %v1734_v22, 4  ;;  %v1699_v39 = vcombine.high %v1691_v63, %v1691_v63  ;;  %v1715_v21 = vadd.f32 %v1714_v62, %v1713_v33  ;;  %v1720_v19 = vsel %vm352_vm5, %v1691_v63, 0.0 }
 0x302   : > { %v1741_v35 = vsel %vm352_vm5, %v1700_v7, 0.0  ;;  %v4740_v48 = vsub.f32 %v4712_v49, %v1681_v4  ;;  %v1710_v6 = vadd.f32 %v1709_v5, %v1708_v37  ;;  %v1721_v17 = vrot.slane %v1720_v19, 4 }
 0x303   : > { %v1736_v38 = vadd.f32 %v1735_v26, %v1734_v22  ;;  %v1742_v43 = vrot.slane %v1741_v35, 4  ;;  %v1716_v1 = vrot.slane %v1715_v21, 2  ;;  %v1727_v40 = vsel %vm352_vm5, %v1699_v39, 0.0 }
 0x304   : > { %v1693_v10 = vmul.f32 %v4740_v48, %v4740_v48  ;;  %v1711_v57 = vrot.slane %v1710_v6, 1  ;;  %v1722_v15 = vadd.f32 %v1721_v17, %v1720_v19  ;;  %v1728_v42 = vrot.slane %v1727_v40, 4 }
 0x305   : > { %v1737_v16 = vrot.slane %v1736_v38, 2  ;;  %v1743_v41 = vadd.f32 %v1742_v43, %v1741_v35  ;;  %v1717_v45 = vadd.f32 %v1716_v1, %v1715_v21 }
 0x306   : > { %v1701_v20 = vcombine.high %v1693_v10, %v1693_v10  ;;  %v1712_v46 = vadd.f32 %v1711_v57, %v1710_v6  ;;  %v1723_v49 = vrot.slane %v1722_v15, 2  ;;  %v1729_v51 = vadd.f32 %v1728_v42, %v1727_v40 }
 0x307   : > { %v1738_v55 = vadd.f32 %v1737_v16, %v1736_v38  ;;  %v1744_v56 = vrot.slane %v1743_v41, 2  ;;  %v1718_v27 = vrot.slane %v1717_v45, 1  ;;  %v1748_v29 = vsel %vm352_vm5, %v1693_v10, 0.0 }
 0x308   : > { %v1724_v14 = vadd.f32 %v1723_v49, %v1722_v15  ;;  %v1730_v23 = vrot.slane %v1729_v51, 2  ;;  %v1749_v47 = vrot.slane %v1748_v29, 4  ;;  %v1755_v54 = vsel %vm352_vm5, %v1701_v20, 0.0 }
 0x309   : > { %v1739_v30 = vrot.slane %v1738_v55, 1  ;;  %v1745_v31 = vadd.f32 %v1744_v56, %v1743_v41  ;;  %v1719_v33 = vadd.f32 %v1718_v27, %v1717_v45  ;;  %v1756_v24 = vrot.slane %v1755_v54, 4 }
 0x30a   : > { %v1725_v25 = vrot.slane %v1724_v14, 1  ;;  %v1731_v37 = vadd.f32 %v1730_v23, %v1729_v51  ;;  %v1750_v62 = vadd.f32 %v1749_v47, %v1748_v29  ;;  %v1762_v63 = vmul.f32 0.25, %v1712_v46  ;;  %v1809_v47 = vpop.permute.xlu1 %1808 }
 0x30b   : > { %v1740_v7 = vadd.f32 %v1739_v30, %v1738_v55  ;;  %v1746_v22 = vrot.slane %v1745_v31, 1  ;;  %v1757_v4 = vadd.f32 %v1756_v24, %v1755_v54  ;;  %v1763_v5 = vmul.f32 0.25, %v1719_v33 }
 0x30c   : > { %v1726_v26 = vadd.f32 %v1725_v25, %v1724_v14  ;;  %v1732_v39 = vrot.slane %v1731_v37, 1  ;;  %v1751_v21 = vrot.slane %v1750_v62, 2  ;;  %v1770_v19 = vadd.f32 1e-05, %v1762_v63 }
 0x30d   : > { %v1747_v35 = vadd.f32 %v1746_v22, %v1745_v31  ;;  %v1766_v6 = vmul.f32 0.25, %v1740_v7  ;;  %v1758_v17 = vrot.slane %v1757_v4, 2  ;;  %v1771_v38 = vadd.f32 1e-05, %v1763_v5  ;;  %v1825_v31 = vpop.permute.xlu0 %1824 }
 0x30e   : > { %v1733_v43 = vadd.f32 %v1732_v39, %v1731_v37  ;;  %v1752_v1 = vadd.f32 %v1751_v21, %v1750_v62  ;;  %v1764_v40 = vmul.f32 0.25, %v1726_v26  ;;  %3838 = vrsqrt.f32 %v1770_v19 }
 0x30f   : > { %v1767_v10 = vmul.f32 0.25, %v1747_v35  ;;  %v1774_v57 = vadd.f32 1e-05, %v1766_v6  ;;  %v1759_v15 = vadd.f32 %v1758_v17, %v1757_v4  ;;  %3840 = vrsqrt.f32 %v1771_v38  ;;  %v4752_v35 = vpop.permute.xlu1 %1846 }
 0x310   : > { %v1753_v42 = vrot.slane %v1752_v1, 1  ;;  %v1765_v16 = vmul.f32 0.25, %v1733_v43  ;;  %v1772_v41 = vadd.f32 1e-05, %v1764_v40  ;;  %v1816_v25 = vrot.slane %v1809_v47, %v4189_v32 }
 0x311   : > { %v1775_v45 = vadd.f32 1e-05, %v1767_v10  ;;  %3842 = vrsqrt.f32 %v1774_v57  ;;  %v1760_v20 = vrot.slane %v1759_v15, 1  ;;  %v1832_v22 = vrot.slane %v1825_v31, %v4189_v32 }
 0x312   : > { %v1754_v46 = vadd.f32 %v1753_v42, %v1752_v1  ;;  %v1773_v49 = vadd.f32 1e-05, %v1765_v16  ;;  %3844 = vrsqrt.f32 %v1772_v41 }
 0x313   : > { %3846 = vrsqrt.f32 %v1775_v45  ;;  %v1761_v51 = vadd.f32 %v1760_v20, %v1759_v15  ;;  %v2027_v16 = vpop.permute.xlu1 %2026 }
 0x314   : > { %v1768_v55 = vmul.f32 0.25, %v1754_v46  ;;  %3848 = vrsqrt.f32 %v1773_v49 }
 0x315   : > { %v1769_v56 = vmul.f32 0.25, %v1761_v51 }
 0x316   : > { %v1776_v27 = vadd.f32 1e-05, %v1768_v55 }
 0x317   : > { %v1777_v29 = vadd.f32 1e-05, %v1769_v56 }
 0x318   : > { %v3839_v14 = vpop.eup %3838  ;;  %3850 = vrsqrt.f32 %v1776_v27 }
 0x319   : > { %v3841_v23 = vpop.eup %3840  ;;  %3852 = vrsqrt.f32 %v1777_v29 }
 0x31a   : > { %v1794_v54 = vcombine.low %v3839_v14, %v3841_v23 }
 0x31b   : > { %v3843_v30 = vpop.eup %3842 }
 0x31c   : > { %v3845_v33 = vpop.eup %3844  ;;  %v1802_v24 = vmul.f32 %v1794_v54, %v4720_v60 }
 0x31d   : > { %v3847_v37 = vpop.eup %3846 }
 0x31e   : > { %v3849_v62 = vpop.eup %3848  ;;  %v1796_v63 = vcombine.low %v3843_v30, %v3847_v37  ;;  %v1818_v7 = vmul.f32 %v1816_v25, %v1802_v24 }
 0x31f   : > { %v1795_v4 = vcombine.low %v3845_v33, %v3849_v62 }
 0x320   : > { %v1804_v5 = vmul.f32 %v1796_v63, %v4726_v18  ;;  %v1834_v26 = vadd.f32 %v1832_v22, %v1818_v7 }
 0x321   : > { %v1803_v39 = vmul.f32 %v1795_v4, %v4729_v36  ;;  %v2119_v4 = vpop.permute.xlu1 %2118 }
 0x322   : > { %v3851_v21 = vpop.eup %3850  ;;  %v1820_v19 = vmul.f32 %v1816_v25, %v1804_v5  ;;  %v4754_v6 = vmax.f32 %v1834_v26, 0.0 }
 0x323   : > { %v3853_v60 = vpop.eup %3852  ;;  %v1819_v17 = vmul.f32 %v1816_v25, %v1803_v39 }
 0x324   : > { %v1797_v38 = vcombine.low %v3851_v21, %v3853_v60  ;;  %v1836_v43 = vadd.f32 %v1832_v22, %v1820_v19  ;;  %v2032_v1 = vrot.slane %v4754_v6, %v4316_v2  ;;  %v2036_v40 = vrot.slane %v4754_v6, %v4322_v9 }
 0x325   : > { %v1835_v18 = vadd.f32 %v1832_v22, %v1819_v17  ;;  %v2124_v36 = vrot.slane %v4754_v6, %v4328_v12  ;;  %v2128_v10 = vrot.slane %v4754_v6, %v4333_v11  ;;  %v1856_v57 = vrot.slane %v4754_v6, %v4312_v61 }
 0x326   : > { %v1805_v15 = vmul.f32 %v1797_v38, %v4740_v48  ;;  %v4767_v42 = vmax.f32 %v1836_v43, 0.0  ;;  %v2072_v41 = vrot.slane %v2032_v1, %v4316_v2  ;;  %v2076_v45 = vrot.slane %v2036_v40, %v4316_v2 }
 0x327   : > { %v4771_v20 = vmax.f32 %v1835_v18, 0.0  ;;  %v2164_v46 = vrot.slane %v2124_v36, %v4328_v12  ;;  %v2168_v49 = vrot.slane %v2128_v10, %v4328_v12  ;;  %v1860_v51 = vrot.slane %v4754_v6, %v4319_v3 }
 0x328   : > { %v1821_v55 = vmul.f32 %v1816_v25, %v1805_v15  ;;  %v2048_v48 = vrot.slane %v4767_v42, %v4316_v2  ;;  %v2052_v56 = vrot.slane %v4767_v42, %v4322_v9  ;;  %v4781_v27 = vmul.f32 %v2072_v41, %v2027_v16 }
 0x329   : > { %v2040_v29 = vrot.slane %v4771_v20, %v4316_v2  ;;  %v2044_v14 = vrot.slane %v4771_v20, %v4322_v9  ;;  %v4787_v23 = vmul.f32 %v2076_v45, %v2027_v16  ;;  %v2132_v47 = vrot.slane %v4771_v20, %v4328_v12 }
 0x32a   : > { %v1837_v54 = vadd.f32 %v1832_v22, %v1821_v55  ;;  %v2088_v30 = vrot.slane %v2048_v48, %v4316_v2  ;;  %v2092_v31 = vrot.slane %v2052_v56, %v4316_v2  ;;  %v2136_v33 = vrot.slane %v4771_v20, %v4333_v11 }
 0x32b   : > { %v2080_v24 = vrot.slane %v2040_v29, %v4316_v2  ;;  %v2084_v25 = vrot.slane %v2044_v14, %v4316_v2  ;;  %v2140_v37 = vrot.slane %v4767_v42, %v4328_v12  ;;  %v2144_v62 = vrot.slane %v4767_v42, %v4333_v11 }
 0x32c   : > { %v4801_v63 = vmax.f32 %v1837_v54, 0.0  ;;  %v4803_v7 = vmul.f32 %v2088_v30, %v2027_v16  ;;  %v4805_v22 = vmul.f32 %v2092_v31, %v2027_v16  ;;  %v2172_v5 = vrot.slane %v2132_v47, %v4328_v12 }
 0x32d   : > { %v4808_v26 = vmul.f32 %v2080_v24, %v2027_v16  ;;  %v4810_v39 = vmul.f32 %v2084_v25, %v2027_v16  ;;  %v2176_v21 = vrot.slane %v2136_v33, %v4328_v12  ;;  %v2180_v19 = vrot.slane %v2140_v37, %v4328_v12 }
 0x32e   : > { %v2056_v60 = vrot.slane %v4801_v63, %v4316_v2  ;;  %v2060_v17 = vrot.slane %v4801_v63, %v4322_v9  ;;  %v2148_v38 = vrot.slane %v4801_v63, %v4328_v12  ;;  %v2152_v43 = vrot.slane %v4801_v63, %v4333_v11 }
 0x32f   : > { %v2184_v1 = vrot.slane %v2144_v62, %v4328_v12  ;;  %v4823_v40 = vmul.f32 %v2164_v46, %v2119_v4  ;;  %v4825_v18 = vmul.f32 %v2168_v49, %v2119_v4  ;;  %v4827_v36 = vmul.f32 %v2172_v5, %v2119_v4 }
 0x330   : > { %v2096_v10 = vrot.slane %v2056_v60, %v4316_v2  ;;  %v2100_v15 = vrot.slane %v2060_v17, %v4316_v2  ;;  %v2188_v41 = vrot.slane %v2148_v38, %v4328_v12  ;;  %v2192_v45 = vrot.slane %v2152_v43, %v4328_v12 }
 0x331   : > { %v4833_v55 = vmul.f32 %v2176_v21, %v2119_v4  ;;  %v4835_v48 = vmul.f32 %v2180_v19, %v2119_v4  ;;  %v4837_v56 = vmul.f32 %v2184_v1, %v2119_v4  ;;  %v1864_v46 = vrot.slane %v4771_v20, %v4312_v61 }
 0x332   : > { %v4841_v49 = vmul.f32 %v2096_v10, %v2027_v16  ;;  %v4843_v29 = vmul.f32 %v2100_v15, %v2027_v16  ;;  %v4845_v14 = vmul.f32 %v2188_v41, %v2119_v4  ;;  %v4847_v47 = vmul.f32 %v2192_v45, %v2119_v4 }
 0x333   : > { %v1868_v54 = vrot.slane %v4771_v20, %v4319_v3  ;;  %v1872_v30 = vrot.slane %v4767_v42, %v4312_v61  ;;  %v1876_v31 = vrot.slane %v4767_v42, %v4319_v3  ;;  %v1880_v33 = vrot.slane %v4801_v63, %v4312_v61 }
 0x334   : > { %v1884_v16 = vrot.slane %v4801_v63, %v4319_v3  ;;  %v1896_v24 = vrot.slane %v1856_v57, %v4312_v61  ;;  %v1900_v25 = vrot.slane %v1860_v51, %v4312_v61  ;;  %v1904_v37 = vrot.slane %v1864_v46, %v4312_v61 }
 0x335   : > { %v1908_v62 = vrot.slane %v1868_v54, %v4312_v61  ;;  %v1912_v4 = vrot.slane %v1872_v30, %v4312_v61  ;;  %v1916_v5 = vrot.slane %v1876_v31, %v4312_v61  ;;  %v1920_v21 = vrot.slane %v1880_v33, %v4312_v61  ;;  %v1935_v31 = vpop.permute.xlu0 %1934 }
 0x336   : > { %v1924_v19 = vrot.slane %v1884_v16, %v4312_v61  ;;  %v1925_v60 = vmul.f32 %v1896_v24, %v4752_v35  ;;  %v1926_v17 = vmul.f32 %v1900_v25, %v4752_v35  ;;  %v1927_v57 = vmul.f32 %v1904_v37, %v4752_v35 }
 0x337   : > { %v1928_v51 = vmul.f32 %v1908_v62, %v4752_v35  ;;  %v1929_v38 = vmul.f32 %v1912_v4, %v4752_v35  ;;  %v1930_v43 = vmul.f32 %v1916_v5, %v4752_v35  ;;  %v1931_v1 = vmul.f32 %v1920_v21, %v4752_v35 }
 0x338   : > { %v1932_v10 = vmul.f32 %v1924_v19, %v4752_v35  ;;  %v1940_v15 = vrot.slane %v4754_v6, %v4325_v8  ;;  %v1944_v41 = vrot.slane %v4754_v6, %v4339_v44  ;;  %v1948_v45 = vrot.slane %v4771_v20, %v4325_v8 }
 0x339   : > { %v1952_v46 = vrot.slane %v4771_v20, %v4339_v44  ;;  %v1956_v54 = vrot.slane %v4767_v42, %v4325_v8  ;;  %v1960_v30 = vrot.slane %v4767_v42, %v4339_v44  ;;  %v1964_v35 = vrot.slane %v4801_v63, %v4325_v8 }
 0x33a   : > { %v1968_v33 = vrot.slane %v4801_v63, %v4339_v44  ;;  %v1980_v6 = vrot.slane %v1940_v15, %v4325_v8  ;;  %v1984_v16 = vrot.slane %v1944_v41, %v4325_v8  ;;  %v1988_v24 = vrot.slane %v1948_v45, %v4325_v8 }
 0x33b   : > { %v1992_v20 = vrot.slane %v1952_v46, %v4325_v8  ;;  %v1996_v25 = vrot.slane %v1956_v54, %v4325_v8  ;;  %v2000_v37 = vrot.slane %v1960_v30, %v4325_v8  ;;  %v2004_v42 = vrot.slane %v1964_v35, %v4325_v8 }
 0x33c   : > { %v2008_v62 = vrot.slane %v1968_v33, %v4325_v8  ;;  %v2009_v4 = vmul.f32 %v1980_v6, %v1935_v31  ;;  %v2010_v5 = vmul.f32 %v1984_v16, %v1935_v31  ;;  %v2011_v21 = vmul.f32 %v1988_v24, %v1935_v31  ;;  %v2214_v16 = vpop.permute.xlu0 %2213 }
 0x33d   : > { %v2012_v63 = vmul.f32 %v1992_v20, %v1935_v31  ;;  %v2013_v19 = vmul.f32 %v1996_v25, %v1935_v31  ;;  %v2014_v15 = vmul.f32 %v2000_v37, %v1935_v31  ;;  %v2015_v53 = vmul.f32 %v2004_v42, %v1935_v31 }
 0x33e   : > { %v2016_v41 = vmul.f32 %v2008_v62, %v1935_v31  ;;  %v2017_v0 = vadd.f32 %v2009_v4, %v1925_v60  ;;  %v2018_v45 = vadd.f32 %v2010_v5, %v1926_v17  ;;  %v2019_v52 = vadd.f32 %v2011_v21, %v1927_v57 }
 0x33f   : > { %v2020_v46 = vadd.f32 %v2012_v63, %v1928_v51  ;;  %v2021_v50 = vadd.f32 %v2013_v19, %v1929_v38  ;;  %v2022_v54 = vadd.f32 %v2014_v15, %v1930_v43  ;;  %v2023_v11 = vadd.f32 %v2015_v53, %v1931_v1 }
 0x340   : > { %v2024_v30 = vadd.f32 %v2016_v41, %v1932_v10  ;;  %v2109_v35 = vadd.f32 %v4781_v27, %v2017_v0  ;;  %v2110_v33 = vadd.f32 %v4787_v23, %v2018_v45  ;;  %v2111_v6 = vadd.f32 %v4808_v26, %v2019_v52 }
 0x341   : > { %v2112_v24 = vadd.f32 %v4810_v39, %v2020_v46  ;;  %v2113_v20 = vadd.f32 %v4803_v7, %v2021_v50  ;;  %v2114_v60 = vadd.f32 %v4805_v22, %v2022_v54  ;;  %v2115_v17 = vadd.f32 %v4841_v49, %v2023_v11 }
 0x342   : > { %v2201_v57 = vadd.f32 %v4823_v40, %v2109_v35  ;;  %v2202_v53 = vadd.f32 %v4825_v18, %v2110_v33  ;;  %v2203_v51 = vadd.f32 %v4827_v36, %v2111_v6  ;;  %v2116_v0 = vadd.f32 %v4843_v29, %v2024_v30 }
 0x343   : > { %v2204_v27 = vadd.f32 %v4833_v55, %v2112_v24  ;;  %v2205_v52 = vadd.f32 %v4835_v48, %v2113_v20  ;;  %v2206_v23 = vadd.f32 %v4837_v56, %v2114_v60  ;;  %v2207_v50 = vadd.f32 %v4845_v14, %v2115_v17 }
 0x344   : > { %v4914_v7 = vadd.f32 %v2214_v16, %v2201_v57  ;;  %v4916_v22 = vadd.f32 %v2214_v16, %v2202_v53  ;;  %v4918_v11 = vadd.f32 %v2214_v16, %v2203_v51  ;;  %v2208_v26 = vadd.f32 %v4847_v47, %v2116_v0 }
 0x345   : > { %v4921_v39 = vadd.f32 %v2214_v16, %v2204_v27  ;;  %v4923_v40 = vadd.f32 %v2214_v16, %v2205_v52  ;;  %v4925_v18 = vadd.f32 %v2214_v16, %v2206_v23  ;;  %v4927_v36 = vadd.f32 %v2214_v16, %v2207_v50 }
 0x346   : > { %v2228_v55 = vsel %vm352_vm5, %v4914_v7, 0.0  ;;  %v2235_v48 = vsel %vm352_vm5, %v4916_v22, 0.0  ;;  %v2242_v56 = vsel %vm352_vm5, %v4918_v11, 0.0  ;;  %v4935_v49 = vadd.f32 %v2214_v16, %v2208_v26 }
 0x347   : > { %v2229_v29 = vrot.slane %v2228_v55, 4  ;;  %v2236_v14 = vrot.slane %v2235_v48, 4  ;;  %v2243_v47 = vrot.slane %v2242_v56, 4  ;;  %v2249_v38 = vsel %vm352_vm5, %v4921_v39, 0.0 }
 0x348   : > { %v2250_v43 = vrot.slane %v2249_v38, 4  ;;  %v2256_v1 = vsel %vm352_vm5, %v4923_v40, 0.0  ;;  %v2263_v10 = vsel %vm352_vm5, %v4925_v18, 0.0  ;;  %v2270_v31 = vsel %vm352_vm5, %v4927_v36, 0.0 }
 0x349   : > { %v2230_v25 = vadd.f32 %v2229_v29, %v2228_v55  ;;  %v2237_v37 = vadd.f32 %v2236_v14, %v2235_v48  ;;  %v2244_v42 = vadd.f32 %v2243_v47, %v2242_v56  ;;  %v2257_v62 = vrot.slane %v2256_v1, 4 }
 0x34a   : > { %v2251_v4 = vadd.f32 %v2250_v43, %v2249_v38  ;;  %v2264_v5 = vrot.slane %v2263_v10, 4  ;;  %v2271_v21 = vrot.slane %v2270_v31, 4  ;;  %v2277_v63 = vsel %vm352_vm5, %v4935_v49, 0.0 }
 0x34b   : > { %v2231_v19 = vrot.slane %v2230_v25, 2  ;;  %v2238_v15 = vrot.slane %v2237_v37, 2  ;;  %v2245_v41 = vrot.slane %v2244_v42, 2  ;;  %v2258_v45 = vadd.f32 %v2257_v62, %v2256_v1 }
 0x34c   : > { %v2252_v46 = vrot.slane %v2251_v4, 2  ;;  %v2265_v54 = vadd.f32 %v2264_v5, %v2263_v10  ;;  %v2272_v30 = vadd.f32 %v2271_v21, %v2270_v31  ;;  %v2278_v35 = vrot.slane %v2277_v63, 4 }
 0x34d   : > { %v2232_v33 = vadd.f32 %v2231_v19, %v2230_v25  ;;  %v2239_v6 = vadd.f32 %v2238_v15, %v2237_v37  ;;  %v2246_v16 = vadd.f32 %v2245_v41, %v2244_v42  ;;  %v2259_v24 = vrot.slane %v2258_v45, 2 }
 0x34e   : > { %v2253_v20 = vadd.f32 %v2252_v46, %v2251_v4  ;;  %v2266_v60 = vrot.slane %v2265_v54, 2  ;;  %v2273_v17 = vrot.slane %v2272_v30, 2  ;;  %v2279_v57 = vadd.f32 %v2278_v35, %v2277_v63 }
 0x34f   : > { %v2233_v53 = vrot.slane %v2232_v33, 1  ;;  %v2240_v51 = vrot.slane %v2239_v6, 1  ;;  %v2247_v0 = vrot.slane %v2246_v16, 1  ;;  %v2260_v27 = vadd.f32 %v2259_v24, %v2258_v45 }
 0x350   : > { %v2254_v52 = vrot.slane %v2253_v20, 1  ;;  %v2267_v23 = vadd.f32 %v2266_v60, %v2265_v54  ;;  %v2274_v50 = vadd.f32 %v2273_v17, %v2272_v30  ;;  %v2280_v26 = vrot.slane %v2279_v57, 2 }
 0x351   : > { %v2234_v55 = vadd.f32 %v2233_v53, %v2232_v33  ;;  %v2241_v48 = vadd.f32 %v2240_v51, %v2239_v6  ;;  %v2248_v56 = vadd.f32 %v2247_v0, %v2246_v16  ;;  %v2261_v29 = vrot.slane %v2260_v27, 1 }
 0x352   : > { %v2255_v14 = vadd.f32 %v2254_v52, %v2253_v20  ;;  %v2268_v47 = vrot.slane %v2267_v23, 1  ;;  %v2275_v38 = vrot.slane %v2274_v50, 1  ;;  %v2281_v43 = vadd.f32 %v2280_v26, %v2279_v57 }
 0x353   : > { %v2284_v1 = vmul.f32 0.25, %v2234_v55  ;;  %v2285_v10 = vmul.f32 0.25, %v2241_v48  ;;  %v2286_v31 = vmul.f32 0.25, %v2248_v56  ;;  %v2262_v25 = vadd.f32 %v2261_v29, %v2260_v27 }
 0x354   : > { %v2287_v37 = vmul.f32 0.25, %v2255_v14  ;;  %v2269_v42 = vadd.f32 %v2268_v47, %v2267_v23  ;;  %v2276_v62 = vadd.f32 %v2275_v38, %v2274_v50  ;;  %v2282_v4 = vrot.slane %v2281_v43, 1 }
 0x355   : > { %v4948_v5 = vsub.f32 %v4914_v7, %v2284_v1  ;;  %v4951_v21 = vsub.f32 %v4916_v22, %v2285_v10  ;;  %v4954_v63 = vsub.f32 %v4918_v11, %v2286_v31  ;;  %v2288_v19 = vmul.f32 0.25, %v2262_v25 }
 0x356   : > { %v4957_v15 = vsub.f32 %v4921_v39, %v2287_v37  ;;  %v2289_v41 = vmul.f32 0.25, %v2269_v42  ;;  %v2283_v45 = vadd.f32 %v2282_v4, %v2281_v43  ;;  %v2290_v46 = vmul.f32 0.25, %v2276_v62 }
 0x357   : > { %v2300_v54 = vmul.f32 %v4948_v5, %v4948_v5  ;;  %v2301_v7 = vmul.f32 %v4951_v21, %v4951_v21  ;;  %v2302_v22 = vmul.f32 %v4954_v63, %v4954_v63  ;;  %v4966_v30 = vsub.f32 %v4923_v40, %v2288_v19 }
 0x358   : > { %v2303_v11 = vmul.f32 %v4957_v15, %v4957_v15  ;;  %v4971_v39 = vsub.f32 %v4925_v18, %v2289_v41  ;;  %v2291_v35 = vmul.f32 0.25, %v2283_v45  ;;  %v4974_v33 = vsub.f32 %v4927_v36, %v2290_v46 }
 0x359   : > { %v2308_v6 = vsel %vm352_vm5, %v2300_v54, 0.0  ;;  %v2315_v16 = vsel %vm352_vm5, %v2301_v7, 0.0  ;;  %v2322_v24 = vsel %vm352_vm5, %v2302_v22, 0.0  ;;  %v2304_v40 = vmul.f32 %v4966_v30, %v4966_v30 }
 0x35a   : > { %v2309_v20 = vrot.slane %v2308_v6, 4  ;;  %v2316_v60 = vrot.slane %v2315_v16, 4  ;;  %v2323_v17 = vrot.slane %v2322_v24, 4  ;;  %v2329_v57 = vsel %vm352_vm5, %v2303_v11, 0.0 }
 0x35b   : > { %v2330_v18 = vrot.slane %v2329_v57, 4  ;;  %v2305_v53 = vmul.f32 %v4971_v39, %v4971_v39  ;;  %v2336_v36 = vsel %vm352_vm5, %v2304_v40, 0.0  ;;  %v4986_v51 = vsub.f32 %v4935_v49, %v2291_v35 }
 0x35c   : > { %v2310_v0 = vadd.f32 %v2309_v20, %v2308_v6  ;;  %v2317_v27 = vadd.f32 %v2316_v60, %v2315_v16  ;;  %v2324_v52 = vadd.f32 %v2323_v17, %v2322_v24  ;;  %v2337_v23 = vrot.slane %v2336_v36, 4 }
 0x35d   : > { %v2331_v50 = vadd.f32 %v2330_v18, %v2329_v57  ;;  %v2343_v26 = vsel %vm352_vm5, %v2305_v53, 0.0  ;;  %v2306_v55 = vmul.f32 %v4974_v33, %v4974_v33  ;;  %v2307_v48 = vmul.f32 %v4986_v51, %v4986_v51 }
 0x35e   : > { %v2311_v56 = vrot.slane %v2310_v0, 2  ;;  %v2318_v29 = vrot.slane %v2317_v27, 2  ;;  %v2325_v14 = vrot.slane %v2324_v52, 2  ;;  %v2338_v47 = vadd.f32 %v2337_v23, %v2336_v36 }
 0x35f   : > { %v2332_v38 = vrot.slane %v2331_v50, 2  ;;  %v2344_v49 = vrot.slane %v2343_v26, 4  ;;  %v2350_v43 = vsel %vm352_vm5, %v2306_v55, 0.0  ;;  %v2357_v1 = vsel %vm352_vm5, %v2307_v48, 0.0 }
 0x360   : > { %v2312_v10 = vadd.f32 %v2311_v56, %v2310_v0  ;;  %v2319_v31 = vadd.f32 %v2318_v29, %v2317_v27  ;;  %v2326_v25 = vadd.f32 %v2325_v14, %v2324_v52  ;;  %v2339_v37 = vrot.slane %v2338_v47, 2 }
 0x361   : > { %v2333_v42 = vadd.f32 %v2332_v38, %v2331_v50  ;;  %v2345_v62 = vadd.f32 %v2344_v49, %v2343_v26  ;;  %v2351_v4 = vrot.slane %v2350_v43, 4  ;;  %v2358_v19 = vrot.slane %v2357_v1, 4 }
 0x362   : > { %v2313_v41 = vrot.slane %v2312_v10, 1  ;;  %v2320_v45 = vrot.slane %v2319_v31, 1  ;;  %v2327_v46 = vrot.slane %v2326_v25, 1  ;;  %v2340_v54 = vadd.f32 %v2339_v37, %v2338_v47 }
 0x363   : > { %v2334_v7 = vrot.slane %v2333_v42, 1  ;;  %v2346_v22 = vrot.slane %v2345_v62, 2  ;;  %v2352_v11 = vadd.f32 %v2351_v4, %v2350_v43  ;;  %v2359_v35 = vadd.f32 %v2358_v19, %v2357_v1  ;;  %v2399_v4 = vpop.permute.xlu1 %2398 }
 0x364   : > { %v2314_v6 = vadd.f32 %v2313_v41, %v2312_v10  ;;  %v2321_v16 = vadd.f32 %v2320_v45, %v2319_v31  ;;  %v2328_v24 = vadd.f32 %v2327_v46, %v2326_v25  ;;  %v2341_v40 = vrot.slane %v2340_v54, 1 }
 0x365   : > { %v2335_v20 = vadd.f32 %v2334_v7, %v2333_v42  ;;  %v2347_v60 = vadd.f32 %v2346_v22, %v2345_v62  ;;  %v2353_v17 = vrot.slane %v2352_v11, 2  ;;  %v2360_v57 = vrot.slane %v2359_v35, 2 }
 0x366   : > { %v2364_v18 = vmul.f32 0.25, %v2314_v6  ;;  %v2365_v53 = vmul.f32 0.25, %v2321_v16  ;;  %v2366_v36 = vmul.f32 0.25, %v2328_v24  ;;  %v2342_v0 = vadd.f32 %v2341_v40, %v2340_v54 }
 0x367   : > { %v2367_v27 = vmul.f32 0.25, %v2335_v20  ;;  %v2348_v52 = vrot.slane %v2347_v60, 1  ;;  %v2354_v23 = vadd.f32 %v2353_v17, %v2352_v11  ;;  %v2361_v50 = vadd.f32 %v2360_v57, %v2359_v35  ;;  %v2412_v6 = vpop.permute.xlu1 %2411 }
 0x368   : > { %v2372_v26 = vadd.f32 1e-05, %v2364_v18  ;;  %v2373_v55 = vadd.f32 1e-05, %v2365_v53  ;;  %v2374_v48 = vadd.f32 1e-05, %v2366_v36 }
 0x369   : > { %v2375_v56 = vadd.f32 1e-05, %v2367_v27  ;;  %v2349_v29 = vadd.f32 %v2348_v52, %v2347_v60  ;;  %v2368_v14 = vmul.f32 0.25, %v2342_v0  ;;  %v2355_v47 = vrot.slane %v2354_v23, 1 }
 0x36a   : > { %3854 = vrsqrt.f32 %v2372_v26  ;;  %v2362_v38 = vrot.slane %v2361_v50, 1 }
 0x36b   : > { %3856 = vrsqrt.f32 %v2373_v55  ;;  %v2369_v49 = vmul.f32 0.25, %v2349_v29  ;;  %v2376_v43 = vadd.f32 1e-05, %v2368_v14  ;;  %v2356_v1 = vadd.f32 %v2355_v47, %v2354_v23 }
 0x36c   : > { %3858 = vrsqrt.f32 %v2374_v48  ;;  %v2363_v10 = vadd.f32 %v2362_v38, %v2361_v50 }
 0x36d   : > { %3860 = vrsqrt.f32 %v2375_v56  ;;  %v2377_v31 = vadd.f32 1e-05, %v2369_v49  ;;  %v2370_v25 = vmul.f32 0.25, %v2356_v1 }
 0x36e   : > { %3862 = vrsqrt.f32 %v2376_v43  ;;  %v2371_v37 = vmul.f32 0.25, %v2363_v10 }
 0x36f   : > { %3864 = vrsqrt.f32 %v2377_v31  ;;  %v2378_v42 = vadd.f32 1e-05, %v2370_v25 }
 0x370   : > { %v2379_v62 = vadd.f32 1e-05, %v2371_v37 }
 0x371   : > { %3866 = vrsqrt.f32 %v2378_v42  ;;  %v323_v42 = vld [vmem:[%s4136_s19] sm:$0xf]  ;;  %s3910_s19 = sshll.u32 %s4032_s28, 4  ;;  %s3911_s19 = int_to_ptr.vmem [resolvable:$false] %s3910_s19 }
 0x372   : > { %3868 = vrsqrt.f32 %v2379_v62  ;;  %v3699_v62 = vld [vmem:[%s5536_s4 + $0x30] sm:$0xf]  ;;  %p3913_p1 = scmp.lt.s32.totalorder %s5193_s11, %s3911_s19 }
 0x374   : > { %v3855_v19 = vpop.eup %3854 }
 0x375   : > { %v3857_v41 = vpop.eup %3856  ;;  %v2388_v45 = vmul.f32 %v3855_v19, %v4948_v5 }
 0x376   : > { %v3859_v46 = vpop.eup %3858  ;;  %v2389_v54 = vmul.f32 %v3857_v41, %v4951_v21 }
 0x377   : > { %v3861_v7 = vpop.eup %3860  ;;  %v2401_v22 = vmul.f32 %v2399_v4, %v2388_v45  ;;  %v2390_v11 = vmul.f32 %v3859_v46, %v4954_v63 }
 0x378   : > { %v3863_v35 = vpop.eup %3862  ;;  %v2402_v16 = vmul.f32 %v2399_v4, %v2389_v54  ;;  %v2391_v24 = vmul.f32 %v3861_v7, %v4957_v15 }
 0x379   : > { %v3865_v40 = vpop.eup %3864  ;;  %v2414_v20 = vadd.f32 %v2412_v6, %v2401_v22  ;;  %v2403_v60 = vmul.f32 %v2399_v4, %v2390_v11  ;;  %v2392_v17 = vmul.f32 %v3863_v35, %v4966_v30 }
 0x37a   : > { %v2415_v57 = vadd.f32 %v2412_v6, %v2402_v16  ;;  %v2404_v18 = vmul.f32 %v2399_v4, %v2391_v24  ;;  %v2393_v5 = vmul.f32 %v3865_v40, %v4971_v39 }
 0x37b   : > { %v3867_v53 = vpop.eup %3866  ;;  %v2422_v21 = vmax.f32 %v2414_v20, 0.0  ;;  %v2416_v36 = vadd.f32 %v2412_v6, %v2403_v60  ;;  %v2405_v0 = vmul.f32 %v2399_v4, %v2392_v17 }
 0x37c   : > { %v3869_v27 = vpop.eup %3868  ;;  %v2423_v63 = vmax.f32 %v2415_v57, 0.0  ;;  %v2417_v52 = vadd.f32 %v2412_v6, %v2404_v18  ;;  %v2406_v23 = vmul.f32 %v2399_v4, %v2393_v5  ;;  %v2394_v50 = vmul.f32 %v3867_v53, %v4974_v33 }
 0x37d   : > { %v2424_v15 = vmax.f32 %v2416_v36, 0.0  ;;  %v2418_v26 = vadd.f32 %v2412_v6, %v2405_v0  ;;  %v2395_v55 = vmul.f32 %v3869_v27, %v4986_v51 }
 0x37e   : > { %v2438_v48 = vcombine.low %v2422_v21, %v2423_v63  ;;  %v2425_v30 = vmax.f32 %v2417_v52, 0.0  ;;  %v2419_v56 = vadd.f32 %v2412_v6, %v2406_v23  ;;  %v2407_v29 = vmul.f32 %v2399_v4, %v2394_v50 }
 0x37f   : > { %v2426_v14 = vmax.f32 %v2418_v26, 0.0  ;;  %v2408_v39 = vmul.f32 %v2399_v4, %v2395_v55 }
 0x380   : > { %v5004_v47 = vadd.f32 %v2438_v48, %v4582_v28  ;;  %v2439_v38 = vcombine.low %v2424_v15, %v2425_v30  ;;  %v2427_v49 = vmax.f32 %v2419_v56, 0.0  ;;  %v2420_v43 = vadd.f32 %v2412_v6, %v2407_v29  ;;  %v3700_v48 = vld [vmem:[%s5536_s4 + $0x34] sm:$0xf]  ;;  %v3701_v30 = vld [vmem:[%s5536_s4 + $0x38] sm:$0xf] }
 0x381   : > { %v2421_v1 = vadd.f32 %v2412_v6, %v2408_v39  ;;  %v3702_v56 = vld [vmem:[%s5535_s3 + $0x8] sm:$0xf]  ;;  %v5549_v29 = vmov 1   ;;  %v3703_v39 = vld [vmem:[%s5536_s4 + $0x3c] sm:$0xf] }
 0x382   : > { %2454 = vrot.lane.b32.xlu0 %v5004_v47, %s4028_s30  ;;  %v5008_v33 = vadd.f32 %v2439_v38, %v4578_v59  ;;  %v2440_v51 = vcombine.low %v2426_v14, %v2427_v49  ;;  %v2428_v10 = vmax.f32 %v2420_v43, 0.0  ;;  %v3697_v59 = vld [vmem:[%s5534_s2 + $0x1c] sm:$0xf]  ;;  %v5550_v14 = vmov 2   ;;  %v3704_v43 = vld [vmem:[%s5536_s4 + $0x40] sm:$0xf] }
 0x383   : > { %v2429_v31 = vmax.f32 %v2421_v1, 0.0  ;;  %v5551_v38 = vmov 0   ;;  %v5552_v49 = vmov 3   ;;  %v3705_v1 = vld [vmem:[%s5536_s4 + $0x44] sm:$0xf] }
 0x384   : > { %2456 = vrot.lane.b32.xlu1 %v5008_v33, %s4028_s30  ;;  %v5012_v25 = vadd.f32 %v2440_v51, %v4590_v58  ;;  %v3698_v58 = vld [vmem:[%s5534_s2 + $0x20] sm:$0xf] }
 0x385   : > { %v2441_v28 = vcombine.low %v2428_v10, %v2429_v31 }
 0x386   : > { %2458 = vrot.lane.b32.xlu0 %v5012_v25, %s4028_s30 }
 0x387   : > { %v5016_v37 = vadd.f32 %v2441_v28, %v4586_v34  ;;  %v3696_v34 = vld [vmem:[%s5534_s2 + $0x18] sm:$0xf] }
 0x389   : > { %2460 = vrot.lane.b32.xlu1 %v5016_v37, %s4028_s30  ;;  %s4030_s30 = smov 120  }
 0x38a   : > { %325 = vrot.lane.b32.xlu0 %v323_v42, %s4029_s27 }
 0x38d   : > { %2518 = vperm.xlu1 %3800, %v3697_v59  }
 0x38e   : > { %2573 = vperm.xlu0 %3799, %v3698_v58  }
 0x391   : > { %2496 = vperm.xlu1 %3800, %v3696_v34  }
 0x392   : > { %2636 = vperm.xlu0 %3799, %v3699_v62  }
 0x3f4   : > { %v2455_v4 = vpop.permute.xlu0 %2454 }
 0x3f5   : > { %v2462_v41 = vrot.slane %v2455_v4, 4 }
 0x3f6   : > { %v2457_v19 = vpop.permute.xlu1 %2456 }
 0x3f7   : > { %v2463_v45 = vrot.slane %v2457_v19, 4  ;;  %v2467_v40 = vsel %vm2466_vm14, %v2462_v41, %v2455_v4 }
 0x3f8   : > { %v2459_v46 = vpop.permute.xlu0 %2458 }
 0x3f9   : > { %v2468_v54 = vsel %vm352_vm5, %v2462_v41, %v2463_v45  ;;  %v2464_v7 = vrot.slane %v2459_v46, 4 }
 0x3fa   : > { %v5034_v22 = vsel %vm2466_vm14, %v2468_v54, %v2457_v19 }
 0x3fb   : > { %v2470_v11 = vsel %vm352_vm5, %v2463_v45, %v2464_v7  ;;  %v2461_v35 = vpop.permute.xlu1 %2460 }
 0x3fc   : > { %v5039_v6 = vsel %vm2466_vm14, %v2470_v11, %v2459_v46  ;;  %v2465_v16 = vrot.slane %v2461_v35, 4  ;;  %v326_v24 = vpop.permute.xlu0 %325 }
 0x3fd   : > { %329 = vst.msk [vmem:[#allocation4] sm:$0xf] %vm328_vm15, %v326_v24 }
 0x3fe   : > { %v2472_v20 = vsel %vm352_vm5, %v2464_v7, %v2465_v16  ;;  %2486 = vst.msk [vmem:[#allocation4 + $0x20] sm:$0xf] %vm328_vm15, %v2465_v16 }
 0x3ff   : > { %2481 = vst.msk [vmem:[#allocation4] sm:$0xff] %vm2480_vm0, %v2467_v40  ;;  %v5044_v60 = vsel %vm2466_vm14, %v2472_v20, %v2461_v35 }
 0x405   : > { %v2487_v57 = vld [vmem:[#allocation4 + $0x20] sm:$0xf] }
 0x406   : > { %v5046_v17 = vld [vmem:[#allocation4] sm:$0xff] }
 0x407   : > { %2625 = vst.msk [vmem:[#allocation4] sm:$0xf] %vm328_vm15, %v2487_v57 }
 0x40c   : > { %v2519_v18 = vpop.permute.xlu1 %2518 }
 0x40d   : > { %v2526_v5 = vrot.slane %v2519_v18, %v4189_v32  ;;  %v2574_v53 = vpop.permute.xlu0 %2573 }
 0x40e   : > { %v2581_v21 = vrot.slane %v2574_v53, %v4189_v32 }
 0x40f   : > { %v2532_v36 = vmul.f32 %v2526_v5, %v2487_v57  ;;  %v2528_v27 = vmul.f32 %v2526_v5, %v5046_v17  ;;  %v2529_v63 = vmul.f32 %v2526_v5, %v5034_v22  ;;  %v2530_v52 = vmul.f32 %v2526_v5, %v5039_v6 }
 0x410   : > { %v2583_v0 = vmul.f32 %v2581_v21, %v5046_v17  ;;  %v2531_v23 = vmul.f32 %v2526_v5, %v5044_v60  ;;  %v2584_v50 = vmul.f32 %v2581_v21, %v5034_v22  ;;  %v2585_v15 = vmul.f32 %v2581_v21, %v5039_v6  ;;  %v2497_v51 = vpop.permute.xlu1 %2496 }
 0x411   : > { %2546 = vrot.lane.b32.xlu1 %v2532_v36, %s4027_s13  ;;  %v2586_v26 = vmul.f32 %v2581_v21, %v5044_v60  ;;  %v2587_v55 = vmul.f32 %v2581_v21, %v2487_v57  ;;  %v2637_v10 = vpop.permute.xlu0 %2636  ;;  %v2504_v34 = vrot.slane %v2497_v51, %v4189_v32 }
 0x412   : > { %2593 = vrot.lane.b32.xlu0 %v2583_v0, %s4030_s30 }
 0x413   : > { %v2506_v54 = vmul.f32 %v2504_v34, %v5046_v17  ;;  %v2507_v18 = vmul.f32 %v2504_v34, %v5034_v22  ;;  %v2508_v21 = vmul.f32 %v2504_v34, %v5039_v6  ;;  %v2644_v17 = vrot.slane %v2637_v10, %v4189_v32 }
 0x415   : > { %2538 = vrot.lane.b32.xlu1 %v2528_v27, %s4027_s13 }
 0x416   : > { %2540 = vrot.lane.b32.xlu0 %v2529_v63, %s4027_s13 }
 0x419   : > { %2542 = vrot.lane.b32.xlu1 %v2530_v52, %s4027_s13 }
 0x41a   : > { %2544 = vrot.lane.b32.xlu0 %v2531_v23, %s4027_s13 }
 0x41d   : > { %2595 = vrot.lane.b32.xlu1 %v2584_v50, %s4030_s30 }
 0x41e   : > { %2597 = vrot.lane.b32.xlu0 %v2585_v15, %s4030_s30 }
 0x421   : > { %2599 = vrot.lane.b32.xlu1 %v2586_v26, %s4030_s30 }
 0x422   : > { %2601 = vrot.lane.b32.xlu0 %v2587_v55, %s4030_s30  ;;  %s3912_s30 = scalar_lea.vmem %s3911_s19, 128 }
 0x423   : > { %p3914_p2 = scmp.lt.s32.totalorder %s3912_s30, %s3906_s17 }
 0x425   : > { %2868 = vperm.xlu1 %3800, %v3700_v48   ;;  %v2509_v48 = vmul.f32 %v2504_v34, %v5044_v60  ;;  %p3915_p3 = por %p3914_p2, %p3913_p1 }
 0x426   : > { %2884 = vperm.xlu0 %3799, %v3701_v30  }
 0x427   : > { %p3916_p5 = pnand %p3915_p3, %p3909_p0 }
 0x429   : > { %2906 = vperm.xlu1 %3800, %v3702_v56  }
 0x42a   : > { %3801 = vset.pattern.permute.xlu0 %v5549_v29 }
 0x42b   : > { %2994 = vperm.xlu0 %3801, %v3702_v56  }
 0x42d   : > { %3802 = vset.pattern.permute.xlu1 %v5550_v14 }
 0x42e   : > { %3086 = vperm.xlu1 %3802, %v3702_v56  }
 0x42f   : > { %3804 = vset.pattern.permute.xlu0 %v5551_v38 }
 0x430   : > { %3273 = vperm.xlu0 %3804, %v3703_v39  }
 0x432   : > { %3803 = vset.pattern.permute.xlu1 %v5552_v49 }
 0x433   : > { %3178 = vperm.xlu1 %3803, %v3702_v56  }
 0x434   : > { %1567 = vrot.lane.b32.xlu0 %v4623_v13, %s4019_s20  ;;  %s3710_s20 = sshll.u32 %s4008_s24, 6 }
 0x435   : > { %s5191_s12 = scalar_lea.hbm %s5538_s6, %s3710_s20 }
 0x437   : > { %3805 = vset.pattern.permute.xlu1 %v5551_v38 }
 0x438   : > { %3458 = vperm.xlu1 %3805, %v3704_v43  }
 0x43c   : > { %3471 = vperm.xlu1 %3805, %v3705_v1  }
 0x440   : > { %2627 = vrot.lane.b32.xlu1 %v2487_v57, %s4031_s8 }
 0x483   : > { %v2547_v31 = vpop.permute.xlu1 %2546 }
 0x484   : > { %v2594_v28 = vpop.permute.xlu0 %2593  ;;  %v2552_v7 = vrot.slane %v2547_v31, 4 }
 0x485   : > { %v2603_v16 = vrot.slane %v2594_v28, 4 }
 0x487   : > { %v2539_v42 = vpop.permute.xlu1 %2538 }
 0x488   : > { %v2548_v13 = vrot.slane %v2539_v42, 4  ;;  %v2541_v59 = vpop.permute.xlu0 %2540 }
 0x489   : > { %v2549_v58 = vrot.slane %v2541_v59, 4 }
 0x48b   : > { %v2543_v62 = vpop.permute.xlu1 %2542  ;;  %v2553_v4 = vsel %vm352_vm5, %v2548_v13, %v2549_v58 }
 0x48c   : > { %v2550_v19 = vrot.slane %v2543_v62, 4  ;;  %v2545_v41 = vpop.permute.xlu0 %2544  ;;  %v2554_v11 = vsel %vm1549_vm12, %v2539_v42, %v2553_v4 }
 0x48d   : > { %v2551_v45 = vrot.slane %v2545_v41, 4  ;;  %v2565_v36 = vadd.f32 %v2554_v11, %v2506_v54 }
 0x48e   : > { %v2555_v46 = vsel %vm352_vm5, %v2549_v58, %v2550_v19 }
 0x48f   : > { %v2596_v35 = vpop.permute.xlu1 %2595  ;;  %v2556_v24 = vsel %vm1549_vm12, %v2541_v59, %v2555_v46  ;;  %v2557_v40 = vsel %vm352_vm5, %v2550_v19, %v2551_v45  ;;  %v2559_v5 = vsel %vm352_vm5, %v2551_v45, %v2552_v7 }
 0x490   : > { %v2604_v20 = vrot.slane %v2596_v35, 4  ;;  %v2598_v57 = vpop.permute.xlu0 %2597  ;;  %v2566_v27 = vadd.f32 %v2556_v24, %v2507_v18  ;;  %v2558_v63 = vsel %vm1549_vm12, %v2543_v62, %v2557_v40  ;;  %v2560_v22 = vsel %vm1549_vm12, %v2545_v41, %v2559_v5 }
 0x491   : > { %v2605_v53 = vrot.slane %v2598_v57, 4  ;;  %v2567_v29 = vadd.f32 %v2558_v63, %v2508_v21  ;;  %v2568_v38 = vadd.f32 %v2560_v22, %v2509_v48 }
 0x492   : > { %v2608_v0 = vsel %vm352_vm5, %v2603_v16, %v2604_v20 }
 0x493   : > { %v2610_v52 = vsel %vm2609_vm1, %v2594_v28, %v2608_v0  ;;  %v2611_v23 = vsel %vm352_vm5, %v2604_v20, %v2605_v53  ;;  %v2600_v50 = vpop.permute.xlu1 %2599 }
 0x494   : > { %v2621_v15 = vadd.f32 %v2610_v52, %v2565_v36  ;;  %v2612_v26 = vsel %vm2609_vm1, %v2596_v35, %v2611_v23  ;;  %v2606_v55 = vrot.slane %v2600_v50, 4  ;;  %v2602_v6 = vpop.permute.xlu0 %2601 }
 0x495   : > { %v2622_v30 = vadd.f32 %v2612_v26, %v2566_v27  ;;  %v2607_v56 = vrot.slane %v2602_v6, 4 }
 0x496   : > { %v5106_v14 = vadd.f32 %v2644_v17, %v2621_v15  ;;  %v2613_v39 = vsel %vm352_vm5, %v2605_v53, %v2606_v55 }
 0x497   : > { %v5109_v49 = vadd.f32 %v2644_v17, %v2622_v30  ;;  %v2614_v43 = vsel %vm2609_vm1, %v2598_v57, %v2613_v39  ;;  %v2615_v1 = vsel %vm352_vm5, %v2606_v55, %v2607_v56 }
 0x498   : > { %v2658_v51 = vcombine.high %v5106_v14, %v5106_v14  ;;  %v2666_v60 = vsel %vm352_vm5, %v5106_v14, 0.0  ;;  %v2623_v10 = vadd.f32 %v2614_v43, %v2567_v29  ;;  %v2616_v31 = vsel %vm2609_vm1, %v2600_v50, %v2615_v1 }
 0x499   : > { %v2667_v28 = vrot.slane %v2666_v60, 4  ;;  %v2659_v42 = vcombine.high %v5109_v49, %v5109_v49  ;;  %v2680_v13 = vsel %vm352_vm5, %v5109_v49, 0.0  ;;  %v2624_v59 = vadd.f32 %v2616_v31, %v2568_v38 }
 0x49a   : > { %v2673_v58 = vsel %vm352_vm5, %v2658_v51, 0.0  ;;  %v2681_v34 = vrot.slane %v2680_v13, 4  ;;  %v5123_v62 = vadd.f32 %v2644_v17, %v2623_v10 }
 0x49b   : > { %v2668_v4 = vadd.f32 %v2667_v28, %v2666_v60  ;;  %v2674_v19 = vrot.slane %v2673_v58, 4  ;;  %v2687_v41 = vsel %vm352_vm5, %v2659_v42, 0.0  ;;  %v5126_v45 = vadd.f32 %v2644_v17, %v2624_v59 }
 0x49c   : > { %v2682_v46 = vadd.f32 %v2681_v34, %v2680_v13  ;;  %v2688_v54 = vrot.slane %v2687_v41, 4  ;;  %v2660_v7 = vcombine.high %v5123_v62, %v5123_v62  ;;  %v2694_v11 = vsel %vm352_vm5, %v5123_v62, 0.0 }
 0x49d   : > { %v2669_v35 = vrot.slane %v2668_v4, 2  ;;  %v2675_v16 = vadd.f32 %v2674_v19, %v2673_v58  ;;  %v2695_v24 = vrot.slane %v2694_v11, 4  ;;  %v2661_v40 = vcombine.high %v5126_v45, %v5126_v45 }
 0x49e   : > { %v2683_v20 = vrot.slane %v2682_v46, 2  ;;  %v2689_v57 = vadd.f32 %v2688_v54, %v2687_v41  ;;  %v2701_v18 = vsel %vm352_vm5, %v2660_v7, 0.0  ;;  %v2708_v5 = vsel %vm352_vm5, %v5126_v45, 0.0 }
 0x49f   : > { %v2696_v53 = vadd.f32 %v2695_v24, %v2694_v11  ;;  %v2702_v21 = vrot.slane %v2701_v18, 4  ;;  %v2709_v17 = vrot.slane %v2708_v5, 4  ;;  %v2715_v36 = vsel %vm352_vm5, %v2661_v40, 0.0 }
 0x4a0   : > { %v2716_v0 = vrot.slane %v2715_v36, 4  ;;  %v2670_v27 = vadd.f32 %v2669_v35, %v2668_v4  ;;  %v2676_v63 = vrot.slane %v2675_v16, 2  ;;  %v2684_v52 = vadd.f32 %v2683_v20, %v2682_v46 }
 0x4a1   : > { %v2697_v23 = vrot.slane %v2696_v53, 2  ;;  %v2703_v50 = vadd.f32 %v2702_v21, %v2701_v18  ;;  %v2710_v22 = vadd.f32 %v2709_v17, %v2708_v5  ;;  %v2690_v15 = vrot.slane %v2689_v57, 2 }
 0x4a2   : > { %v2717_v26 = vadd.f32 %v2716_v0, %v2715_v36  ;;  %v2671_v55 = vrot.slane %v2670_v27, 1  ;;  %v2677_v6 = vadd.f32 %v2676_v63, %v2675_v16  ;;  %v2685_v48 = vrot.slane %v2684_v52, 1 }
 0x4a3   : > { %v2711_v30 = vrot.slane %v2710_v22, 2  ;;  %v2691_v56 = vadd.f32 %v2690_v15, %v2689_v57  ;;  %v2698_v29 = vadd.f32 %v2697_v23, %v2696_v53  ;;  %v2704_v39 = vrot.slane %v2703_v50, 2 }
 0x4a4   : > { %v2718_v38 = vrot.slane %v2717_v26, 2  ;;  %v5138_v43 = vpop.permute.xlu1 %2868  ;;  %v2672_v1 = vadd.f32 %v2671_v55, %v2670_v27  ;;  %v2678_v51 = vrot.slane %v2677_v6, 1  ;;  %v2686_v60 = vadd.f32 %v2685_v48, %v2684_v52 }
 0x4a5   : > { %v2712_v10 = vadd.f32 %v2711_v30, %v2710_v22  ;;  %v2692_v31 = vrot.slane %v2691_v56, 1  ;;  %v2699_v28 = vrot.slane %v2698_v29, 1  ;;  %v2705_v42 = vadd.f32 %v2704_v39, %v2703_v50  ;;  %v5140_v58 = vpop.permute.xlu0 %2884 }
 0x4a6   : > { %v2679_v13 = vadd.f32 %v2678_v51, %v2677_v6  ;;  %v2719_v59 = vadd.f32 %v2718_v38, %v2717_v26  ;;  %v2722_v54 = vmul.f32 0.25, %v2672_v1  ;;  %v2724_v16 = vmul.f32 0.25, %v2686_v60 }
 0x4a7   : > { %v2693_v34 = vadd.f32 %v2692_v31, %v2691_v56  ;;  %v2700_v4 = vadd.f32 %v2699_v28, %v2698_v29  ;;  %v2706_v19 = vrot.slane %v2705_v42, 1  ;;  %v2713_v41 = vrot.slane %v2712_v10, 1 }
 0x4a8   : > { %v2720_v46 = vrot.slane %v2719_v59, 1  ;;  %v2723_v7 = vmul.f32 0.25, %v2679_v13  ;;  %v5142_v40 = vpop.permute.xlu1 %2906 }
 0x4a9   : > { %v2707_v11 = vadd.f32 %v2706_v19, %v2705_v42  ;;  %v2714_v35 = vadd.f32 %v2713_v41, %v2712_v10  ;;  %v2725_v24 = vmul.f32 0.25, %v2693_v34  ;;  %v2726_v5 = vmul.f32 0.25, %v2700_v4 }
 0x4aa   : > { %v2721_v20 = vadd.f32 %v2720_v46, %v2719_v59  ;;  %v2738_v57 = vcombine.low %v2722_v54, %v2723_v7  ;;  %v5144_v18 = vpop.permute.xlu0 %2994 }
 0x4ab   : > { %v2727_v53 = vmul.f32 0.25, %v2707_v11  ;;  %v2739_v21 = vcombine.low %v2724_v16, %v2725_v24  ;;  %v2728_v17 = vmul.f32 0.25, %v2714_v35 }
 0x4ac   : > { %v2729_v36 = vmul.f32 0.25, %v2721_v20  ;;  %v5147_v0 = vsub.f32 %v5106_v14, %v2738_v57 }
 0x4ad   : > { %v2740_v27 = vcombine.low %v2726_v5, %v2727_v53  ;;  %v5150_v63 = vsub.f32 %v5109_v49, %v2739_v21  ;;  %v5152_v52 = vpop.permute.xlu1 %3086 }
 0x4ae   : > { %v2741_v23 = vcombine.low %v2728_v17, %v2729_v36  ;;  %v2750_v50 = vmul.f32 %v5147_v0, %v5147_v0 }
 0x4af   : > { %v5157_v22 = vsub.f32 %v5123_v62, %v2740_v27  ;;  %v2751_v15 = vmul.f32 %v5150_v63, %v5150_v63  ;;  %v5161_v26 = vpop.permute.xlu0 %3273 }
 0x4b0   : > { %v5164_v14 = vsub.f32 %v5126_v45, %v2741_v23  ;;  %v2758_v55 = vcombine.high %v2750_v50, %v2750_v50  ;;  %v2766_v49 = vsel %vm352_vm5, %v2750_v50, 0.0 }
 0x4b1   : > { %v2752_v6 = vmul.f32 %v5157_v22, %v5157_v22  ;;  %v2759_v48 = vcombine.high %v2751_v15, %v2751_v15  ;;  %v2767_v30 = vrot.slane %v2766_v49, 4  ;;  %v2780_v62 = vsel %vm352_vm5, %v2751_v15, 0.0 }
 0x4b2   : > { %v2753_v56 = vmul.f32 %v5164_v14, %v5164_v14  ;;  %v2773_v29 = vsel %vm352_vm5, %v2758_v55, 0.0  ;;  %v2781_v39 = vrot.slane %v2780_v62, 4  ;;  %v5173_v45 = vpop.permute.xlu1 %3178 }
 0x4b3   : > { %v2760_v38 = vcombine.high %v2752_v6, %v2752_v6  ;;  %v2768_v1 = vadd.f32 %v2767_v30, %v2766_v49  ;;  %v2774_v51 = vrot.slane %v2773_v29, 4  ;;  %v2787_v60 = vsel %vm352_vm5, %v2759_v48, 0.0  ;;  %v1568_v10 = vpop.permute.xlu0 %1567 }
 0x4b4   : > { %v2761_v31 = vcombine.high %v2753_v56, %v2753_v56  ;;  %v2782_v28 = vadd.f32 %v2781_v39, %v2780_v62  ;;  %v2788_v42 = vrot.slane %v2787_v60, 4  ;;  %v2794_v13 = vsel %vm352_vm5, %v2752_v6, 0.0  ;;  %1571 = vst.msk [vmem:[%s4184_s18] sm:$0xf] %vm1570_vm2, %v1568_v10 }
 0x4b5   : > { %v2769_v59 = vrot.slane %v2768_v1, 2  ;;  %v2775_v34 = vadd.f32 %v2774_v51, %v2773_v29  ;;  %v2795_v4 = vrot.slane %v2794_v13, 4  ;;  %v2801_v19 = vsel %vm352_vm5, %v2760_v38, 0.0 }
 0x4b6   : > { %v2783_v41 = vrot.slane %v2782_v28, 2  ;;  %v2789_v46 = vadd.f32 %v2788_v42, %v2787_v60  ;;  %v2802_v54 = vrot.slane %v2801_v19, 4  ;;  %v2808_v7 = vsel %vm352_vm5, %v2753_v56, 0.0 }
 0x4b7   : > { %v2770_v11 = vadd.f32 %v2769_v59, %v2768_v1  ;;  %v2776_v35 = vrot.slane %v2775_v34, 2  ;;  %v2796_v16 = vadd.f32 %v2795_v4, %v2794_v13  ;;  %v2809_v24 = vrot.slane %v2808_v7, 4  ;;  %v5181_v20 = vpop.permute.xlu1 %3458 }
 0x4b8   : > { %v2784_v57 = vadd.f32 %v2783_v41, %v2782_v28  ;;  %v2790_v5 = vrot.slane %v2789_v46, 2  ;;  %v2803_v53 = vadd.f32 %v2802_v54, %v2801_v19  ;;  %v2815_v21 = vsel %vm352_vm5, %v2761_v31, 0.0 }
 0x4b9   : > { %v2771_v17 = vrot.slane %v2770_v11, 1  ;;  %v2777_v36 = vadd.f32 %v2776_v35, %v2775_v34  ;;  %v2797_v27 = vrot.slane %v2796_v16, 2  ;;  %v2810_v23 = vadd.f32 %v2809_v24, %v2808_v7 }
 0x4ba   : > { %v2785_v50 = vrot.slane %v2784_v57, 1  ;;  %v2791_v15 = vadd.f32 %v2790_v5, %v2789_v46  ;;  %v2804_v55 = vrot.slane %v2803_v53, 2  ;;  %v2816_v49 = vrot.slane %v2815_v21, 4 }
 0x4bb   : > { %v2772_v6 = vadd.f32 %v2771_v17, %v2770_v11  ;;  %v2778_v48 = vrot.slane %v2777_v36, 1  ;;  %v2798_v30 = vadd.f32 %v2797_v27, %v2796_v16  ;;  %v2811_v62 = vrot.slane %v2810_v23, 2  ;;  %v5184_v56 = vpop.permute.xlu1 %3471 }
 0x4bc   : > { %v2786_v29 = vadd.f32 %v2785_v50, %v2784_v57  ;;  %v2792_v39 = vrot.slane %v2791_v15, 1  ;;  %v2805_v38 = vadd.f32 %v2804_v55, %v2803_v53  ;;  %v2817_v1 = vadd.f32 %v2816_v49, %v2815_v21 }
 0x4bd   : > { %v2779_v51 = vadd.f32 %v2778_v48, %v2777_v36  ;;  %v2799_v60 = vrot.slane %v2798_v30, 1  ;;  %v2812_v10 = vadd.f32 %v2811_v62, %v2810_v23  ;;  %v2822_v31 = vmul.f32 0.25, %v2772_v6 }
 0x4be   : > { %v2793_v28 = vadd.f32 %v2792_v39, %v2791_v15  ;;  %v2806_v42 = vrot.slane %v2805_v38, 1  ;;  %v2818_v13 = vrot.slane %v2817_v1, 2  ;;  %v2824_v59 = vmul.f32 0.25, %v2786_v29 }
 0x4bf   : > { %v2800_v34 = vadd.f32 %v2799_v60, %v2798_v30  ;;  %v2813_v4 = vrot.slane %v2812_v10, 1  ;;  %v2823_v19 = vmul.f32 0.25, %v2779_v51  ;;  %v2830_v41 = vadd.f32 1e-05, %v2822_v31  ;;  %v2628_v46 = vpop.permute.xlu1 %2627 }
 0x4c0   : > { %v2807_v54 = vadd.f32 %v2806_v42, %v2805_v38  ;;  %v2819_v7 = vadd.f32 %v2818_v13, %v2817_v1  ;;  %v2825_v11 = vmul.f32 0.25, %v2793_v28  ;;  %v2832_v35 = vadd.f32 1e-05, %v2824_v59  ;;  %2631 = vst.msk [vmem:[%s4184_s18] sm:$0xf] %vm2630_vm3, %v2628_v46 }
 0x4c1   : > { %v2814_v16 = vadd.f32 %v2813_v4, %v2812_v10  ;;  %v2826_v24 = vmul.f32 0.25, %v2800_v34  ;;  %v2831_v57 = vadd.f32 1e-05, %v2823_v19  ;;  %3870 = vrsqrt.f32 %v2830_v41 }
 0x4c2   : > { %3919 = shalt.err (!%p3916_p5)
}
 0x4c3   : > { %s3920_s18 = scalar_lea.hbm %s5191_s12, 64  ;;  %s3924_s20 = scalar_lea.hbm %s5538_s6, 128 }
 0x4c4   : > { %p3921_p6 = scmp.ne.s32.totalorder %s5191_s12, %s3920_s18  ;;  %p3925_p10 = scmp.lt.u32.totalorder %s5191_s12, %s5538_s6 }
 0x4c5   : > { %p3926_p11 = scmp.lt.u32.totalorder %s3924_s20, %s3920_s18  ;;  %p3928_p13 = scmp.lt.u32.totalorder %s3920_s18, %s5191_s12 }
 0x4c6   : > { %p3922_p7 = pnand %p3921_p6, %p4109_p4 }
 0x4c7   : > { %p3927_p12 = por %p3926_p11, %p3925_p10 }
 0x4c8   : > { %p3923_p9 = pneg %p3922_p7 }
 0x4c9   : > { %p3929_p0 = por %p3928_p13, %p3927_p12 }
 0x4cb   : > { %p3930_p1 = pnand %p3929_p0, %p3923_p9 }
 0x4cd   : > { %3933 = shalt.err (!%p3930_p1)
}
 0x4ce   : > { %3716 = dma.vmem_to_hbm [thread:$0]  (%p4109_p4), %s5193_s11, 64, %s5191_s12, %s3520_s14   ;;  %v2820_v5 = vrot.slane %v2819_v7, 1  ;;  %v2827_v53 = vmul.f32 0.25, %v2807_v54  ;;  %v2833_v21 = vadd.f32 1e-05, %v2825_v11  ;;  %3872 = vrsqrt.f32 %v2832_v35  ;;  %v3871_v49 = vpop.eup %3870 }
 0x4cf   : > { %v2828_v17 = vmul.f32 0.25, %v2814_v16  ;;  %v2834_v36 = vadd.f32 1e-05, %v2826_v24  ;;  %3874 = vrsqrt.f32 %v2831_v57  ;;  %v2876_v51 = vrot.slane %v5138_v43, %v4189_v32  ;;  %s3674_s11 = sshll.u32 %s4163_s15, 5  ;;  %s3714_s14 = sshll.u32 %s4008_s24, 9 }
 0x4d0   : > { %v2821_v27 = vadd.f32 %v2820_v5, %v2819_v7  ;;  %v2835_v23 = vadd.f32 1e-05, %v2827_v53  ;;  %3876 = vrsqrt.f32 %v2833_v21  ;;  %v2892_v28 = vrot.slane %v5140_v58, %v4189_v32  ;;  %s286_s12 = scalar_lea.vmem [#allocation5], %s3674_s11  ;;  %s5484_s30 = scalar_lea.hbm %s5537_s5, %s3714_s14 }
 0x4d1   : > { %v2836_v50 = vadd.f32 1e-05, %v2828_v17  ;;  %3878 = vrsqrt.f32 %v2834_v36  ;;  %s3536_s17 = sshll.u32 %s286_s12, 4  ;;  %s3515_s24 = scalar_lea.sflag [#allocation6], %s4163_s15  ;;  %s5486_s17 = int_to_ptr.vmem [resolvable:$true] %s3536_s17 }
 0x4d2   : > { %v2829_v15 = vmul.f32 0.25, %v2821_v27  ;;  %3880 = vrsqrt.f32 %v2835_v23  ;;  %s3934_s18 = scalar_lea.vmem %s5486_s17, 512  ;;  %s4033_s27 = smov [#allocation5]  }
 0x4d3   : > { %3882 = vrsqrt.f32 %v2836_v50  ;;  %p3935_p2 = scmp.ne.s32.totalorder %s5486_s17, %s3934_s18  ;;  %s3938_s8 = sshll.u32 %s4033_s27, 4  ;;  %s3939_s8 = int_to_ptr.vmem [resolvable:$false] %s3938_s8 }
 0x4d4   : > { %v2837_v55 = vadd.f32 1e-05, %v2829_v15  ;;  %s3940_s20 = scalar_lea.vmem %s3939_s8, 1024  ;;  %p3941_p6 = scmp.lt.s32.totalorder %s5486_s17, %s3939_s8 }
 0x4d5   : > { %p3936_p3 = pnand %p3935_p2, %p4109_p4  ;;  %p3942_p7 = scmp.lt.s32.totalorder %s3940_s20, %s3934_s18 }
 0x4d6   : > { %3884 = vrsqrt.f32 %v2837_v55 }
 0x4d7   : > { %p3937_p5 = pneg %p3936_p3  ;;  %p3943_p9 = por %p3942_p7, %p3941_p6 }
 0x4d8   : > { %v3873_v6 = vpop.eup %3872 }
 0x4d9   : > { %v3875_v48 = vpop.eup %3874  ;;  %p3944_p10 = pnand %p3943_p9, %p3937_p5 }
 0x4da   : > { %v3877_v30 = vpop.eup %3876  ;;  %v2854_v62 = vcombine.low %v3871_v49, %v3875_v48 }
 0x4db   : > { %v3879_v29 = vpop.eup %3878  ;;  %v2855_v39 = vcombine.low %v3873_v6, %v3877_v30 }
 0x4dc   : > { %v3881_v38 = vpop.eup %3880  ;;  %v2862_v1 = vmul.f32 %v2854_v62, %v5147_v0 }
 0x4dd   : > { %v2856_v60 = vcombine.low %v3879_v29, %v3881_v38  ;;  %v2863_v10 = vmul.f32 %v2855_v39, %v5150_v63  ;;  %v3883_v42 = vpop.eup %3882 }
 0x4de   : > { %v2878_v31 = vmul.f32 %v2876_v51, %v2862_v1 }
 0x4df   : > { %v2864_v13 = vmul.f32 %v2856_v60, %v5157_v22  ;;  %v2879_v59 = vmul.f32 %v2876_v51, %v2863_v10 }
 0x4e0   : > { %v3885_v34 = vpop.eup %3884  ;;  %v2894_v4 = vadd.f32 %v2892_v28, %v2878_v31 }
 0x4e1   : > { %v2857_v19 = vcombine.low %v3883_v42, %v3885_v34  ;;  %v2880_v41 = vmul.f32 %v2876_v51, %v2864_v13  ;;  %v2895_v46 = vadd.f32 %v2892_v28, %v2879_v59 }
 0x4e2   : > { %v5226_v0 = vmax.f32 %v2894_v4, 0.0 }
 0x4e3   : > { %v2865_v43 = vmul.f32 %v2857_v19, %v5164_v14  ;;  %v2896_v54 = vadd.f32 %v2892_v28, %v2880_v41  ;;  %v5229_v7 = vmax.f32 %v2895_v46, 0.0 }
 0x4e4   : > { %v2916_v63 = vrot.slane %v5226_v0, %v4312_v61  ;;  %v2920_v32 = vrot.slane %v5226_v0, %v4319_v3  ;;  %v3000_v58 = vrot.slane %v5226_v0, %v4325_v8  ;;  %v3004_v22 = vrot.slane %v5226_v0, %v4339_v44 }
 0x4e5   : > { %v2881_v11 = vmul.f32 %v2876_v51, %v2865_v43  ;;  %v5239_v35 = vmax.f32 %v2896_v54, 0.0  ;;  %v2924_v14 = vrot.slane %v5229_v7, %v4312_v61  ;;  %v2928_v16 = vrot.slane %v5229_v7, %v4319_v3 }
 0x4e6   : > { %v2956_v24 = vrot.slane %v2916_v63, %v4312_v61  ;;  %v2960_v57 = vrot.slane %v2920_v32, %v4312_v61  ;;  %v3008_v5 = vrot.slane %v5229_v7, %v4325_v8  ;;  %v3012_v53 = vrot.slane %v5229_v7, %v4339_v44 }
 0x4e7   : > { %v2897_v21 = vadd.f32 %v2892_v28, %v2881_v11  ;;  %v2932_v17 = vrot.slane %v5239_v35, %v4312_v61  ;;  %v2936_v36 = vrot.slane %v5239_v35, %v4319_v3  ;;  %v2964_v27 = vrot.slane %v2924_v14, %v4312_v61 }
 0x4e8   : > { %v2968_v23 = vrot.slane %v2928_v16, %v4312_v61  ;;  %v2985_v50 = vmul.f32 %v2956_v24, %v5142_v40  ;;  %v2986_v15 = vmul.f32 %v2960_v57, %v5142_v40  ;;  %v3016_v55 = vrot.slane %v5239_v35, %v4325_v8 }
 0x4e9   : > { %v5261_v49 = vmax.f32 %v2897_v21, 0.0  ;;  %v2972_v6 = vrot.slane %v2932_v17, %v4312_v61  ;;  %v2976_v48 = vrot.slane %v2936_v36, %v4312_v61  ;;  %v2987_v30 = vmul.f32 %v2964_v27, %v5142_v40 }
 0x4ea   : > { %v2988_v62 = vmul.f32 %v2968_v23, %v5142_v40  ;;  %v3020_v29 = vrot.slane %v5239_v35, %v4339_v44  ;;  %v3040_v39 = vrot.slane %v3000_v58, %v4325_v8  ;;  %v3044_v38 = vrot.slane %v3004_v22, %v4325_v8 }
 0x4eb   : > { %v2940_v1 = vrot.slane %v5261_v49, %v4312_v61  ;;  %v2944_v51 = vrot.slane %v5261_v49, %v4319_v3  ;;  %v2989_v60 = vmul.f32 %v2972_v6, %v5142_v40  ;;  %v2990_v10 = vmul.f32 %v2976_v48, %v5142_v40 }
 0x4ec   : > { %v3024_v31 = vrot.slane %v5261_v49, %v4325_v8  ;;  %v3028_v28 = vrot.slane %v5261_v49, %v4339_v44  ;;  %v3048_v42 = vrot.slane %v3008_v5, %v4325_v8  ;;  %v3052_v13 = vrot.slane %v3012_v53, %v4325_v8 }
 0x4ed   : > { %v2980_v59 = vrot.slane %v2940_v1, %v4312_v61  ;;  %v2984_v34 = vrot.slane %v2944_v51, %v4312_v61  ;;  %v3056_v3 = vrot.slane %v3016_v55, %v4325_v8  ;;  %v3060_v4 = vrot.slane %v3020_v29, %v4325_v8 }
 0x4ee   : > { %v3064_v19 = vrot.slane %v3024_v31, %v4325_v8  ;;  %v3068_v41 = vrot.slane %v3028_v28, %v4325_v8  ;;  %v3069_v46 = vmul.f32 %v3040_v39, %v5144_v18  ;;  %v3070_v44 = vmul.f32 %v3044_v38, %v5144_v18 }
 0x4ef   : > { %v2991_v43 = vmul.f32 %v2980_v59, %v5142_v40  ;;  %v2992_v54 = vmul.f32 %v2984_v34, %v5142_v40  ;;  %v3071_v63 = vmul.f32 %v3048_v42, %v5144_v18  ;;  %v3072_v61 = vmul.f32 %v3052_v13, %v5144_v18 }
 0x4f0   : > { %v3073_v32 = vmul.f32 %v3056_v3, %v5144_v18  ;;  %v3074_v58 = vmul.f32 %v3060_v4, %v5144_v18  ;;  %v3075_v22 = vmul.f32 %v3064_v19, %v5144_v18  ;;  %v3076_v8 = vmul.f32 %v3068_v41, %v5144_v18 }
 0x4f1   : > { %v3077_v11 = vadd.f32 %v3069_v46, %v2985_v50  ;;  %v3078_v14 = vadd.f32 %v3070_v44, %v2986_v15  ;;  %v3079_v16 = vadd.f32 %v3071_v63, %v2987_v30  ;;  %v3080_v24 = vadd.f32 %v3072_v61, %v2988_v62  ;;  %v5553_v44 = vld [vmem:[#allocation11_spill] sm:$0xff] }
 0x4f2   : > { %v3081_v57 = vadd.f32 %v3073_v32, %v2989_v60  ;;  %v3082_v5 = vadd.f32 %v3074_v58, %v2990_v10  ;;  %v3083_v53 = vadd.f32 %v3075_v22, %v2991_v43  ;;  %v3084_v40 = vadd.f32 %v3076_v8, %v2992_v54 }
 0x4f3   : > { %v3092_v21 = vrot.slane %v5226_v0, %v4316_v2  ;;  %v3096_v17 = vrot.slane %v5226_v0, %v4322_v9  ;;  %v3100_v36 = vrot.slane %v5229_v7, %v4316_v2  ;;  %v3104_v18 = vrot.slane %v5229_v7, %v4322_v9 }
 0x4f4   : > { %v3108_v27 = vrot.slane %v5239_v35, %v4316_v2  ;;  %v3112_v23 = vrot.slane %v5239_v35, %v4322_v9  ;;  %v3116_v50 = vrot.slane %v5261_v49, %v4316_v2  ;;  %v3120_v15 = vrot.slane %v5261_v49, %v4322_v9 }
 0x4f5   : > { %v3132_v55 = vrot.slane %v3092_v21, %v4316_v2  ;;  %v3136_v6 = vrot.slane %v3096_v17, %v4316_v2  ;;  %v3140_v48 = vrot.slane %v3100_v36, %v4316_v2  ;;  %v3144_v30 = vrot.slane %v3104_v18, %v4316_v2 }
 0x4f6   : > { %v3148_v62 = vrot.slane %v3108_v27, %v4316_v2  ;;  %v3152_v29 = vrot.slane %v3112_v23, %v4316_v2  ;;  %v3156_v39 = vrot.slane %v3116_v50, %v4316_v2  ;;  %v3160_v38 = vrot.slane %v3120_v15, %v4316_v2 }
 0x4f7   : > { %v3161_v1 = vmul.f32 %v3132_v55, %v5152_v52  ;;  %v3162_v9 = vmul.f32 %v3136_v6, %v5152_v52  ;;  %v3163_v51 = vmul.f32 %v3140_v48, %v5152_v52  ;;  %v3164_v60 = vmul.f32 %v3144_v30, %v5152_v52 }
 0x4f8   : > { %v3165_v10 = vmul.f32 %v3148_v62, %v5152_v52  ;;  %v3166_v31 = vmul.f32 %v3152_v29, %v5152_v52  ;;  %v3167_v28 = vmul.f32 %v3156_v39, %v5152_v52  ;;  %v3168_v42 = vmul.f32 %v3160_v38, %v5152_v52 }
 0x4f9   : > { %v3169_v13 = vadd.f32 %v3161_v1, %v3077_v11  ;;  %v3170_v59 = vadd.f32 %v3162_v9, %v3078_v14  ;;  %v3171_v34 = vadd.f32 %v3163_v51, %v3079_v16  ;;  %v3172_v2 = vadd.f32 %v3164_v60, %v3080_v24 }
 0x4fa   : > { %v3173_v3 = vadd.f32 %v3165_v10, %v3081_v57  ;;  %v3174_v4 = vadd.f32 %v3166_v31, %v3082_v5  ;;  %v3175_v19 = vadd.f32 %v3167_v28, %v3083_v53  ;;  %v3176_v41 = vadd.f32 %v3168_v42, %v3084_v40 }
 0x4fb   : > { %v3184_v46 = vrot.slane %v5226_v0, %v4328_v12  ;;  %v3188_v43 = vrot.slane %v5226_v0, %v5553_v44  ;;  %v3192_v54 = vrot.slane %v5229_v7, %v4328_v12  ;;  %v3196_v52 = vrot.slane %v5229_v7, %v5553_v44 }
 0x4fc   : > { %v3200_v63 = vrot.slane %v5239_v35, %v4328_v12  ;;  %v3204_v61 = vrot.slane %v5239_v35, %v5553_v44  ;;  %v3208_v32 = vrot.slane %v5261_v49, %v4328_v12  ;;  %v3212_v58 = vrot.slane %v5261_v49, %v5553_v44 }
 0x4fd   : > { %v3224_v0 = vrot.slane %v3184_v46, %v4328_v12  ;;  %v3228_v22 = vrot.slane %v3188_v43, %v4328_v12  ;;  %v3232_v8 = vrot.slane %v3192_v54, %v4328_v12  ;;  %v3236_v7 = vrot.slane %v3196_v52, %v4328_v12 }
 0x4fe   : > { %v3240_v11 = vrot.slane %v3200_v63, %v4328_v12  ;;  %v3244_v14 = vrot.slane %v3204_v61, %v4328_v12  ;;  %v3248_v35 = vrot.slane %v3208_v32, %v4328_v12  ;;  %v3252_v16 = vrot.slane %v3212_v58, %v4328_v12 }
 0x4ff   : > { %v3253_v24 = vmul.f32 %v3224_v0, %v5173_v45  ;;  %v3254_v49 = vmul.f32 %v3228_v22, %v5173_v45  ;;  %v3255_v57 = vmul.f32 %v3232_v8, %v5173_v45  ;;  %v3256_v5 = vmul.f32 %v3236_v7, %v5173_v45 }
 0x500   : > { %v3257_v53 = vmul.f32 %v3240_v11, %v5173_v45  ;;  %v3258_v40 = vmul.f32 %v3244_v14, %v5173_v45  ;;  %v3259_v21 = vmul.f32 %v3248_v35, %v5173_v45  ;;  %v3260_v17 = vmul.f32 %v3252_v16, %v5173_v45 }
 0x501   : > { %v3261_v36 = vadd.f32 %v3253_v24, %v3169_v13  ;;  %v3262_v18 = vadd.f32 %v3254_v49, %v3170_v59  ;;  %v3263_v27 = vadd.f32 %v3255_v57, %v3171_v34  ;;  %v3264_v12 = vadd.f32 %v3256_v5, %v3172_v2 }
 0x502   : > { %v3265_v23 = vadd.f32 %v3257_v53, %v3173_v3  ;;  %v3266_v50 = vadd.f32 %v3258_v40, %v3174_v4  ;;  %v3267_v15 = vadd.f32 %v3259_v21, %v3175_v19  ;;  %v3268_v55 = vadd.f32 %v3260_v17, %v3176_v41 }
 0x503   : > { %v5364_v6 = vadd.f32 %v5161_v26, %v3261_v36  ;;  %v5367_v48 = vadd.f32 %v5161_v26, %v3262_v18  ;;  %v5370_v30 = vadd.f32 %v5161_v26, %v3263_v27  ;;  %v5373_v62 = vadd.f32 %v5161_v26, %v3264_v12 }
 0x504   : > { %v5376_v45 = vadd.f32 %v5161_v26, %v3265_v23  ;;  %v5379_v29 = vadd.f32 %v5161_v26, %v3266_v50  ;;  %v5382_v39 = vadd.f32 %v5161_v26, %v3267_v15  ;;  %v5385_v38 = vadd.f32 %v5161_v26, %v3268_v55 }
 0x505   : > { %v3288_v1 = vsel %vm352_vm5, %v5364_v6, 0.0  ;;  %v3295_v9 = vsel %vm352_vm5, %v5367_v48, 0.0  ;;  %v3302_v51 = vsel %vm352_vm5, %v5370_v30, 0.0  ;;  %v3309_v60 = vsel %vm352_vm5, %v5373_v62, 0.0 }
 0x506   : > { %v3289_v10 = vrot.slane %v3288_v1, 4  ;;  %v3296_v31 = vrot.slane %v3295_v9, 4  ;;  %v3303_v28 = vrot.slane %v3302_v51, 4  ;;  %v3310_v42 = vrot.slane %v3309_v60, 4 }
 0x507   : > { %v3316_v26 = vsel %vm352_vm5, %v5376_v45, 0.0  ;;  %v3323_v13 = vsel %vm352_vm5, %v5379_v29, 0.0  ;;  %v3330_v59 = vsel %vm352_vm5, %v5382_v39, 0.0  ;;  %v3337_v34 = vsel %vm352_vm5, %v5385_v38, 0.0 }
 0x508   : > { %v3290_v2 = vadd.f32 %v3289_v10, %v3288_v1  ;;  %v3297_v3 = vadd.f32 %v3296_v31, %v3295_v9  ;;  %v3304_v4 = vadd.f32 %v3303_v28, %v3302_v51  ;;  %v3311_v19 = vadd.f32 %v3310_v42, %v3309_v60 }
 0x509   : > { %v3317_v41 = vrot.slane %v3316_v26, 4  ;;  %v3324_v46 = vrot.slane %v3323_v13, 4  ;;  %v3331_v44 = vrot.slane %v3330_v59, 4  ;;  %v3338_v43 = vrot.slane %v3337_v34, 4 }
 0x50a   : > { %v3291_v54 = vrot.slane %v3290_v2, 2  ;;  %v3298_v52 = vrot.slane %v3297_v3, 2  ;;  %v3305_v63 = vrot.slane %v3304_v4, 2  ;;  %v3312_v61 = vrot.slane %v3311_v19, 2 }
 0x50b   : > { %v3318_v32 = vadd.f32 %v3317_v41, %v3316_v26  ;;  %v3325_v58 = vadd.f32 %v3324_v46, %v3323_v13  ;;  %v3332_v0 = vadd.f32 %v3331_v44, %v3330_v59  ;;  %v3339_v22 = vadd.f32 %v3338_v43, %v3337_v34 }
 0x50c   : > { %v3292_v8 = vadd.f32 %v3291_v54, %v3290_v2  ;;  %v3299_v7 = vadd.f32 %v3298_v52, %v3297_v3  ;;  %v3306_v11 = vadd.f32 %v3305_v63, %v3304_v4  ;;  %v3313_v14 = vadd.f32 %v3312_v61, %v3311_v19 }
 0x50d   : > { %v3319_v35 = vrot.slane %v3318_v32, 2  ;;  %v3326_v16 = vrot.slane %v3325_v58, 2  ;;  %v3333_v24 = vrot.slane %v3332_v0, 2  ;;  %v3340_v49 = vrot.slane %v3339_v22, 2 }
 0x50e   : > { %v3293_v57 = vrot.slane %v3292_v8, 1  ;;  %v3300_v5 = vrot.slane %v3299_v7, 1  ;;  %v3307_v53 = vrot.slane %v3306_v11, 1  ;;  %v3314_v40 = vrot.slane %v3313_v14, 1 }
 0x50f   : > { %v3320_v21 = vadd.f32 %v3319_v35, %v3318_v32  ;;  %v3327_v17 = vadd.f32 %v3326_v16, %v3325_v58  ;;  %v3334_v36 = vadd.f32 %v3333_v24, %v3332_v0  ;;  %v3341_v18 = vadd.f32 %v3340_v49, %v3339_v22 }
 0x510   : > { %v3294_v27 = vadd.f32 %v3293_v57, %v3292_v8  ;;  %v3301_v12 = vadd.f32 %v3300_v5, %v3299_v7  ;;  %v3308_v23 = vadd.f32 %v3307_v53, %v3306_v11  ;;  %v3315_v50 = vadd.f32 %v3314_v40, %v3313_v14 }
 0x511   : > { %v3321_v15 = vrot.slane %v3320_v21, 1  ;;  %v3328_v55 = vrot.slane %v3327_v17, 1  ;;  %v3335_v1 = vrot.slane %v3334_v36, 1  ;;  %v3342_v9 = vrot.slane %v3341_v18, 1 }
 0x512   : > { %v3344_v51 = vmul.f32 0.25, %v3294_v27  ;;  %v3345_v60 = vmul.f32 0.25, %v3301_v12  ;;  %v3346_v10 = vmul.f32 0.25, %v3308_v23  ;;  %v3347_v31 = vmul.f32 0.25, %v3315_v50 }
 0x513   : > { %v3322_v28 = vadd.f32 %v3321_v15, %v3320_v21  ;;  %v3329_v42 = vadd.f32 %v3328_v55, %v3327_v17  ;;  %v3336_v26 = vadd.f32 %v3335_v1, %v3334_v36  ;;  %v3343_v13 = vadd.f32 %v3342_v9, %v3341_v18 }
 0x514   : > { %v5404_v59 = vsub.f32 %v5364_v6, %v3344_v51  ;;  %v5407_v34 = vsub.f32 %v5367_v48, %v3345_v60  ;;  %v5410_v2 = vsub.f32 %v5370_v30, %v3346_v10  ;;  %v5413_v3 = vsub.f32 %v5373_v62, %v3347_v31 }
 0x515   : > { %v3348_v4 = vmul.f32 0.25, %v3322_v28  ;;  %v3349_v19 = vmul.f32 0.25, %v3329_v42  ;;  %v3350_v41 = vmul.f32 0.25, %v3336_v26  ;;  %v3351_v46 = vmul.f32 0.25, %v3343_v13 }
 0x516   : > { %v3360_v44 = vmul.f32 %v5404_v59, %v5404_v59  ;;  %v3361_v6 = vmul.f32 %v5407_v34, %v5407_v34  ;;  %v3362_v48 = vmul.f32 %v5410_v2, %v5410_v2  ;;  %v3363_v30 = vmul.f32 %v5413_v3, %v5413_v3 }
 0x517   : > { %v5424_v43 = vsub.f32 %v5376_v45, %v3348_v4  ;;  %v5427_v62 = vsub.f32 %v5379_v29, %v3349_v19  ;;  %v5430_v54 = vsub.f32 %v5382_v39, %v3350_v41  ;;  %v5433_v52 = vsub.f32 %v5385_v38, %v3351_v46 }
 0x518   : > { %v3368_v63 = vsel %vm352_vm5, %v3360_v44, 0.0  ;;  %v3375_v61 = vsel %vm352_vm5, %v3361_v6, 0.0  ;;  %v3382_v32 = vsel %vm352_vm5, %v3362_v48, 0.0  ;;  %v3389_v58 = vsel %vm352_vm5, %v3363_v30, 0.0 }
 0x519   : > { %v3364_v45 = vmul.f32 %v5424_v43, %v5424_v43  ;;  %v3365_v29 = vmul.f32 %v5427_v62, %v5427_v62  ;;  %v3366_v39 = vmul.f32 %v5430_v54, %v5430_v54  ;;  %v3367_v38 = vmul.f32 %v5433_v52, %v5433_v52 }
 0x51a   : > { %v3369_v0 = vrot.slane %v3368_v63, 4  ;;  %v3376_v22 = vrot.slane %v3375_v61, 4  ;;  %v3383_v8 = vrot.slane %v3382_v32, 4  ;;  %v3390_v7 = vrot.slane %v3389_v58, 4 }
 0x51b   : > { %v3396_v11 = vsel %vm352_vm5, %v3364_v45, 0.0  ;;  %v3403_v14 = vsel %vm352_vm5, %v3365_v29, 0.0  ;;  %v3410_v35 = vsel %vm352_vm5, %v3366_v39, 0.0  ;;  %v3417_v16 = vsel %vm352_vm5, %v3367_v38, 0.0 }
 0x51c   : > { %v3370_v24 = vadd.f32 %v3369_v0, %v3368_v63  ;;  %v3377_v49 = vadd.f32 %v3376_v22, %v3375_v61  ;;  %v3384_v57 = vadd.f32 %v3383_v8, %v3382_v32  ;;  %v3391_v5 = vadd.f32 %v3390_v7, %v3389_v58 }
 0x51d   : > { %v3397_v53 = vrot.slane %v3396_v11, 4  ;;  %v3404_v40 = vrot.slane %v3403_v14, 4  ;;  %v3411_v21 = vrot.slane %v3410_v35, 4  ;;  %v3418_v17 = vrot.slane %v3417_v16, 4 }
 0x51e   : > { %v3371_v36 = vrot.slane %v3370_v24, 2  ;;  %v3378_v18 = vrot.slane %v3377_v49, 2  ;;  %v3385_v27 = vrot.slane %v3384_v57, 2  ;;  %v3392_v12 = vrot.slane %v3391_v5, 2 }
 0x51f   : > { %v3398_v23 = vadd.f32 %v3397_v53, %v3396_v11  ;;  %v3405_v50 = vadd.f32 %v3404_v40, %v3403_v14  ;;  %v3412_v15 = vadd.f32 %v3411_v21, %v3410_v35  ;;  %v3419_v55 = vadd.f32 %v3418_v17, %v3417_v16 }
 0x520   : > { %v3372_v1 = vadd.f32 %v3371_v36, %v3370_v24  ;;  %v3379_v9 = vadd.f32 %v3378_v18, %v3377_v49  ;;  %v3386_v51 = vadd.f32 %v3385_v27, %v3384_v57  ;;  %v3393_v60 = vadd.f32 %v3392_v12, %v3391_v5 }
 0x521   : > { %v3399_v10 = vrot.slane %v3398_v23, 2  ;;  %v3406_v31 = vrot.slane %v3405_v50, 2  ;;  %v3413_v28 = vrot.slane %v3412_v15, 2  ;;  %v3420_v42 = vrot.slane %v3419_v55, 2 }
 0x522   : > { %v3373_v26 = vrot.slane %v3372_v1, 1  ;;  %v3380_v13 = vrot.slane %v3379_v9, 1  ;;  %v3387_v4 = vrot.slane %v3386_v51, 1  ;;  %v3394_v19 = vrot.slane %v3393_v60, 1 }
 0x523   : > { %v3400_v41 = vadd.f32 %v3399_v10, %v3398_v23  ;;  %v3407_v46 = vadd.f32 %v3406_v31, %v3405_v50  ;;  %v3414_v44 = vadd.f32 %v3413_v28, %v3412_v15  ;;  %v3421_v6 = vadd.f32 %v3420_v42, %v3419_v55 }
 0x524   : > { %v3374_v48 = vadd.f32 %v3373_v26, %v3372_v1  ;;  %v3381_v30 = vadd.f32 %v3380_v13, %v3379_v9  ;;  %v3388_v63 = vadd.f32 %v3387_v4, %v3386_v51  ;;  %v3395_v61 = vadd.f32 %v3394_v19, %v3393_v60 }
 0x525   : > { %v3401_v32 = vrot.slane %v3400_v41, 1  ;;  %v3408_v58 = vrot.slane %v3407_v46, 1  ;;  %v3415_v45 = vrot.slane %v3414_v44, 1  ;;  %v3422_v29 = vrot.slane %v3421_v6, 1 }
 0x526   : > { %v3424_v39 = vmul.f32 0.25, %v3374_v48  ;;  %v3425_v38 = vmul.f32 0.25, %v3381_v30  ;;  %v3426_v0 = vmul.f32 0.25, %v3388_v63  ;;  %v3427_v22 = vmul.f32 0.25, %v3395_v61 }
 0x527   : > { %v3402_v8 = vadd.f32 %v3401_v32, %v3400_v41  ;;  %v3409_v7 = vadd.f32 %v3408_v58, %v3407_v46  ;;  %v3416_v11 = vadd.f32 %v3415_v45, %v3414_v44  ;;  %v3423_v14 = vadd.f32 %v3422_v29, %v3421_v6 }
 0x528   : > { %v3432_v35 = vadd.f32 1e-05, %v3424_v39  ;;  %v3433_v16 = vadd.f32 1e-05, %v3425_v38  ;;  %v3434_v24 = vadd.f32 1e-05, %v3426_v0 }
 0x529   : > { %v3428_v49 = vmul.f32 0.25, %v3402_v8  ;;  %v3429_v57 = vmul.f32 0.25, %v3409_v7  ;;  %v3430_v5 = vmul.f32 0.25, %v3416_v11  ;;  %v3431_v53 = vmul.f32 0.25, %v3423_v14 }
 0x52a   : > { %v3435_v40 = vadd.f32 1e-05, %v3427_v22  ;;  %3886 = vrsqrt.f32 %v3432_v35 }
 0x52b   : > { %v3436_v21 = vadd.f32 1e-05, %v3428_v49  ;;  %v3437_v17 = vadd.f32 1e-05, %v3429_v57  ;;  %3888 = vrsqrt.f32 %v3433_v16  ;;  %v3438_v36 = vadd.f32 1e-05, %v3430_v5 }
 0x52c   : > { %3890 = vrsqrt.f32 %v3434_v24  ;;  %v3439_v18 = vadd.f32 1e-05, %v3431_v53 }
 0x52d   : > { %3892 = vrsqrt.f32 %v3435_v40 }
 0x52e   : > { %3894 = vrsqrt.f32 %v3436_v21 }
 0x52f   : > { %3896 = vrsqrt.f32 %v3437_v17 }
 0x530   : > { %3898 = vrsqrt.f32 %v3438_v36 }
 0x531   : > { %3900 = vrsqrt.f32 %v3439_v18 }
 0x534   : > { %v3887_v27 = vpop.eup %3886 }
 0x535   : > { %v3889_v12 = vpop.eup %3888  ;;  %v3448_v23 = vmul.f32 %v3887_v27, %v5404_v59 }
 0x536   : > { %v3891_v50 = vpop.eup %3890  ;;  %v3449_v15 = vmul.f32 %v3889_v12, %v5407_v34 }
 0x537   : > { %v3893_v55 = vpop.eup %3892  ;;  %v3450_v1 = vmul.f32 %v3891_v50, %v5410_v2  ;;  %v3461_v9 = vmul.f32 %v5181_v20, %v3448_v23 }
 0x538   : > { %v3895_v51 = vpop.eup %3894  ;;  %v3451_v60 = vmul.f32 %v3893_v55, %v5413_v3  ;;  %v3462_v10 = vmul.f32 %v5181_v20, %v3449_v15 }
 0x539   : > { %v3897_v31 = vpop.eup %3896  ;;  %v3452_v28 = vmul.f32 %v3895_v51, %v5424_v43  ;;  %v3463_v42 = vmul.f32 %v5181_v20, %v3450_v1  ;;  %v3474_v59 = vadd.f32 %v5184_v56, %v3461_v9 }
 0x53a   : > { %v3899_v26 = vpop.eup %3898  ;;  %v3453_v34 = vmul.f32 %v3897_v31, %v5427_v62  ;;  %v3464_v2 = vmul.f32 %v5181_v20, %v3451_v60  ;;  %v3475_v13 = vadd.f32 %v5184_v56, %v3462_v10 }
 0x53b   : > { %v3901_v4 = vpop.eup %3900  ;;  %v3454_v19 = vmul.f32 %v3899_v26, %v5430_v54  ;;  %v3465_v3 = vmul.f32 %v5181_v20, %v3452_v28  ;;  %v3476_v41 = vadd.f32 %v5184_v56, %v3463_v42  ;;  %v3482_v46 = vmax.f32 %v3474_v59, 0.0 }
 0x53c   : > { %v3455_v43 = vmul.f32 %v3901_v4, %v5433_v52  ;;  %v3466_v44 = vmul.f32 %v5181_v20, %v3453_v34  ;;  %v3477_v6 = vadd.f32 %v5184_v56, %v3464_v2  ;;  %v3483_v62 = vmax.f32 %v3475_v13, 0.0 }
 0x53d   : > { %v3467_v48 = vmul.f32 %v5181_v20, %v3454_v19  ;;  %v3478_v30 = vadd.f32 %v5184_v56, %v3465_v3  ;;  %v3484_v63 = vmax.f32 %v3476_v41, 0.0 }
 0x53e   : > { %v3468_v54 = vmul.f32 %v5181_v20, %v3455_v43  ;;  %v3479_v61 = vadd.f32 %v5184_v56, %v3466_v44  ;;  %v3485_v32 = vmax.f32 %v3477_v6, 0.0  ;;  %v3498_v58 = vcombine.low %v3482_v46, %v3483_v62 }
 0x53f   : > { %v3480_v45 = vadd.f32 %v5184_v56, %v3467_v48  ;;  %v3486_v52 = vmax.f32 %v3478_v30, 0.0 }
 0x540   : > { %v3481_v29 = vadd.f32 %v5184_v56, %v3468_v54  ;;  %v3487_v39 = vmax.f32 %v3479_v61, 0.0  ;;  %v3499_v38 = vcombine.low %v3484_v63, %v3485_v32  ;;  %v3506_v0 = vadd.f32 %v3498_v58, %v5004_v47 }
 0x541   : > { %v3488_v22 = vmax.f32 %v3480_v45, 0.0 }
 0x542   : > { %v3489_v8 = vmax.f32 %v3481_v29, 0.0  ;;  %v3500_v7 = vcombine.low %v3486_v52, %v3487_v39  ;;  %v3507_v20 = vadd.f32 %v3499_v38, %v5008_v33  ;;  %3510 = vst [vmem:[%s286_s12] sm:$0xff] %v3506_v0 }
 0x544   : > { %v3501_v11 = vcombine.low %v3488_v22, %v3489_v8  ;;  %v3508_v14 = vadd.f32 %v3500_v7, %v5012_v25  ;;  %3511 = vst [vmem:[%s286_s12 + $0x8] sm:$0xff] %v3507_v20 }
 0x546   : > { %v3509_v56 = vadd.f32 %v3501_v11, %v5016_v37  ;;  %3512 = vst [vmem:[%s286_s12 + $0x10] sm:$0xff] %v3508_v14 }
 0x548   : > { %3513 = vst [vmem:[%s286_s12 + $0x18] sm:$0xff] %v3509_v56 }
 0x549   : > { %3947 = shalt.err (!%p3944_p10)
}
 0x54a   : > { %s3948_s15 = scalar_lea.hbm %s5484_s30, 512  ;;  %s3952_s11 = scalar_lea.hbm %s5537_s5, 1024 }
 0x54b   : > { %p3949_p11 = scmp.ne.s32.totalorder %s5484_s30, %s3948_s15  ;;  %p3953_p0 = scmp.lt.u32.totalorder %s5484_s30, %s5537_s5 }
 0x54c   : > { %p3954_p1 = scmp.lt.u32.totalorder %s3952_s11, %s3948_s15  ;;  %p3956_p3 = scmp.lt.u32.totalorder %s3948_s15, %s5484_s30 }
 0x54d   : > { %p3950_p12 = pnand %p3949_p11, %p4109_p4 }
 0x54e   : > { %p3955_p2 = por %p3954_p1, %p3953_p0 }
 0x54f   : > { %p3951_p13 = pneg %p3950_p12 }
 0x550   : > { %p3957_p5 = por %p3956_p3, %p3955_p2 }
 0x552   : > { %p3958_p6 = pnand %p3957_p5, %p3951_p13 }
 0x554   : > { %3961 = shalt.err (!%p3958_p6)
}
 0x555   : > { %3715 = dma.vmem_to_hbm [thread:$0]  (%p4109_p4), %s5486_s17, 512, %s5484_s30, %s3515_s24  }
 0x556 PF: > { %p3726_p7 = scmp.ge.s32.totalorder %s4016_s26, 2  ;;  %s3561_s28 = sand.u32 1, %s3996_s21  }
 0x557   : > { %s3562_s19 = scalar_lea.sflag [#allocation6], %s3561_s28 }
 0x558   : > { %p3720_p9 = pnand %p3726_p7, %p4116_p8 }
 0x55a   : > { %3987 = dma.done.wait (!%p3720_p9), %s3562_s19, 512  }
 0x55b   : > { %3989 = vsyncadd (!%p3720_p9), %s3562_s19, 4294966784  ;;  %s3571_s18 = scalar_lea.sflag [#allocation8], %s3561_s28 }
 0x55c   : > { %3991 = dma.done.wait (!%p3720_p9), %s3571_s18, 64  }
 0x55d   : > { %3993 = vsyncadd (!%p3720_p9), %s3571_s18, 4294967232  ;;  %s23_s26 = sadd.s32 1, %s4016_s26   ;;  %s5554_s21 = smov %s4000_s22 }
 0x55e   : > { %p20_p10 = scmp.ge.s32.totalorder %s23_s26, 4   ;;  %s5555_s22 = smov %s4004_s23 }
 0x55f   : > { %s5556_s23 = smov %s4122_s10  ;;  %s5557_s24 = smov %s4012_s25 }
 0x560   : > { %s5558_s25 = smov %s5560_s29  ;;  %22 = sbr.rel (!%p20_p10) target bundleno = 6 (0x6), region = 126 }
 0x567   :  { %3576 = vsyncpa [#allocation6], 1 }
 0x568   :  { %3578 = vsyncpa [#allocation6 + $0x1], 1 }
 0x569   :  { %3579 = vsyncpa [#allocation8], 1 }
 0x56a   :  { %3581 = vsyncpa [#allocation8 + $0x1], 1 }

</bundles_post_ra>
